<compile_context>
chip_gen: v6e
topology: v6e:2x2x1
jax: 0.10.0
libtpu: 0.0.40
codegen_flags: <defaults>
</compile_context>

<pallas_src>
import jax
import jax.numpy as jnp
from jax.experimental import pallas as pl
from jax.experimental.pallas import tpu as pltpu


# ------------------------------- the kernel -------------------------------- #
#
# Flat-layout geometry (per image):
#   conv1 out : acc1[oc, g],  g = oy*28 + ox   (valid oy,ox in [0,26))   726 cols
#   pool1 out : p1  [c,  k],  k = py*13 + px   (py,px in [0,13))         169 cols
#   conv2 out : acc2[oc, h],  h = qy*13 + qx   (valid qy,qx in [0,11))   141 cols
#   pool2 out : p2  [c,  m],  m = ry*5  + rx   (ry,rx in [0,5))           25 cols
# Pool selectors (passed in, one-hot): s1[g, k] = (g == 56*py + 2*px),
#                                      s2[h, m] = (h == 26*ry + 2*rx).

def _cnn_kernel(xf_ref, w1_ref, b1_ref, w2_ref, b2_ref, s1_ref, s2_ref,
                w3_ref, b3_ref, w4_ref, b4_ref, out_ref,
                acc1_ref, p1_ref, acc2_ref, p2_ref, feat_ref):
    f32 = jnp.float32

    # ---- conv1 (1 -> 16, 3x3, valid) + bias + ReLU: VPU broadcast-FMA ------ #
    acc1_ref[...] = jnp.broadcast_to(b1_ref[...], (16, 726))
    for i in range(3):
        for j in range(3):
            t = i * 3 + j                     # tap index
            s = i * 28 + j                    # flat shift in the 28-wide image
            # (16,1) * (1,726) broadcast multiply-accumulate on the VPU.
            acc1_ref[...] += w1_ref[t] * xf_ref[0, :, s:s + 726]
    acc1_ref[...] = jnp.maximum(acc1_ref[...], 0.0)

    # ---- maxpool 2x2 stride 2: dense 2x2 max + one-hot selection matmul ---- #
    md1 = jnp.maximum(
        jnp.maximum(acc1_ref[:, 0:697], acc1_ref[:, 1:698]),
        jnp.maximum(acc1_ref[:, 28:725], acc1_ref[:, 29:726]))
    p1_ref[...] = jnp.dot(md1, s1_ref[...], preferred_element_type=f32)

    # ---- conv2 (16 -> 16, 3x3, valid) + bias + ReLU: 9 small MXU dots ------ #
    acc2_ref[...] = jnp.broadcast_to(b2_ref[...], (16, 141))
    for i in range(3):
        for j in range(3):
            t = i * 3 + j
            s = i * 13 + j                    # flat shift in the 13-wide grid
            acc2_ref[...] += jnp.dot(w2_ref[t], p1_ref[:, s:s + 141],
                                     preferred_element_type=f32)
    acc2_ref[...] = jnp.maximum(acc2_ref[...], 0.0)

    # ---- maxpool 2x2 stride 2 ---------------------------------------------- #
    md2 = jnp.maximum(
        jnp.maximum(acc2_ref[:, 0:113], acc2_ref[:, 1:114]),
        jnp.maximum(acc2_ref[:, 13:126], acc2_ref[:, 14:127]))
    p2_ref[...] = jnp.dot(md2, s2_ref[...], preferred_element_type=f32)

    # ---- flatten (channel-major == torch .view(-1, 16*5*5)) ---------------- #
    for c in range(16):
        feat_ref[:, c * 25:(c + 1) * 25] = p2_ref[c:c + 1, :]

    # ---- l1 (400 -> 120) in bf16 on the MXU (f32 acc), then l2 (120 -> 10) -- #
    h = jnp.dot(feat_ref[...].astype(jnp.bfloat16), w3_ref[...],
                preferred_element_type=f32) + b3_ref[...]
    logits = jnp.dot(h, w4_ref[...], preferred_element_type=f32) + b4_ref[...]
    out_ref[0] = logits


# ------------------------------ the wrapper -------------------------------- #

def cnn_forward(x, params):
    """x: (B, 1, 28, 28) float32 NCHW -> logits (B, 10)."""
    B = x.shape[0]
    xf = x.reshape(B, 1, 28 * 28).astype(jnp.float32)          # flat image

    # Weight layout plumbing (tiny, weights only -- done once under jit).
    w1 = params["conv1_w"].reshape(16, 9).T.reshape(9, 16, 1)   # [tap, oc, 1]
    b1 = params["conv1_b"].reshape(16, 1)
    w2 = params["conv2_w"].transpose(2, 3, 0, 1).reshape(9, 16, 16)  # [tap,oc,ic]
    b2 = params["conv2_b"].reshape(16, 1)
    w3 = params["l1_w"].astype(jnp.bfloat16)                    # (400, 120)
    b3 = params["l1_b"].reshape(1, 120)
    w4 = params["l2_w"]                                         # (120, 10)
    b4 = params["l2_b"].reshape(1, 10)

    # One-hot pool-compaction selectors (constants, folded by XLA).
    k1 = jnp.arange(169)
    tgt1 = 56 * (k1 // 13) + 2 * (k1 % 13)
    s1 = (jnp.arange(697)[:, None] == tgt1[None, :]).astype(jnp.float32)
    k2 = jnp.arange(25)
    tgt2 = 26 * (k2 // 5) + 2 * (k2 % 5)
    s2 = (jnp.arange(113)[:, None] == tgt2[None, :]).astype(jnp.float32)

    out = pl.pallas_call(
        _cnn_kernel,
        out_shape=jax.ShapeDtypeStruct((B, 1, 10), jnp.float32),
        grid=(B,),
        in_specs=[
            pl.BlockSpec((1, 1, 784), lambda b: (b, 0, 0)),   # image
            pl.BlockSpec((9, 16, 1), lambda b: (0, 0, 0)),    # conv1 w
            pl.BlockSpec((16, 1), lambda b: (0, 0)),          # conv1 b
            pl.BlockSpec((9, 16, 16), lambda b: (0, 0, 0)),   # conv2 w
            pl.BlockSpec((16, 1), lambda b: (0, 0)),          # conv2 b
            pl.BlockSpec((697, 169), lambda b: (0, 0)),       # pool1 selector
            pl.BlockSpec((113, 25), lambda b: (0, 0)),        # pool2 selector
            pl.BlockSpec((400, 120), lambda b: (0, 0)),       # l1 w (bf16)
            pl.BlockSpec((1, 120), lambda b: (0, 0)),         # l1 b
            pl.BlockSpec((120, 10), lambda b: (0, 0)),        # l2 w
            pl.BlockSpec((1, 10), lambda b: (0, 0)),          # l2 b
        ],
        out_specs=pl.BlockSpec((1, 1, 10), lambda b: (b, 0, 0)),
        scratch_shapes=[
            pltpu.VMEM((16, 726), jnp.float32),   # conv1 out (flat, 28-wide)
            pltpu.VMEM((16, 169), jnp.float32),   # pool1 out (flat, 13-wide)
            pltpu.VMEM((16, 141), jnp.float32),   # conv2 out (flat, 13-wide)
            pltpu.VMEM((16, 25), jnp.float32),    # pool2 out (flat, 5-wide)
            pltpu.VMEM((1, 400), jnp.float32),    # flattened features
        ],
        compiler_params=pltpu.CompilerParams(
            dimension_semantics=("parallel",),
            vmem_limit_bytes=32 * 1024 * 1024),
    )(xf, w1, b1, w2, b2, s1, s2, w3, b3, w4, b4)
    # TODO(synk): for very large batches, a separate batch-tiled FC kernel
    # would use the MXU rows better than the per-image (M=1) dots here.
    return out.reshape(B, 10)


# --------------------------- synthetic parameters --------------------------- #

def init_params(key):
    """Deterministic synthetic parameters, PyTorch-like shapes."""
    ks = jax.random.split(key, 8)

    def uni(k, shape, fan_in):
        bound = 1.0 / jnp.sqrt(float(fan_in))
        return jax.random.uniform(k, shape, jnp.float32, -bound, bound)

    return {
        "conv1_w": uni(ks[0], (16, 1, 3, 3), 1 * 3 * 3),
        "conv1_b": uni(ks[1], (16,), 1 * 3 * 3),
        "conv2_w": uni(ks[2], (16, 16, 3, 3), 16 * 3 * 3),
        "conv2_b": uni(ks[3], (16,), 16 * 3 * 3),
        # Linear weights stored pre-transposed: (in_features, out_features).
        "l1_w": uni(ks[4], (16 * 5 * 5, 120), 16 * 5 * 5),
        "l1_b": uni(ks[5], (120,), 16 * 5 * 5),
        "l2_w": uni(ks[6], (120, 10), 120),
        "l2_b": uni(ks[7], (10,), 120),
    }


if __name__ == "__main__":
    key = jax.random.PRNGKey(0)
    k_params, k_x = jax.random.split(key)
    params = init_params(k_params)
    # MNIST-shaped input (required by the module's view(-1, 16*5*5)); batch=2.
    x = jax.random.normal(k_x, (2, 1, 28, 28), dtype=jnp.float32)

    out = jax.jit(cnn_forward)(x, params)
    out = jax.block_until_ready(out)
    assert out.shape == (2, 10) and out.dtype == jnp.float32
    print("KERNEL_OK")
</pallas_src>

<mosaic_0001>
module attributes {stable_mosaic.version = 11 : i64} {
  func.func @_cnn_kernel(%arg0: i32, %arg1: memref<1x1x784xf32, #tpu.memory_space<vmem>>, %arg2: memref<9x16x1xf32, #tpu.memory_space<vmem>>, %arg3: memref<16x1xf32, #tpu.memory_space<vmem>>, %arg4: memref<9x16x16xf32, #tpu.memory_space<vmem>>, %arg5: memref<16x1xf32, #tpu.memory_space<vmem>>, %arg6: memref<697x169xf32, #tpu.memory_space<vmem>>, %arg7: memref<113x25xf32, #tpu.memory_space<vmem>>, %arg8: memref<400x120xbf16, #tpu.memory_space<vmem>>, %arg9: memref<1x120xf32, #tpu.memory_space<vmem>>, %arg10: memref<120x10xf32, #tpu.memory_space<vmem>>, %arg11: memref<1x10xf32, #tpu.memory_space<vmem>>, %arg12: memref<1x1x10xf32, #tpu.memory_space<vmem>>, %arg13: memref<16x726xf32, #tpu.memory_space<vmem>>, %arg14: memref<16x169xf32, #tpu.memory_space<vmem>>, %arg15: memref<16x141xf32, #tpu.memory_space<vmem>>, %arg16: memref<16x25xf32, #tpu.memory_space<vmem>>, %arg17: memref<1x400xf32, #tpu.memory_space<vmem>>) attributes {dimension_semantics = [#tpu.dimension_semantics<parallel>], iteration_bounds = array<i64: 2>, scalar_prefetch = 0 : i64, scratch_operands = 5 : i64, tpu.core_type = #tpu.core_type<tc>, window_params = [{transform_indices = @transform_0, window_bounds = array<i64: 1, 1, 784>}, {pipeline_mode = #tpu.pipeline_mode<synchronous>, transform_indices = @transform_1, window_bounds = array<i64: 9, 16, 1>}, {pipeline_mode = #tpu.pipeline_mode<synchronous>, transform_indices = @transform_2, window_bounds = array<i64: 16, 1>}, {pipeline_mode = #tpu.pipeline_mode<synchronous>, transform_indices = @transform_3, window_bounds = array<i64: 9, 16, 16>}, {pipeline_mode = #tpu.pipeline_mode<synchronous>, transform_indices = @transform_4, window_bounds = array<i64: 16, 1>}, {pipeline_mode = #tpu.pipeline_mode<synchronous>, transform_indices = @transform_5, window_bounds = array<i64: 697, 169>}, {pipeline_mode = #tpu.pipeline_mode<synchronous>, transform_indices = @transform_6, window_bounds = array<i64: 113, 25>}, {pipeline_mode = #tpu.pipeline_mode<synchronous>, transform_indices = @transform_7, window_bounds = array<i64: 400, 120>}, {pipeline_mode = #tpu.pipeline_mode<synchronous>, transform_indices = @transform_8, window_bounds = array<i64: 1, 120>}, {pipeline_mode = #tpu.pipeline_mode<synchronous>, transform_indices = @transform_9, window_bounds = array<i64: 120, 10>}, {pipeline_mode = #tpu.pipeline_mode<synchronous>, transform_indices = @transform_10, window_bounds = array<i64: 1, 10>}, {transform_indices = @transform_11, window_bounds = array<i64: 1, 1, 10>}]} {
    %c0 = arith.constant 0 : index
    %c0_0 = arith.constant 0 : index
    %0 = vector.load %arg3[%c0, %c0_0] : memref<16x1xf32, #tpu.memory_space<vmem>>, vector<16x1xf32>
    %1 = vector.shape_cast %0 : vector<16x1xf32> to vector<16x1xf32>
    %2 = vector.broadcast %1 : vector<16x1xf32> to vector<16x726xf32>
    %c0_1 = arith.constant 0 : index
    %c0_2 = arith.constant 0 : index
    %3 = vector.load %arg13[%c0_1, %c0_2] : memref<16x726xf32, #tpu.memory_space<vmem>>, vector<16x726xf32>
    tpu.vector_store %arg13[%c0_1, %c0_2], %2 {strides = array<i32>} : memref<16x726xf32, #tpu.memory_space<vmem>>, vector<16x726xf32>,
    %c0_3 = arith.constant 0 : index
    %c0_4 = arith.constant 0 : index
    %4 = vector.load %arg13[%c0_3, %c0_4] : memref<16x726xf32, #tpu.memory_space<vmem>>, vector<16x726xf32>
    %c0_5 = arith.constant 0 : index
    %c0_6 = arith.constant 0 : index
    %c0_7 = arith.constant 0 : index
    %5 = vector.load %arg2[%c0_5, %c0_6, %c0_7] : memref<9x16x1xf32, #tpu.memory_space<vmem>>, vector<1x16x1xf32>
    %6 = vector.shape_cast %5 : vector<1x16x1xf32> to vector<16x1xf32>
    %c0_8 = arith.constant 0 : index
    %c0_9 = arith.constant 0 : index
    %c0_10 = arith.constant 0 : index
    %7 = vector.load %arg1[%c0_8, %c0_9, %c0_10] : memref<1x1x784xf32, #tpu.memory_space<vmem>>, vector<1x1x726xf32>
    %8 = vector.shape_cast %7 : vector<1x1x726xf32> to vector<1x726xf32>
    %9 = vector.broadcast %6 : vector<16x1xf32> to vector<16x726xf32>
    %10 = vector.broadcast %8 : vector<1x726xf32> to vector<16x726xf32>
    %11 = arith.mulf %9, %10 : vector<16x726xf32>
    %12 = arith.addf %4, %11 : vector<16x726xf32>
    %c0_11 = arith.constant 0 : index
    %c0_12 = arith.constant 0 : index
    %13 = vector.load %arg13[%c0_11, %c0_12] : memref<16x726xf32, #tpu.memory_space<vmem>>, vector<16x726xf32>
    tpu.vector_store %arg13[%c0_11, %c0_12], %12 {strides = array<i32>} : memref<16x726xf32, #tpu.memory_space<vmem>>, vector<16x726xf32>,
    %c0_13 = arith.constant 0 : index
    %c0_14 = arith.constant 0 : index
    %14 = vector.load %arg13[%c0_13, %c0_14] : memref<16x726xf32, #tpu.memory_space<vmem>>, vector<16x726xf32>
    %c1 = arith.constant 1 : index
    %c0_15 = arith.constant 0 : index
    %c0_16 = arith.constant 0 : index
    %15 = vector.load %arg2[%c1, %c0_15, %c0_16] : memref<9x16x1xf32, #tpu.memory_space<vmem>>, vector<1x16x1xf32>
    %16 = vector.shape_cast %15 : vector<1x16x1xf32> to vector<16x1xf32>
    %c0_17 = arith.constant 0 : index
    %c0_18 = arith.constant 0 : index
    %c1_19 = arith.constant 1 : index
    %17 = vector.load %arg1[%c0_17, %c0_18, %c1_19] : memref<1x1x784xf32, #tpu.memory_space<vmem>>, vector<1x1x726xf32>
    %18 = vector.shape_cast %17 : vector<1x1x726xf32> to vector<1x726xf32>
    %19 = vector.broadcast %16 : vector<16x1xf32> to vector<16x726xf32>
    %20 = vector.broadcast %18 : vector<1x726xf32> to vector<16x726xf32>
    %21 = arith.mulf %19, %20 : vector<16x726xf32>
    %22 = arith.addf %14, %21 : vector<16x726xf32>
    %c0_20 = arith.constant 0 : index
    %c0_21 = arith.constant 0 : index
    %23 = vector.load %arg13[%c0_20, %c0_21] : memref<16x726xf32, #tpu.memory_space<vmem>>, vector<16x726xf32>
    tpu.vector_store %arg13[%c0_20, %c0_21], %22 {strides = array<i32>} : memref<16x726xf32, #tpu.memory_space<vmem>>, vector<16x726xf32>,
    %c0_22 = arith.constant 0 : index
    %c0_23 = arith.constant 0 : index
    %24 = vector.load %arg13[%c0_22, %c0_23] : memref<16x726xf32, #tpu.memory_space<vmem>>, vector<16x726xf32>
    %c2 = arith.constant 2 : index
    %c0_24 = arith.constant 0 : index
    %c0_25 = arith.constant 0 : index
    %25 = vector.load %arg2[%c2, %c0_24, %c0_25] : memref<9x16x1xf32, #tpu.memory_space<vmem>>, vector<1x16x1xf32>
    %26 = vector.shape_cast %25 : vector<1x16x1xf32> to vector<16x1xf32>
    %c0_26 = arith.constant 0 : index
    %c0_27 = arith.constant 0 : index
    %c2_28 = arith.constant 2 : index
    %27 = vector.load %arg1[%c0_26, %c0_27, %c2_28] : memref<1x1x784xf32, #tpu.memory_space<vmem>>, vector<1x1x726xf32>
    %28 = vector.shape_cast %27 : vector<1x1x726xf32> to vector<1x726xf32>
    %29 = vector.broadcast %26 : vector<16x1xf32> to vector<16x726xf32>
    %30 = vector.broadcast %28 : vector<1x726xf32> to vector<16x726xf32>
    %31 = arith.mulf %29, %30 : vector<16x726xf32>
    %32 = arith.addf %24, %31 : vector<16x726xf32>
    %c0_29 = arith.constant 0 : index
    %c0_30 = arith.constant 0 : index
    %33 = vector.load %arg13[%c0_29, %c0_30] : memref<16x726xf32, #tpu.memory_space<vmem>>, vector<16x726xf32>
    tpu.vector_store %arg13[%c0_29, %c0_30], %32 {strides = array<i32>} : memref<16x726xf32, #tpu.memory_space<vmem>>, vector<16x726xf32>,
    %c0_31 = arith.constant 0 : index
    %c0_32 = arith.constant 0 : index
    %34 = vector.load %arg13[%c0_31, %c0_32] : memref<16x726xf32, #tpu.memory_space<vmem>>, vector<16x726xf32>
    %c3 = arith.constant 3 : index
    %c0_33 = arith.constant 0 : index
    %c0_34 = arith.constant 0 : index
    %35 = vector.load %arg2[%c3, %c0_33, %c0_34] : memref<9x16x1xf32, #tpu.memory_space<vmem>>, vector<1x16x1xf32>
    %36 = vector.shape_cast %35 : vector<1x16x1xf32> to vector<16x1xf32>
    %c0_35 = arith.constant 0 : index
    %c0_36 = arith.constant 0 : index
    %c28 = arith.constant 28 : index
    %37 = vector.load %arg1[%c0_35, %c0_36, %c28] : memref<1x1x784xf32, #tpu.memory_space<vmem>>, vector<1x1x726xf32>
    %38 = vector.shape_cast %37 : vector<1x1x726xf32> to vector<1x726xf32>
    %39 = vector.broadcast %36 : vector<16x1xf32> to vector<16x726xf32>
    %40 = vector.broadcast %38 : vector<1x726xf32> to vector<16x726xf32>
    %41 = arith.mulf %39, %40 : vector<16x726xf32>
    %42 = arith.addf %34, %41 : vector<16x726xf32>
    %c0_37 = arith.constant 0 : index
    %c0_38 = arith.constant 0 : index
    %43 = vector.load %arg13[%c0_37, %c0_38] : memref<16x726xf32, #tpu.memory_space<vmem>>, vector<16x726xf32>
    tpu.vector_store %arg13[%c0_37, %c0_38], %42 {strides = array<i32>} : memref<16x726xf32, #tpu.memory_space<vmem>>, vector<16x726xf32>,
    %c0_39 = arith.constant 0 : index
    %c0_40 = arith.constant 0 : index
    %44 = vector.load %arg13[%c0_39, %c0_40] : memref<16x726xf32, #tpu.memory_space<vmem>>, vector<16x726xf32>
    %c4 = arith.constant 4 : index
    %c0_41 = arith.constant 0 : index
    %c0_42 = arith.constant 0 : index
    %45 = vector.load %arg2[%c4, %c0_41, %c0_42] : memref<9x16x1xf32, #tpu.memory_space<vmem>>, vector<1x16x1xf32>
    %46 = vector.shape_cast %45 : vector<1x16x1xf32> to vector<16x1xf32>
    %c0_43 = arith.constant 0 : index
    %c0_44 = arith.constant 0 : index
    %c29 = arith.constant 29 : index
    %47 = vector.load %arg1[%c0_43, %c0_44, %c29] : memref<1x1x784xf32, #tpu.memory_space<vmem>>, vector<1x1x726xf32>
    %48 = vector.shape_cast %47 : vector<1x1x726xf32> to vector<1x726xf32>
    %49 = vector.broadcast %46 : vector<16x1xf32> to vector<16x726xf32>
    %50 = vector.broadcast %48 : vector<1x726xf32> to vector<16x726xf32>
    %51 = arith.mulf %49, %50 : vector<16x726xf32>
    %52 = arith.addf %44, %51 : vector<16x726xf32>
    %c0_45 = arith.constant 0 : index
    %c0_46 = arith.constant 0 : index
    %53 = vector.load %arg13[%c0_45, %c0_46] : memref<16x726xf32, #tpu.memory_space<vmem>>, vector<16x726xf32>
    tpu.vector_store %arg13[%c0_45, %c0_46], %52 {strides = array<i32>} : memref<16x726xf32, #tpu.memory_space<vmem>>, vector<16x726xf32>,
    %c0_47 = arith.constant 0 : index
    %c0_48 = arith.constant 0 : index
    %54 = vector.load %arg13[%c0_47, %c0_48] : memref<16x726xf32, #tpu.memory_space<vmem>>, vector<16x726xf32>
    %c5 = arith.constant 5 : index
    %c0_49 = arith.constant 0 : index
    %c0_50 = arith.constant 0 : index
    %55 = vector.load %arg2[%c5, %c0_49, %c0_50] : memref<9x16x1xf32, #tpu.memory_space<vmem>>, vector<1x16x1xf32>
    %56 = vector.shape_cast %55 : vector<1x16x1xf32> to vector<16x1xf32>
    %c0_51 = arith.constant 0 : index
    %c0_52 = arith.constant 0 : index
    %c30 = arith.constant 30 : index
    %57 = vector.load %arg1[%c0_51, %c0_52, %c30] : memref<1x1x784xf32, #tpu.memory_space<vmem>>, vector<1x1x726xf32>
    %58 = vector.shape_cast %57 : vector<1x1x726xf32> to vector<1x726xf32>
    %59 = vector.broadcast %56 : vector<16x1xf32> to vector<16x726xf32>
    %60 = vector.broadcast %58 : vector<1x726xf32> to vector<16x726xf32>
    %61 = arith.mulf %59, %60 : vector<16x726xf32>
    %62 = arith.addf %54, %61 : vector<16x726xf32>
    %c0_53 = arith.constant 0 : index
    %c0_54 = arith.constant 0 : index
    %63 = vector.load %arg13[%c0_53, %c0_54] : memref<16x726xf32, #tpu.memory_space<vmem>>, vector<16x726xf32>
    tpu.vector_store %arg13[%c0_53, %c0_54], %62 {strides = array<i32>} : memref<16x726xf32, #tpu.memory_space<vmem>>, vector<16x726xf32>,
    %c0_55 = arith.constant 0 : index
    %c0_56 = arith.constant 0 : index
    %64 = vector.load %arg13[%c0_55, %c0_56] : memref<16x726xf32, #tpu.memory_space<vmem>>, vector<16x726xf32>
    %c6 = arith.constant 6 : index
    %c0_57 = arith.constant 0 : index
    %c0_58 = arith.constant 0 : index
    %65 = vector.load %arg2[%c6, %c0_57, %c0_58] : memref<9x16x1xf32, #tpu.memory_space<vmem>>, vector<1x16x1xf32>
    %66 = vector.shape_cast %65 : vector<1x16x1xf32> to vector<16x1xf32>
    %c0_59 = arith.constant 0 : index
    %c0_60 = arith.constant 0 : index
    %c56 = arith.constant 56 : index
    %67 = vector.load %arg1[%c0_59, %c0_60, %c56] : memref<1x1x784xf32, #tpu.memory_space<vmem>>, vector<1x1x726xf32>
    %68 = vector.shape_cast %67 : vector<1x1x726xf32> to vector<1x726xf32>
    %69 = vector.broadcast %66 : vector<16x1xf32> to vector<16x726xf32>
    %70 = vector.broadcast %68 : vector<1x726xf32> to vector<16x726xf32>
    %71 = arith.mulf %69, %70 : vector<16x726xf32>
    %72 = arith.addf %64, %71 : vector<16x726xf32>
    %c0_61 = arith.constant 0 : index
    %c0_62 = arith.constant 0 : index
    %73 = vector.load %arg13[%c0_61, %c0_62] : memref<16x726xf32, #tpu.memory_space<vmem>>, vector<16x726xf32>
    tpu.vector_store %arg13[%c0_61, %c0_62], %72 {strides = array<i32>} : memref<16x726xf32, #tpu.memory_space<vmem>>, vector<16x726xf32>,
    %c0_63 = arith.constant 0 : index
    %c0_64 = arith.constant 0 : index
    %74 = vector.load %arg13[%c0_63, %c0_64] : memref<16x726xf32, #tpu.memory_space<vmem>>, vector<16x726xf32>
    %c7 = arith.constant 7 : index
    %c0_65 = arith.constant 0 : index
    %c0_66 = arith.constant 0 : index
    %75 = vector.load %arg2[%c7, %c0_65, %c0_66] : memref<9x16x1xf32, #tpu.memory_space<vmem>>, vector<1x16x1xf32>
    %76 = vector.shape_cast %75 : vector<1x16x1xf32> to vector<16x1xf32>
    %c0_67 = arith.constant 0 : index
    %c0_68 = arith.constant 0 : index
    %c57 = arith.constant 57 : index
    %77 = vector.load %arg1[%c0_67, %c0_68, %c57] : memref<1x1x784xf32, #tpu.memory_space<vmem>>, vector<1x1x726xf32>
    %78 = vector.shape_cast %77 : vector<1x1x726xf32> to vector<1x726xf32>
    %79 = vector.broadcast %76 : vector<16x1xf32> to vector<16x726xf32>
    %80 = vector.broadcast %78 : vector<1x726xf32> to vector<16x726xf32>
    %81 = arith.mulf %79, %80 : vector<16x726xf32>
    %82 = arith.addf %74, %81 : vector<16x726xf32>
    %c0_69 = arith.constant 0 : index
    %c0_70 = arith.constant 0 : index
    %83 = vector.load %arg13[%c0_69, %c0_70] : memref<16x726xf32, #tpu.memory_space<vmem>>, vector<16x726xf32>
    tpu.vector_store %arg13[%c0_69, %c0_70], %82 {strides = array<i32>} : memref<16x726xf32, #tpu.memory_space<vmem>>, vector<16x726xf32>,
    %c0_71 = arith.constant 0 : index
    %c0_72 = arith.constant 0 : index
    %84 = vector.load %arg13[%c0_71, %c0_72] : memref<16x726xf32, #tpu.memory_space<vmem>>, vector<16x726xf32>
    %c8 = arith.constant 8 : index
    %c0_73 = arith.constant 0 : index
    %c0_74 = arith.constant 0 : index
    %85 = vector.load %arg2[%c8, %c0_73, %c0_74] : memref<9x16x1xf32, #tpu.memory_space<vmem>>, vector<1x16x1xf32>
    %86 = vector.shape_cast %85 : vector<1x16x1xf32> to vector<16x1xf32>
    %c0_75 = arith.constant 0 : index
    %c0_76 = arith.constant 0 : index
    %c58 = arith.constant 58 : index
    %87 = vector.load %arg1[%c0_75, %c0_76, %c58] : memref<1x1x784xf32, #tpu.memory_space<vmem>>, vector<1x1x726xf32>
    %88 = vector.shape_cast %87 : vector<1x1x726xf32> to vector<1x726xf32>
    %89 = vector.broadcast %86 : vector<16x1xf32> to vector<16x726xf32>
    %90 = vector.broadcast %88 : vector<1x726xf32> to vector<16x726xf32>
    %91 = arith.mulf %89, %90 : vector<16x726xf32>
    %92 = arith.addf %84, %91 : vector<16x726xf32>
    %c0_77 = arith.constant 0 : index
    %c0_78 = arith.constant 0 : index
    %93 = vector.load %arg13[%c0_77, %c0_78] : memref<16x726xf32, #tpu.memory_space<vmem>>, vector<16x726xf32>
    tpu.vector_store %arg13[%c0_77, %c0_78], %92 {strides = array<i32>} : memref<16x726xf32, #tpu.memory_space<vmem>>, vector<16x726xf32>,
    %c0_79 = arith.constant 0 : index
    %c0_80 = arith.constant 0 : index
    %94 = vector.load %arg13[%c0_79, %c0_80] : memref<16x726xf32, #tpu.memory_space<vmem>>, vector<16x726xf32>
    %cst = arith.constant 0.000000e+00 : f32
    %95 = vector.broadcast %cst : f32 to vector<16x726xf32>
    %96 = arith.maximumf %94, %95 : vector<16x726xf32>
    %c0_81 = arith.constant 0 : index
    %c0_82 = arith.constant 0 : index
    %97 = vector.load %arg13[%c0_81, %c0_82] : memref<16x726xf32, #tpu.memory_space<vmem>>, vector<16x726xf32>
    tpu.vector_store %arg13[%c0_81, %c0_82], %96 {strides = array<i32>} : memref<16x726xf32, #tpu.memory_space<vmem>>, vector<16x726xf32>,
    %c0_83 = arith.constant 0 : index
    %c0_84 = arith.constant 0 : index
    %98 = vector.load %arg13[%c0_83, %c0_84] : memref<16x726xf32, #tpu.memory_space<vmem>>, vector<16x697xf32>
    %c0_85 = arith.constant 0 : index
    %c1_86 = arith.constant 1 : index
    %99 = vector.load %arg13[%c0_85, %c1_86] : memref<16x726xf32, #tpu.memory_space<vmem>>, vector<16x697xf32>
    %100 = arith.maximumf %98, %99 : vector<16x697xf32>
    %c0_87 = arith.constant 0 : index
    %c28_88 = arith.constant 28 : index
    %101 = vector.load %arg13[%c0_87, %c28_88] : memref<16x726xf32, #tpu.memory_space<vmem>>, vector<16x697xf32>
    %c0_89 = arith.constant 0 : index
    %c29_90 = arith.constant 29 : index
    %102 = vector.load %arg13[%c0_89, %c29_90] : memref<16x726xf32, #tpu.memory_space<vmem>>, vector<16x697xf32>
    %103 = arith.maximumf %101, %102 : vector<16x697xf32>
    %104 = arith.maximumf %100, %103 : vector<16x697xf32>
    %c0_91 = arith.constant 0 : index
    %c0_92 = arith.constant 0 : index
    %105 = vector.load %arg6[%c0_91, %c0_92] : memref<697x169xf32, #tpu.memory_space<vmem>>, vector<697x169xf32>
    %cst_93 = arith.constant dense<0.000000e+00> : vector<16x169xf32>
    %106 = tpu.matmul %104, %105, %cst_93 {dimension_numbers = #tpu.dot_dimension_numbers<[1], [0], [0], [1], [0, 0, 1, 1], [], []>} : vector<16x697xf32>, vector<697x169xf32>, vector<16x169xf32> -> vector<16x169xf32>
    %c0_94 = arith.constant 0 : index
    %c0_95 = arith.constant 0 : index
    %107 = vector.load %arg14[%c0_94, %c0_95] : memref<16x169xf32, #tpu.memory_space<vmem>>, vector<16x169xf32>
    tpu.vector_store %arg14[%c0_94, %c0_95], %106 {strides = array<i32>} : memref<16x169xf32, #tpu.memory_space<vmem>>, vector<16x169xf32>,
    %c0_96 = arith.constant 0 : index
    %c0_97 = arith.constant 0 : index
    %108 = vector.load %arg5[%c0_96, %c0_97] : memref<16x1xf32, #tpu.memory_space<vmem>>, vector<16x1xf32>
    %109 = vector.shape_cast %108 : vector<16x1xf32> to vector<16x1xf32>
    %110 = vector.broadcast %109 : vector<16x1xf32> to vector<16x141xf32>
    %c0_98 = arith.constant 0 : index
    %c0_99 = arith.constant 0 : index
    %111 = vector.load %arg15[%c0_98, %c0_99] : memref<16x141xf32, #tpu.memory_space<vmem>>, vector<16x141xf32>
    tpu.vector_store %arg15[%c0_98, %c0_99], %110 {strides = array<i32>} : memref<16x141xf32, #tpu.memory_space<vmem>>, vector<16x141xf32>,
    %c0_100 = arith.constant 0 : index
    %c0_101 = arith.constant 0 : index
    %112 = vector.load %arg15[%c0_100, %c0_101] : memref<16x141xf32, #tpu.memory_space<vmem>>, vector<16x141xf32>
    %c0_102 = arith.constant 0 : index
    %c0_103 = arith.constant 0 : index
    %c0_104 = arith.constant 0 : index
    %113 = vector.load %arg4[%c0_102, %c0_103, %c0_104] : memref<9x16x16xf32, #tpu.memory_space<vmem>>, vector<1x16x16xf32>
    %114 = vector.shape_cast %113 : vector<1x16x16xf32> to vector<16x16xf32>
    %c0_105 = arith.constant 0 : index
    %c0_106 = arith.constant 0 : index
    %115 = vector.load %arg14[%c0_105, %c0_106] : memref<16x169xf32, #tpu.memory_space<vmem>>, vector<16x141xf32>
    %cst_107 = arith.constant dense<0.000000e+00> : vector<16x141xf32>
    %116 = tpu.matmul %114, %115, %cst_107 {dimension_numbers = #tpu.dot_dimension_numbers<[1], [0], [0], [1], [0, 0, 1, 1], [], []>} : vector<16x16xf32>, vector<16x141xf32>, vector<16x141xf32> -> vector<16x141xf32>
    %117 = arith.addf %112, %116 : vector<16x141xf32>
    %c0_108 = arith.constant 0 : index
    %c0_109 = arith.constant 0 : index
    %118 = vector.load %arg15[%c0_108, %c0_109] : memref<16x141xf32, #tpu.memory_space<vmem>>, vector<16x141xf32>
    tpu.vector_store %arg15[%c0_108, %c0_109], %117 {strides = array<i32>} : memref<16x141xf32, #tpu.memory_space<vmem>>, vector<16x141xf32>,
    %c0_110 = arith.constant 0 : index
    %c0_111 = arith.constant 0 : index
    %119 = vector.load %arg15[%c0_110, %c0_111] : memref<16x141xf32, #tpu.memory_space<vmem>>, vector<16x141xf32>
    %c1_112 = arith.constant 1 : index
    %c0_113 = arith.constant 0 : index
    %c0_114 = arith.constant 0 : index
    %120 = vector.load %arg4[%c1_112, %c0_113, %c0_114] : memref<9x16x16xf32, #tpu.memory_space<vmem>>, vector<1x16x16xf32>
    %121 = vector.shape_cast %120 : vector<1x16x16xf32> to vector<16x16xf32>
    %c0_115 = arith.constant 0 : index
    %c1_116 = arith.constant 1 : index
    %122 = vector.load %arg14[%c0_115, %c1_116] : memref<16x169xf32, #tpu.memory_space<vmem>>, vector<16x141xf32>
    %cst_117 = arith.constant dense<0.000000e+00> : vector<16x141xf32>
    %123 = tpu.matmul %121, %122, %cst_117 {dimension_numbers = #tpu.dot_dimension_numbers<[1], [0], [0], [1], [0, 0, 1, 1], [], []>} : vector<16x16xf32>, vector<16x141xf32>, vector<16x141xf32> -> vector<16x141xf32>
    %124 = arith.addf %119, %123 : vector<16x141xf32>
    %c0_118 = arith.constant 0 : index
    %c0_119 = arith.constant 0 : index
    %125 = vector.load %arg15[%c0_118, %c0_119] : memref<16x141xf32, #tpu.memory_space<vmem>>, vector<16x141xf32>
    tpu.vector_store %arg15[%c0_118, %c0_119], %124 {strides = array<i32>} : memref<16x141xf32, #tpu.memory_space<vmem>>, vector<16x141xf32>,
    %c0_120 = arith.constant 0 : index
    %c0_121 = arith.constant 0 : index
    %126 = vector.load %arg15[%c0_120, %c0_121] : memref<16x141xf32, #tpu.memory_space<vmem>>, vector<16x141xf32>
    %c2_122 = arith.constant 2 : index
    %c0_123 = arith.constant 0 : index
    %c0_124 = arith.constant 0 : index
    %127 = vector.load %arg4[%c2_122, %c0_123, %c0_124] : memref<9x16x16xf32, #tpu.memory_space<vmem>>, vector<1x16x16xf32>
    %128 = vector.shape_cast %127 : vector<1x16x16xf32> to vector<16x16xf32>
    %c0_125 = arith.constant 0 : index
    %c2_126 = arith.constant 2 : index
    %129 = vector.load %arg14[%c0_125, %c2_126] : memref<16x169xf32, #tpu.memory_space<vmem>>, vector<16x141xf32>
    %cst_127 = arith.constant dense<0.000000e+00> : vector<16x141xf32>
    %130 = tpu.matmul %128, %129, %cst_127 {dimension_numbers = #tpu.dot_dimension_numbers<[1], [0], [0], [1], [0, 0, 1, 1], [], []>} : vector<16x16xf32>, vector<16x141xf32>, vector<16x141xf32> -> vector<16x141xf32>
    %131 = arith.addf %126, %130 : vector<16x141xf32>
    %c0_128 = arith.constant 0 : index
    %c0_129 = arith.constant 0 : index
    %132 = vector.load %arg15[%c0_128, %c0_129] : memref<16x141xf32, #tpu.memory_space<vmem>>, vector<16x141xf32>
    tpu.vector_store %arg15[%c0_128, %c0_129], %131 {strides = array<i32>} : memref<16x141xf32, #tpu.memory_space<vmem>>, vector<16x141xf32>,
    %c0_130 = arith.constant 0 : index
    %c0_131 = arith.constant 0 : index
    %133 = vector.load %arg15[%c0_130, %c0_131] : memref<16x141xf32, #tpu.memory_space<vmem>>, vector<16x141xf32>
    %c3_132 = arith.constant 3 : index
    %c0_133 = arith.constant 0 : index
    %c0_134 = arith.constant 0 : index
    %134 = vector.load %arg4[%c3_132, %c0_133, %c0_134] : memref<9x16x16xf32, #tpu.memory_space<vmem>>, vector<1x16x16xf32>
    %135 = vector.shape_cast %134 : vector<1x16x16xf32> to vector<16x16xf32>
    %c0_135 = arith.constant 0 : index
    %c13 = arith.constant 13 : index
    %136 = vector.load %arg14[%c0_135, %c13] : memref<16x169xf32, #tpu.memory_space<vmem>>, vector<16x141xf32>
    %cst_136 = arith.constant dense<0.000000e+00> : vector<16x141xf32>
    %137 = tpu.matmul %135, %136, %cst_136 {dimension_numbers = #tpu.dot_dimension_numbers<[1], [0], [0], [1], [0, 0, 1, 1], [], []>} : vector<16x16xf32>, vector<16x141xf32>, vector<16x141xf32> -> vector<16x141xf32>
    %138 = arith.addf %133, %137 : vector<16x141xf32>
    %c0_137 = arith.constant 0 : index
    %c0_138 = arith.constant 0 : index
    %139 = vector.load %arg15[%c0_137, %c0_138] : memref<16x141xf32, #tpu.memory_space<vmem>>, vector<16x141xf32>
    tpu.vector_store %arg15[%c0_137, %c0_138], %138 {strides = array<i32>} : memref<16x141xf32, #tpu.memory_space<vmem>>, vector<16x141xf32>,
    %c0_139 = arith.constant 0 : index
    %c0_140 = arith.constant 0 : index
    %140 = vector.load %arg15[%c0_139, %c0_140] : memref<16x141xf32, #tpu.memory_space<vmem>>, vector<16x141xf32>
    %c4_141 = arith.constant 4 : index
    %c0_142 = arith.constant 0 : index
    %c0_143 = arith.constant 0 : index
    %141 = vector.load %arg4[%c4_141, %c0_142, %c0_143] : memref<9x16x16xf32, #tpu.memory_space<vmem>>, vector<1x16x16xf32>
    %142 = vector.shape_cast %141 : vector<1x16x16xf32> to vector<16x16xf32>
    %c0_144 = arith.constant 0 : index
    %c14 = arith.constant 14 : index
    %143 = vector.load %arg14[%c0_144, %c14] : memref<16x169xf32, #tpu.memory_space<vmem>>, vector<16x141xf32>
    %cst_145 = arith.constant dense<0.000000e+00> : vector<16x141xf32>
    %144 = tpu.matmul %142, %143, %cst_145 {dimension_numbers = #tpu.dot_dimension_numbers<[1], [0], [0], [1], [0, 0, 1, 1], [], []>} : vector<16x16xf32>, vector<16x141xf32>, vector<16x141xf32> -> vector<16x141xf32>
    %145 = arith.addf %140, %144 : vector<16x141xf32>
    %c0_146 = arith.constant 0 : index
    %c0_147 = arith.constant 0 : index
    %146 = vector.load %arg15[%c0_146, %c0_147] : memref<16x141xf32, #tpu.memory_space<vmem>>, vector<16x141xf32>
    tpu.vector_store %arg15[%c0_146, %c0_147], %145 {strides = array<i32>} : memref<16x141xf32, #tpu.memory_space<vmem>>, vector<16x141xf32>,
    %c0_148 = arith.constant 0 : index
    %c0_149 = arith.constant 0 : index
    %147 = vector.load %arg15[%c0_148, %c0_149] : memref<16x141xf32, #tpu.memory_space<vmem>>, vector<16x141xf32>
    %c5_150 = arith.constant 5 : index
    %c0_151 = arith.constant 0 : index
    %c0_152 = arith.constant 0 : index
    %148 = vector.load %arg4[%c5_150, %c0_151, %c0_152] : memref<9x16x16xf32, #tpu.memory_space<vmem>>, vector<1x16x16xf32>
    %149 = vector.shape_cast %148 : vector<1x16x16xf32> to vector<16x16xf32>
    %c0_153 = arith.constant 0 : index
    %c15 = arith.constant 15 : index
    %150 = vector.load %arg14[%c0_153, %c15] : memref<16x169xf32, #tpu.memory_space<vmem>>, vector<16x141xf32>
    %cst_154 = arith.constant dense<0.000000e+00> : vector<16x141xf32>
    %151 = tpu.matmul %149, %150, %cst_154 {dimension_numbers = #tpu.dot_dimension_numbers<[1], [0], [0], [1], [0, 0, 1, 1], [], []>} : vector<16x16xf32>, vector<16x141xf32>, vector<16x141xf32> -> vector<16x141xf32>
    %152 = arith.addf %147, %151 : vector<16x141xf32>
    %c0_155 = arith.constant 0 : index
    %c0_156 = arith.constant 0 : index
    %153 = vector.load %arg15[%c0_155, %c0_156] : memref<16x141xf32, #tpu.memory_space<vmem>>, vector<16x141xf32>
    tpu.vector_store %arg15[%c0_155, %c0_156], %152 {strides = array<i32>} : memref<16x141xf32, #tpu.memory_space<vmem>>, vector<16x141xf32>,
    %c0_157 = arith.constant 0 : index
    %c0_158 = arith.constant 0 : index
    %154 = vector.load %arg15[%c0_157, %c0_158] : memref<16x141xf32, #tpu.memory_space<vmem>>, vector<16x141xf32>
    %c6_159 = arith.constant 6 : index
    %c0_160 = arith.constant 0 : index
    %c0_161 = arith.constant 0 : index
    %155 = vector.load %arg4[%c6_159, %c0_160, %c0_161] : memref<9x16x16xf32, #tpu.memory_space<vmem>>, vector<1x16x16xf32>
    %156 = vector.shape_cast %155 : vector<1x16x16xf32> to vector<16x16xf32>
    %c0_162 = arith.constant 0 : index
    %c26 = arith.constant 26 : index
    %157 = vector.load %arg14[%c0_162, %c26] : memref<16x169xf32, #tpu.memory_space<vmem>>, vector<16x141xf32>
    %cst_163 = arith.constant dense<0.000000e+00> : vector<16x141xf32>
    %158 = tpu.matmul %156, %157, %cst_163 {dimension_numbers = #tpu.dot_dimension_numbers<[1], [0], [0], [1], [0, 0, 1, 1], [], []>} : vector<16x16xf32>, vector<16x141xf32>, vector<16x141xf32> -> vector<16x141xf32>
    %159 = arith.addf %154, %158 : vector<16x141xf32>
    %c0_164 = arith.constant 0 : index
    %c0_165 = arith.constant 0 : index
    %160 = vector.load %arg15[%c0_164, %c0_165] : memref<16x141xf32, #tpu.memory_space<vmem>>, vector<16x141xf32>
    tpu.vector_store %arg15[%c0_164, %c0_165], %159 {strides = array<i32>} : memref<16x141xf32, #tpu.memory_space<vmem>>, vector<16x141xf32>,
    %c0_166 = arith.constant 0 : index
    %c0_167 = arith.constant 0 : index
    %161 = vector.load %arg15[%c0_166, %c0_167] : memref<16x141xf32, #tpu.memory_space<vmem>>, vector<16x141xf32>
    %c7_168 = arith.constant 7 : index
    %c0_169 = arith.constant 0 : index
    %c0_170 = arith.constant 0 : index
    %162 = vector.load %arg4[%c7_168, %c0_169, %c0_170] : memref<9x16x16xf32, #tpu.memory_space<vmem>>, vector<1x16x16xf32>
    %163 = vector.shape_cast %162 : vector<1x16x16xf32> to vector<16x16xf32>
    %c0_171 = arith.constant 0 : index
    %c27 = arith.constant 27 : index
    %164 = vector.load %arg14[%c0_171, %c27] : memref<16x169xf32, #tpu.memory_space<vmem>>, vector<16x141xf32>
    %cst_172 = arith.constant dense<0.000000e+00> : vector<16x141xf32>
    %165 = tpu.matmul %163, %164, %cst_172 {dimension_numbers = #tpu.dot_dimension_numbers<[1], [0], [0], [1], [0, 0, 1, 1], [], []>} : vector<16x16xf32>, vector<16x141xf32>, vector<16x141xf32> -> vector<16x141xf32>
    %166 = arith.addf %161, %165 : vector<16x141xf32>
    %c0_173 = arith.constant 0 : index
    %c0_174 = arith.constant 0 : index
    %167 = vector.load %arg15[%c0_173, %c0_174] : memref<16x141xf32, #tpu.memory_space<vmem>>, vector<16x141xf32>
    tpu.vector_store %arg15[%c0_173, %c0_174], %166 {strides = array<i32>} : memref<16x141xf32, #tpu.memory_space<vmem>>, vector<16x141xf32>,
    %c0_175 = arith.constant 0 : index
    %c0_176 = arith.constant 0 : index
    %168 = vector.load %arg15[%c0_175, %c0_176] : memref<16x141xf32, #tpu.memory_space<vmem>>, vector<16x141xf32>
    %c8_177 = arith.constant 8 : index
    %c0_178 = arith.constant 0 : index
    %c0_179 = arith.constant 0 : index
    %169 = vector.load %arg4[%c8_177, %c0_178, %c0_179] : memref<9x16x16xf32, #tpu.memory_space<vmem>>, vector<1x16x16xf32>
    %170 = vector.shape_cast %169 : vector<1x16x16xf32> to vector<16x16xf32>
    %c0_180 = arith.constant 0 : index
    %c28_181 = arith.constant 28 : index
    %171 = vector.load %arg14[%c0_180, %c28_181] : memref<16x169xf32, #tpu.memory_space<vmem>>, vector<16x141xf32>
    %cst_182 = arith.constant dense<0.000000e+00> : vector<16x141xf32>
    %172 = tpu.matmul %170, %171, %cst_182 {dimension_numbers = #tpu.dot_dimension_numbers<[1], [0], [0], [1], [0, 0, 1, 1], [], []>} : vector<16x16xf32>, vector<16x141xf32>, vector<16x141xf32> -> vector<16x141xf32>
    %173 = arith.addf %168, %172 : vector<16x141xf32>
    %c0_183 = arith.constant 0 : index
    %c0_184 = arith.constant 0 : index
    %174 = vector.load %arg15[%c0_183, %c0_184] : memref<16x141xf32, #tpu.memory_space<vmem>>, vector<16x141xf32>
    tpu.vector_store %arg15[%c0_183, %c0_184], %173 {strides = array<i32>} : memref<16x141xf32, #tpu.memory_space<vmem>>, vector<16x141xf32>,
    %c0_185 = arith.constant 0 : index
    %c0_186 = arith.constant 0 : index
    %175 = vector.load %arg15[%c0_185, %c0_186] : memref<16x141xf32, #tpu.memory_space<vmem>>, vector<16x141xf32>
    %cst_187 = arith.constant 0.000000e+00 : f32
    %176 = vector.broadcast %cst_187 : f32 to vector<16x141xf32>
    %177 = arith.maximumf %175, %176 : vector<16x141xf32>
    %c0_188 = arith.constant 0 : index
    %c0_189 = arith.constant 0 : index
    %178 = vector.load %arg15[%c0_188, %c0_189] : memref<16x141xf32, #tpu.memory_space<vmem>>, vector<16x141xf32>
    tpu.vector_store %arg15[%c0_188, %c0_189], %177 {strides = array<i32>} : memref<16x141xf32, #tpu.memory_space<vmem>>, vector<16x141xf32>,
    %c0_190 = arith.constant 0 : index
    %c0_191 = arith.constant 0 : index
    %179 = vector.load %arg15[%c0_190, %c0_191] : memref<16x141xf32, #tpu.memory_space<vmem>>, vector<16x113xf32>
    %c0_192 = arith.constant 0 : index
    %c1_193 = arith.constant 1 : index
    %180 = vector.load %arg15[%c0_192, %c1_193] : memref<16x141xf32, #tpu.memory_space<vmem>>, vector<16x113xf32>
    %181 = arith.maximumf %179, %180 : vector<16x113xf32>
    %c0_194 = arith.constant 0 : index
    %c13_195 = arith.constant 13 : index
    %182 = vector.load %arg15[%c0_194, %c13_195] : memref<16x141xf32, #tpu.memory_space<vmem>>, vector<16x113xf32>
    %c0_196 = arith.constant 0 : index
    %c14_197 = arith.constant 14 : index
    %183 = vector.load %arg15[%c0_196, %c14_197] : memref<16x141xf32, #tpu.memory_space<vmem>>, vector<16x113xf32>
    %184 = arith.maximumf %182, %183 : vector<16x113xf32>
    %185 = arith.maximumf %181, %184 : vector<16x113xf32>
    %c0_198 = arith.constant 0 : index
    %c0_199 = arith.constant 0 : index
    %186 = vector.load %arg7[%c0_198, %c0_199] : memref<113x25xf32, #tpu.memory_space<vmem>>, vector<113x25xf32>
    %cst_200 = arith.constant dense<0.000000e+00> : vector<16x25xf32>
    %187 = tpu.matmul %185, %186, %cst_200 {dimension_numbers = #tpu.dot_dimension_numbers<[1], [0], [0], [1], [0, 0, 1, 1], [], []>} : vector<16x113xf32>, vector<113x25xf32>, vector<16x25xf32> -> vector<16x25xf32>
    %c0_201 = arith.constant 0 : index
    %c0_202 = arith.constant 0 : index
    %188 = vector.load %arg16[%c0_201, %c0_202] : memref<16x25xf32, #tpu.memory_space<vmem>>, vector<16x25xf32>
    tpu.vector_store %arg16[%c0_201, %c0_202], %187 {strides = array<i32>} : memref<16x25xf32, #tpu.memory_space<vmem>>, vector<16x25xf32>,
    %c0_203 = arith.constant 0 : index
    %c0_204 = arith.constant 0 : index
    %189 = vector.load %arg16[%c0_203, %c0_204] : memref<16x25xf32, #tpu.memory_space<vmem>>, vector<1x25xf32>
    %c0_205 = arith.constant 0 : index
    %c0_206 = arith.constant 0 : index
    %190 = vector.load %arg17[%c0_205, %c0_206] : memref<1x400xf32, #tpu.memory_space<vmem>>, vector<1x25xf32>
    tpu.vector_store %arg17[%c0_205, %c0_206], %189 {strides = array<i32>} : memref<1x400xf32, #tpu.memory_space<vmem>>, vector<1x25xf32>,
    %c1_207 = arith.constant 1 : index
    %c0_208 = arith.constant 0 : index
    %191 = vector.load %arg16[%c1_207, %c0_208] : memref<16x25xf32, #tpu.memory_space<vmem>>, vector<1x25xf32>
    %c0_209 = arith.constant 0 : index
    %c25 = arith.constant 25 : index
    %192 = vector.load %arg17[%c0_209, %c25] : memref<1x400xf32, #tpu.memory_space<vmem>>, vector<1x25xf32>
    tpu.vector_store %arg17[%c0_209, %c25], %191 {strides = array<i32>} : memref<1x400xf32, #tpu.memory_space<vmem>>, vector<1x25xf32>,
    %c2_210 = arith.constant 2 : index
    %c0_211 = arith.constant 0 : index
    %193 = vector.load %arg16[%c2_210, %c0_211] : memref<16x25xf32, #tpu.memory_space<vmem>>, vector<1x25xf32>
    %c0_212 = arith.constant 0 : index
    %c50 = arith.constant 50 : index
    %194 = vector.load %arg17[%c0_212, %c50] : memref<1x400xf32, #tpu.memory_space<vmem>>, vector<1x25xf32>
    tpu.vector_store %arg17[%c0_212, %c50], %193 {strides = array<i32>} : memref<1x400xf32, #tpu.memory_space<vmem>>, vector<1x25xf32>,
    %c3_213 = arith.constant 3 : index
    %c0_214 = arith.constant 0 : index
    %195 = vector.load %arg16[%c3_213, %c0_214] : memref<16x25xf32, #tpu.memory_space<vmem>>, vector<1x25xf32>
    %c0_215 = arith.constant 0 : index
    %c75 = arith.constant 75 : index
    %196 = vector.load %arg17[%c0_215, %c75] : memref<1x400xf32, #tpu.memory_space<vmem>>, vector<1x25xf32>
    tpu.vector_store %arg17[%c0_215, %c75], %195 {strides = array<i32>} : memref<1x400xf32, #tpu.memory_space<vmem>>, vector<1x25xf32>,
    %c4_216 = arith.constant 4 : index
    %c0_217 = arith.constant 0 : index
    %197 = vector.load %arg16[%c4_216, %c0_217] : memref<16x25xf32, #tpu.memory_space<vmem>>, vector<1x25xf32>
    %c0_218 = arith.constant 0 : index
    %c100 = arith.constant 100 : index
    %198 = vector.load %arg17[%c0_218, %c100] : memref<1x400xf32, #tpu.memory_space<vmem>>, vector<1x25xf32>
    tpu.vector_store %arg17[%c0_218, %c100], %197 {strides = array<i32>} : memref<1x400xf32, #tpu.memory_space<vmem>>, vector<1x25xf32>,
    %c5_219 = arith.constant 5 : index
    %c0_220 = arith.constant 0 : index
    %199 = vector.load %arg16[%c5_219, %c0_220] : memref<16x25xf32, #tpu.memory_space<vmem>>, vector<1x25xf32>
    %c0_221 = arith.constant 0 : index
    %c125 = arith.constant 125 : index
    %200 = vector.load %arg17[%c0_221, %c125] : memref<1x400xf32, #tpu.memory_space<vmem>>, vector<1x25xf32>
    tpu.vector_store %arg17[%c0_221, %c125], %199 {strides = array<i32>} : memref<1x400xf32, #tpu.memory_space<vmem>>, vector<1x25xf32>,
    %c6_222 = arith.constant 6 : index
    %c0_223 = arith.constant 0 : index
    %201 = vector.load %arg16[%c6_222, %c0_223] : memref<16x25xf32, #tpu.memory_space<vmem>>, vector<1x25xf32>
    %c0_224 = arith.constant 0 : index
    %c150 = arith.constant 150 : index
    %202 = vector.load %arg17[%c0_224, %c150] : memref<1x400xf32, #tpu.memory_space<vmem>>, vector<1x25xf32>
    tpu.vector_store %arg17[%c0_224, %c150], %201 {strides = array<i32>} : memref<1x400xf32, #tpu.memory_space<vmem>>, vector<1x25xf32>,
    %c7_225 = arith.constant 7 : index
    %c0_226 = arith.constant 0 : index
    %203 = vector.load %arg16[%c7_225, %c0_226] : memref<16x25xf32, #tpu.memory_space<vmem>>, vector<1x25xf32>
    %c0_227 = arith.constant 0 : index
    %c175 = arith.constant 175 : index
    %204 = vector.load %arg17[%c0_227, %c175] : memref<1x400xf32, #tpu.memory_space<vmem>>, vector<1x25xf32>
    tpu.vector_store %arg17[%c0_227, %c175], %203 {strides = array<i32>} : memref<1x400xf32, #tpu.memory_space<vmem>>, vector<1x25xf32>,
    %c8_228 = arith.constant 8 : index
    %c0_229 = arith.constant 0 : index
    %205 = vector.load %arg16[%c8_228, %c0_229] : memref<16x25xf32, #tpu.memory_space<vmem>>, vector<1x25xf32>
    %c0_230 = arith.constant 0 : index
    %c200 = arith.constant 200 : index
    %206 = vector.load %arg17[%c0_230, %c200] : memref<1x400xf32, #tpu.memory_space<vmem>>, vector<1x25xf32>
    tpu.vector_store %arg17[%c0_230, %c200], %205 {strides = array<i32>} : memref<1x400xf32, #tpu.memory_space<vmem>>, vector<1x25xf32>,
    %c9 = arith.constant 9 : index
    %c0_231 = arith.constant 0 : index
    %207 = vector.load %arg16[%c9, %c0_231] : memref<16x25xf32, #tpu.memory_space<vmem>>, vector<1x25xf32>
    %c0_232 = arith.constant 0 : index
    %c225 = arith.constant 225 : index
    %208 = vector.load %arg17[%c0_232, %c225] : memref<1x400xf32, #tpu.memory_space<vmem>>, vector<1x25xf32>
    tpu.vector_store %arg17[%c0_232, %c225], %207 {strides = array<i32>} : memref<1x400xf32, #tpu.memory_space<vmem>>, vector<1x25xf32>,
    %c10 = arith.constant 10 : index
    %c0_233 = arith.constant 0 : index
    %209 = vector.load %arg16[%c10, %c0_233] : memref<16x25xf32, #tpu.memory_space<vmem>>, vector<1x25xf32>
    %c0_234 = arith.constant 0 : index
    %c250 = arith.constant 250 : index
    %210 = vector.load %arg17[%c0_234, %c250] : memref<1x400xf32, #tpu.memory_space<vmem>>, vector<1x25xf32>
    tpu.vector_store %arg17[%c0_234, %c250], %209 {strides = array<i32>} : memref<1x400xf32, #tpu.memory_space<vmem>>, vector<1x25xf32>,
    %c11 = arith.constant 11 : index
    %c0_235 = arith.constant 0 : index
    %211 = vector.load %arg16[%c11, %c0_235] : memref<16x25xf32, #tpu.memory_space<vmem>>, vector<1x25xf32>
    %c0_236 = arith.constant 0 : index
    %c275 = arith.constant 275 : index
    %212 = vector.load %arg17[%c0_236, %c275] : memref<1x400xf32, #tpu.memory_space<vmem>>, vector<1x25xf32>
    tpu.vector_store %arg17[%c0_236, %c275], %211 {strides = array<i32>} : memref<1x400xf32, #tpu.memory_space<vmem>>, vector<1x25xf32>,
    %c12 = arith.constant 12 : index
    %c0_237 = arith.constant 0 : index
    %213 = vector.load %arg16[%c12, %c0_237] : memref<16x25xf32, #tpu.memory_space<vmem>>, vector<1x25xf32>
    %c0_238 = arith.constant 0 : index
    %c300 = arith.constant 300 : index
    %214 = vector.load %arg17[%c0_238, %c300] : memref<1x400xf32, #tpu.memory_space<vmem>>, vector<1x25xf32>
    tpu.vector_store %arg17[%c0_238, %c300], %213 {strides = array<i32>} : memref<1x400xf32, #tpu.memory_space<vmem>>, vector<1x25xf32>,
    %c13_239 = arith.constant 13 : index
    %c0_240 = arith.constant 0 : index
    %215 = vector.load %arg16[%c13_239, %c0_240] : memref<16x25xf32, #tpu.memory_space<vmem>>, vector<1x25xf32>
    %c0_241 = arith.constant 0 : index
    %c325 = arith.constant 325 : index
    %216 = vector.load %arg17[%c0_241, %c325] : memref<1x400xf32, #tpu.memory_space<vmem>>, vector<1x25xf32>
    tpu.vector_store %arg17[%c0_241, %c325], %215 {strides = array<i32>} : memref<1x400xf32, #tpu.memory_space<vmem>>, vector<1x25xf32>,
    %c14_242 = arith.constant 14 : index
    %c0_243 = arith.constant 0 : index
    %217 = vector.load %arg16[%c14_242, %c0_243] : memref<16x25xf32, #tpu.memory_space<vmem>>, vector<1x25xf32>
    %c0_244 = arith.constant 0 : index
    %c350 = arith.constant 350 : index
    %218 = vector.load %arg17[%c0_244, %c350] : memref<1x400xf32, #tpu.memory_space<vmem>>, vector<1x25xf32>
    tpu.vector_store %arg17[%c0_244, %c350], %217 {strides = array<i32>} : memref<1x400xf32, #tpu.memory_space<vmem>>, vector<1x25xf32>,
    %c15_245 = arith.constant 15 : index
    %c0_246 = arith.constant 0 : index
    %219 = vector.load %arg16[%c15_245, %c0_246] : memref<16x25xf32, #tpu.memory_space<vmem>>, vector<1x25xf32>
    %c0_247 = arith.constant 0 : index
    %c375 = arith.constant 375 : index
    %220 = vector.load %arg17[%c0_247, %c375] : memref<1x400xf32, #tpu.memory_space<vmem>>, vector<1x25xf32>
    tpu.vector_store %arg17[%c0_247, %c375], %219 {strides = array<i32>} : memref<1x400xf32, #tpu.memory_space<vmem>>, vector<1x25xf32>,
    %c0_248 = arith.constant 0 : index
    %c0_249 = arith.constant 0 : index
    %221 = vector.load %arg17[%c0_248, %c0_249] : memref<1x400xf32, #tpu.memory_space<vmem>>, vector<1x400xf32>
    %222 = arith.truncf %221 : vector<1x400xf32> to vector<1x400xbf16>
    %c0_250 = arith.constant 0 : index
    %c0_251 = arith.constant 0 : index
    %223 = vector.load %arg8[%c0_250, %c0_251] : memref<400x120xbf16, #tpu.memory_space<vmem>>, vector<400x120xbf16>
    %cst_252 = arith.constant dense<0.000000e+00> : vector<1x120xf32>
    %224 = tpu.matmul %222, %223, %cst_252 {dimension_numbers = #tpu.dot_dimension_numbers<[1], [0], [0], [1], [0, 0, 1, 1], [], []>} : vector<1x400xbf16>, vector<400x120xbf16>, vector<1x120xf32> -> vector<1x120xf32>
    %c0_253 = arith.constant 0 : index
    %c0_254 = arith.constant 0 : index
    %225 = vector.load %arg9[%c0_253, %c0_254] : memref<1x120xf32, #tpu.memory_space<vmem>>, vector<1x120xf32>
    %226 = arith.addf %224, %225 : vector<1x120xf32>
    %c0_255 = arith.constant 0 : index
    %c0_256 = arith.constant 0 : index
    %227 = vector.load %arg10[%c0_255, %c0_256] : memref<120x10xf32, #tpu.memory_space<vmem>>, vector<120x10xf32>
    %cst_257 = arith.constant dense<0.000000e+00> : vector<1x10xf32>
    %228 = tpu.matmul %226, %227, %cst_257 {dimension_numbers = #tpu.dot_dimension_numbers<[1], [0], [0], [1], [0, 0, 1, 1], [], []>} : vector<1x120xf32>, vector<120x10xf32>, vector<1x10xf32> -> vector<1x10xf32>
    %c0_258 = arith.constant 0 : index
    %c0_259 = arith.constant 0 : index
    %229 = vector.load %arg11[%c0_258, %c0_259] : memref<1x10xf32, #tpu.memory_space<vmem>>, vector<1x10xf32>
    %230 = arith.addf %228, %229 : vector<1x10xf32>
    %c0_260 = arith.constant 0 : index
    %c0_261 = arith.constant 0 : index
    %c0_262 = arith.constant 0 : index
    %231 = vector.load %arg12[%c0_260, %c0_261, %c0_262] : memref<1x1x10xf32, #tpu.memory_space<vmem>>, vector<1x1x10xf32>
    %232 = vector.shape_cast %231 : vector<1x1x10xf32> to vector<1x10xf32>
    %233 = vector.shape_cast %230 : vector<1x10xf32> to vector<1x1x10xf32>
    tpu.vector_store %arg12[%c0_260, %c0_261, %c0_262], %233 {strides = array<i32>} : memref<1x1x10xf32, #tpu.memory_space<vmem>>, vector<1x1x10xf32>,
    return
  }
  func.func @transform_0(%arg0: i32) -> (i32, i32, i32) {
    %c0_i32 = arith.constant 0 : i32
    %c0_i32_0 = arith.constant 0 : i32
    %c0_i32_1 = arith.constant 0 : i32
    return %arg0, %c0_i32, %c0_i32_0 : i32, i32, i32
  }
  func.func @transform_1(%arg0: i32) -> (i32, i32, i32) {
    %c0_i32 = arith.constant 0 : i32
    %c0_i32_0 = arith.constant 0 : i32
    %c0_i32_1 = arith.constant 0 : i32
    %c0_i32_2 = arith.constant 0 : i32
    return %c0_i32, %c0_i32_0, %c0_i32_1 : i32, i32, i32
  }
  func.func @transform_2(%arg0: i32) -> (i32, i32) {
    %c0_i32 = arith.constant 0 : i32
    %c0_i32_0 = arith.constant 0 : i32
    %c0_i32_1 = arith.constant 0 : i32
    return %c0_i32, %c0_i32_0 : i32, i32
  }
  func.func @transform_3(%arg0: i32) -> (i32, i32, i32) {
    %c0_i32 = arith.constant 0 : i32
    %c0_i32_0 = arith.constant 0 : i32
    %c0_i32_1 = arith.constant 0 : i32
    %c0_i32_2 = arith.constant 0 : i32
    return %c0_i32, %c0_i32_0, %c0_i32_1 : i32, i32, i32
  }
  func.func @transform_4(%arg0: i32) -> (i32, i32) {
    %c0_i32 = arith.constant 0 : i32
    %c0_i32_0 = arith.constant 0 : i32
    %c0_i32_1 = arith.constant 0 : i32
    return %c0_i32, %c0_i32_0 : i32, i32
  }
  func.func @transform_5(%arg0: i32) -> (i32, i32) {
    %c0_i32 = arith.constant 0 : i32
    %c0_i32_0 = arith.constant 0 : i32
    %c0_i32_1 = arith.constant 0 : i32
    return %c0_i32, %c0_i32_0 : i32, i32
  }
  func.func @transform_6(%arg0: i32) -> (i32, i32) {
    %c0_i32 = arith.constant 0 : i32
    %c0_i32_0 = arith.constant 0 : i32
    %c0_i32_1 = arith.constant 0 : i32
    return %c0_i32, %c0_i32_0 : i32, i32
  }
  func.func @transform_7(%arg0: i32) -> (i32, i32) {
    %c0_i32 = arith.constant 0 : i32
    %c0_i32_0 = arith.constant 0 : i32
    %c0_i32_1 = arith.constant 0 : i32
    return %c0_i32, %c0_i32_0 : i32, i32
  }
  func.func @transform_8(%arg0: i32) -> (i32, i32) {
    %c0_i32 = arith.constant 0 : i32
    %c0_i32_0 = arith.constant 0 : i32
    %c0_i32_1 = arith.constant 0 : i32
    return %c0_i32, %c0_i32_0 : i32, i32
  }
  func.func @transform_9(%arg0: i32) -> (i32, i32) {
    %c0_i32 = arith.constant 0 : i32
    %c0_i32_0 = arith.constant 0 : i32
    %c0_i32_1 = arith.constant 0 : i32
    return %c0_i32, %c0_i32_0 : i32, i32
  }
  func.func @transform_10(%arg0: i32) -> (i32, i32) {
    %c0_i32 = arith.constant 0 : i32
    %c0_i32_0 = arith.constant 0 : i32
    %c0_i32_1 = arith.constant 0 : i32
    return %c0_i32, %c0_i32_0 : i32, i32
  }
  func.func @transform_11(%arg0: i32) -> (i32, i32, i32) {
    %c0_i32 = arith.constant 0 : i32
    %c0_i32_0 = arith.constant 0 : i32
    %c0_i32_1 = arith.constant 0 : i32
    return %arg0, %c0_i32, %c0_i32_0 : i32, i32, i32
  }
}

</mosaic_0001>

<bundles_post_ra>
// kernel: cnn_forward.1
= control target key start
LH: loop header
LB: loop body
LE: loop exit
PB: predicated region body
PF: predicated region fallthrough
CT: control target
= control target key end

     0   :  { %s7414_s0 = inlined_call_operand.vmem [shape: f32[2,1,784], index: 0, kind: input, shape index: {}]   ;;  %s7415_s1 = inlined_call_operand.vmem [shape: f32[9,16,1], index: 1, kind: input, shape index: {}]   ;;  %s7416_s2 = inlined_call_operand.vmem [shape: f32[16,1], index: 2, kind: input, shape index: {}]   ;;  %s7417_s3 = inlined_call_operand.vmem [shape: f32[9,16,16], index: 3, kind: input, shape index: {}]   ;;  %s7418_s4 = inlined_call_operand.vmem [shape: f32[16,1], index: 4, kind: input, shape index: {}]   ;;  %s7419_s5 = inlined_call_operand.vmem [shape: f32[697,169], index: 5, kind: input, shape index: {}]   ;;  %s7420_s6 = inlined_call_operand.vmem [shape: f32[113,25], index: 6, kind: input, shape index: {}]   ;;  %s7421_s7 = inlined_call_operand.vmem [shape: bf16[400,120], index: 7, kind: input, shape index: {}]   ;;  %s7422_s8 = inlined_call_operand.vmem [shape: f32[1,120], index: 8, kind: input, shape index: {}]   ;;  %s7423_s9 = inlined_call_operand.vmem [shape: f32[120,10], index: 9, kind: input, shape index: {}]   ;;  %s7424_s10 = inlined_call_operand.vmem [shape: f32[1,10], index: 10, kind: input, shape index: {}]   ;;  %s7425_s11 = inlined_call_operand.hbm [shape: f32[2,1,10], index: 11, kind: output, shape index: {}]  }
   0x1   :  { %7463 = sst [smem:[#allocation31_spill]] %s7414_s0 }
   0x2   :  { %16 = vsyncpa [#allocation8], 0 }
   0x3   :  { %18 = vsyncpa [#allocation8 + $0x1], 0  ;;  %s4941_s17 = smov 0   ;;  %s4943_s18 = smov 0  }
   0x4   :  { %s4945_s19 = smov 0   ;;  %s4947_s20 = smov 0  }
   0x5 LB: > { %s4962_s21 = sadd.s32 4294967295, %s4848_s20   ;;  %s4424_s22 = sadd.s32 4294967294, %s4848_s20   ;;  %s4848_s20 = sphi %s4947_s20, %s7566_s20   ;;  %s4844_s19 = sphi %s4945_s19, %s7565_s19   ;;  %s4840_s18 = sphi %s4943_s18, %s7564_s18   ;;  %s4836_s17 = sphi %s4941_s17, %s7563_s17  }
   0x6   : > { %s4966_s23 = sadd.s32 1, %s4848_s20   ;;  %s267_s24 = sadd.s32 1, %s4844_s19 }
   0x7   : > { %s264_s25 = ssub.s32 %s4848_s20, %s4966_s23  ;;  %p277_p0 = scmp.ne.s32.totalorder %s4844_s19, %s4840_s18 }
   0x8   : > { %p265_p1 = scmp.eq.s32.totalorder %s264_s25, 0  ;;  %p278_p2 = scmp.eq.s32.totalorder %s4962_s21, 1 }
   0x9   : > { %p283_p3 = scmp.ne.s32.totalorder %s4840_s18, %s4836_s17  ;;  %p284_p4 = scmp.eq.s32.totalorder %s4424_s22, 1 }
   0xa   : > { %s4977_s26 = scalar_select %p265_p1, %s4844_s19, %s267_s24  }
   0xb   : > { %p4979_p5 = por %p278_p2, %p277_p0  ;;  %p4983_p6 = por %p284_p4, %p283_p3 }
   0xc   : > { %p4427_p7 = scmp.ge.s32.totalorder %s4848_s20, 1  ;;  %p339_p8 = scmp.lt.s32.totalorder %s4848_s20, 3 }
   0xe   : > { %p340_p9 = pnand %p4427_p7, %p339_p8 }
  0x10   : > { %343 = sbr.rel (%p340_p9) target bundleno = 2319 (0x90f), region = 64 }
  0x15   : > { %v4432_v0 = vld [vmem:[%s7415_s1 + $0x30] sm:$0xff]  ;;  %p377_p10 = scmp.lt.s32.totalorder %s4962_s21, 1  ;;  %v7426_v2 = vlaneseq  ;;  %v7428_v3 = vmov 0   ;;  %v4434_v4 = vld [vmem:[%s7415_s1 + $0x40] sm:$0xff]  ;;  %s7467_s0 = sld [smem:[#allocation31_spill]]  ;;  %v4429_v10 = vld [vmem:[%s7415_s1 + $0x18] sm:$0xff] }
  0x16   : > { %v4428_v1 = vld [vmem:[%s7415_s1 + $0x10] sm:$0xff]  ;;  %4722 = vset.pattern.permute.xlu1 %v7428_v3  ;;  %4721 = vset.pattern.permute.xlu0 %v7428_v3  ;;  %v4430_v5 = vld [vmem:[%s7415_s1 + $0x20] sm:$0xff]  ;;  %v4431_v15 = vld [vmem:[%s7415_s1 + $0x28] sm:$0xff]  ;;  %vm399_vm0 = vcmask 703488   ;;  %s7459_s29 = smov 100   ;;  %s4854_s30 = smov 99  }
  0x17   : > { %821 = vperm.xlu1 %4722, %v4432_v0   ;;  %517 = vperm.xlu0 %4721, %v4428_v1   ;;  %s378_s14 = scalar_select %p377_p10, %s4962_s21, 1  ;;  %v5006_v6 = vshrl.u32 %v7426_v2, 7  ;;  %v4436_v7 = vld [vmem:[%s7415_s1 + $0x50] sm:$0xff]  ;;  %v382_v8 = vld [vmem:[%s7416_s2] sm:$0xff]  ;;  %v4433_v22 = vld [vmem:[%s7415_s1 + $0x38] sm:$0xff]  ;;  %vm604_vm1 = vcmask 1039360  }
  0x18   : > { %v419_v11 = vld [vmem:[%s7415_s1] sm:$0xff]  ;;  %v4440_v21 = vld [vmem:[%s7415_s1 + $0x70] sm:$0xff]  ;;  %v4435_v26 = vld [vmem:[%s7415_s1 + $0x48] sm:$0xff]  ;;  %s7447_s12 = smov 72   ;;  %s4857_s13 = smov 71   ;;  %vm756_vm2 = vcmask 1031168  }
  0x19   : > { %7466 = vst [vmem:[#allocation10_spill] sm:$0xff] %v5006_v6  ;;  %s4651_s25 = smul.u32 7, %s378_s14  ;;  %v5015_v9 = vsub.s32 5, %v5006_v6  ;;  %v4438_v14 = vld [vmem:[%s7415_s1 + $0x60] sm:$0xff]  ;;  %v5042_v16 = vsub.s32 4, %v5006_v6  ;;  %v4437_v34 = vld [vmem:[%s7415_s1 + $0x58] sm:$0xff] }
  0x1a   : > { %v4442_v27 = vld [vmem:[%s7415_s1 + $0x80] sm:$0xff]  ;;  %v383_v35 = vld [vmem:[%s7416_s2 + $0x8] sm:$0xff]  ;;  %v4441_v39 = vld [vmem:[%s7415_s1 + $0x78] sm:$0xff]  ;;  %v5125_v41 = vsub.s32 2, %v5006_v6  ;;  %v5128_v42 = vsub.s32 1, %v5006_v6  ;;  %v5142_v46 = vsub.s32 3, %v5006_v6 }
  0x1b   : > { %973 = vperm.xlu1 %4722, %v4434_v4   ;;  %669 = vperm.xlu0 %4721, %v4430_v5   ;;  %s5020_s22 = scalar_lea.vmem %s7467_s0, %s4651_s25  ;;  %v4439_v37 = vld [vmem:[%s7415_s1 + $0x68] sm:$0xff]  ;;  %v5149_v49 = vsub.s32 0, %v5006_v6  ;;  %s7461_s14 = smov 127   ;;  %vm908_vm3 = vcmask 818176   ;;  %vm1060_vm4 = vcmask 809984   ;;  %vm1212_vm5 = vcmask 801792  }
  0x1c   : > { %v5029_v12 = vld [vmem:[%s5020_s22] sm:$0x3f]  ;;  %v420_v38 = vld [vmem:[%s7415_s1 + $0x8] sm:$0xff]  ;;  %7469 = vst [vmem:[#allocation12_spill] sm:$0xff] %v5125_v41  ;;  %7470 = vst [vmem:[#allocation13_spill] sm:$0xff] %v5128_v42  ;;  %s4855_s25 = smov 98  }
  0x1d   : > { %v5033_v13 = vrot.slane %v5029_v12, %v5015_v9  ;;  %v5045_v17 = vld [vmem:[%s5020_s22] sm:$0x7f]  ;;  %v4443_v40 = vld [vmem:[%s7415_s1 + $0x88] sm:$0xff]  ;;  %7471 = vst [vmem:[#allocation14_spill] sm:$0xff] %v5142_v46  ;;  %7472 = vst [vmem:[#allocation15_spill] sm:$0xff] %v5149_v49  ;;  %v5317_v2 = vrot.slane %v5029_v12, %v5125_v41  ;;  %s4858_s15 = smov 70  }
  0x1e   : > { %v5049_v18 = vrot.slane %v5045_v17, %v5015_v9  ;;  %v5052_v19 = vld [vmem:[%s5020_s22] sm:$0x3f]  ;;  %vm1377_vm6 = vcmask 588800   ;;  %vm1544_vm7 = vcmask 580608   ;;  %vm1711_vm8 = vcmask 572416   ;;  %s4861_s16 = smov 114  }
  0x1f   : > { %1125 = vperm.xlu0 %4721, %v4436_v7   ;;  %386 = vperm.xlu1 %4722, %v382_v8   ;;  %v5055_v20 = vld [vmem:[%s5020_s22] sm:$0x3f]  ;;  %v5092_v31 = vrot.slane %v5052_v19, %v5042_v16  ;;  %vm2131_vm9 = vcmask 1040384   ;;  %vm2124_vm10 = vcmask 465920   ;;  %vm2370_vm11 = vcmask 334848   ;;  %s4863_s24 = smov 102  }
  0x20   : > { %v5064_v23 = vld [vmem:[%s5020_s22] sm:$0x3f]  ;;  %v5081_v28 = vrot.slane %v5055_v20, %v5015_v9  ;;  %vm2401_vm12 = vcmask 130048   ;;  %vm2756_vm13 = vcmask 941056   ;;  %vm2877_vm14 = vcmask 932864   ;;  %s4872_s0 = smov 125  }
  0x21   : > { %v5067_v24 = vld [vmem:[%s5020_s22] sm:$0x7f]  ;;  %v5088_v30 = vrot.slane %v5064_v23, %v5015_v9  ;;  %7468 = vst [vmem:[#allocation11_spill] sm:$0xff] %v5092_v31  ;;  %v5333_v31 = vrot.slane %v5029_v12, %v5042_v16  ;;  %vm2998_vm15 = vcmask 924672  }
  0x22   : > { %v5071_v25 = vrot.slane %v5067_v24, %v5042_v16  ;;  %v5084_v29 = vld [vmem:[%s5020_s22] sm:$0x7f]  ;;  %v5100_v33 = vrot.slane %v5067_v24, %v5015_v9 }
  0x23   : > { %522 = vperm.xlu0 %4721, %v4429_v10   ;;  %424 = vperm.xlu1 %4722, %v419_v11   ;;  %v5096_v32 = vrot.slane %v5084_v29, %v5042_v16  ;;  %v5110_v36 = vrot.slane %v5084_v29, %v5015_v9  ;;  %v5131_v43 = vld [vmem:[%s5020_s22] sm:$0x3f]  ;;  %v5222_v11 = vrot.slane %v5055_v20, %v5128_v42 }
  0x24   : > { %v5135_v44 = vrot.slane %v5131_v43, %v5125_v41  ;;  %v5139_v45 = vrot.slane %v5131_v43, %v5128_v42  ;;  %v5157_v52 = vrot.slane %v5131_v43, %v5042_v16  ;;  %v5161_v53 = vrot.slane %v5131_v43, %v5142_v46  ;;  %v5164_v54 = vld [vmem:[%s5020_s22] sm:$0x3f]  ;;  %s7448_s22 = smov 126  }
  0x25   : > { %v5176_v58 = vrot.slane %v5164_v54, %v5128_v42  ;;  %v5180_v59 = vrot.slane %v5131_v43, %v5149_v49  ;;  %v5196_v0 = vrot.slane %v5164_v54, %v5142_v46  ;;  %v5200_v1 = vrot.slane %v5164_v54, %v5125_v41 }
  0x26   : > { %v5212_v8 = vrot.slane %v5164_v54, %v5149_v49  ;;  %v5216_v10 = vrot.slane %v5164_v54, %v5042_v16 }
  0x27   : > { %1277 = vperm.xlu0 %4721, %v4438_v14   ;;  %674 = vperm.xlu1 %4722, %v4431_v15   ;;  %v5226_v14 = vrot.slane %v5055_v20, %v5125_v41  ;;  %v456_v15 = vrot.slane %v5052_v19, %v5015_v9 }
  0x2b   : > { %1444 = vperm.xlu0 %4721, %v4440_v21   ;;  %826 = vperm.xlu1 %4722, %v4433_v22  }
  0x2f   : > { %978 = vperm.xlu0 %4721, %v4435_v26   ;;  %1611 = vperm.xlu1 %4722, %v4442_v27  }
  0x33   : > { %1130 = vperm.xlu0 %4721, %v4437_v34   ;;  %391 = vperm.xlu1 %4722, %v383_v35  }
  0x37   : > { %1282 = vperm.xlu0 %4721, %v4439_v37   ;;  %429 = vperm.xlu1 %4722, %v420_v38   ;;  %v5247_v38 = vrot.slane %v5055_v20, %v5142_v46 }
  0x3b   : > { %1449 = vperm.xlu0 %4721, %v4441_v39   ;;  %v5251_v39 = vrot.slane %v5055_v20, %v5042_v16 }
  0x3f   : > { %1616 = vperm.xlu0 %4721, %v4443_v40  }
  0x92   : > { %v5144_v47 = vpop.permute.xlu1 %821  ;;  %v5146_v48 = vpop.permute.xlu0 %517 }
  0x93   : > { %v558_v50 = vmul.f32 %v5135_v44, %v5146_v48  ;;  %v557_v51 = vmul.f32 %v5139_v45, %v5146_v48  ;;  %v560_v56 = vmul.f32 %v5157_v52, %v5146_v48  ;;  %v559_v57 = vmul.f32 %v5161_v53, %v5146_v48 }
  0x94   : > { %v556_v63 = vmul.f32 %v5180_v59, %v5146_v48  ;;  %v861_v27 = vmul.f32 %v5222_v11, %v5144_v47  ;;  %v862_v34 = vmul.f32 %v5226_v14, %v5144_v47 }
  0x95   : > { %584 = vrot.lane.b32.xlu1 %v558_v50, %s7461_s14  ;;  %582 = vrot.lane.b32.xlu0 %v557_v51, %s7461_s14 }
  0x96   : > { %v5168_v55 = vpop.permute.xlu1 %973  ;;  %v5182_v60 = vpop.permute.xlu0 %669 }
  0x97   : > { %v709_v62 = vmul.f32 %v5176_v58, %v5182_v60  ;;  %v711_v5 = vmul.f32 %v5196_v0, %v5182_v60  ;;  %v710_v7 = vmul.f32 %v5200_v1, %v5182_v60  ;;  %v708_v22 = vmul.f32 %v5212_v8, %v5182_v60 }
  0x98   : > { %v712_v26 = vmul.f32 %v5216_v10, %v5182_v60 }
  0x99   : > { %588 = vrot.lane.b32.xlu1 %v560_v56, %s7461_s14  ;;  %586 = vrot.lane.b32.xlu0 %v559_v57, %s7461_s14  ;;  %v863_v56 = vmul.f32 %v5247_v38, %v5144_v47  ;;  %v864_v57 = vmul.f32 %v5251_v39, %v5144_v47 }
  0x9a   : > { %v5186_v61 = vpop.permute.xlu1 %386 }
  0x9b   : > { %400 = vst.msk [vmem:[#allocation2 + $0x28] sm:$0xff] %vm399_vm0, %v5186_v61 }
  0x9d   : > { %734 = vrot.lane.b32.xlu1 %v709_v62, %s7448_s22  ;;  %580 = vrot.lane.b32.xlu0 %v556_v63, %s7461_s14  ;;  %v5263_v62 = vrot.slane %v5064_v23, %v5128_v42  ;;  %v5267_v63 = vrot.slane %v5055_v20, %v5149_v49  ;;  %v5282_v20 = vrot.slane %v5064_v23, %v5142_v46 }
  0x9e   : > { %v5204_v4 = vpop.permute.xlu1 %424 }
  0x9f   : > { %v468_v35 = vmul.f32 %v456_v15, %v5204_v4 }
  0xa1   : > { %738 = vrot.lane.b32.xlu1 %v711_v5, %s7448_s22  ;;  %736 = vrot.lane.b32.xlu0 %v710_v7, %s7448_s22  ;;  %v1013_v7 = vmul.f32 %v5263_v62, %v5168_v55 }
  0xa2   : > { %v5230_v21 = vpop.permute.xlu1 %674  ;;  %v412_v40 = vld [vmem:[#allocation2 + $0x28] sm:$0xff] }
  0xa3   : > { %v480_v51 = vadd.f32 %v468_v35, %v412_v40  ;;  %v5296_v35 = vrot.slane %v5064_v23, %v5149_v49  ;;  %v5300_v40 = vrot.slane %v5064_v23, %v5042_v16 }
  0xa5   : > { %732 = vrot.lane.b32.xlu1 %v708_v22, %s7448_s22  ;;  %740 = vrot.lane.b32.xlu0 %v712_v26, %s7448_s22  ;;  %492 = vst.msk [vmem:[#allocation2 + $0x28] sm:$0xff] %vm399_vm0, %v480_v51  ;;  %v860_v22 = vmul.f32 %v5267_v63, %v5144_v47  ;;  %v5286_v26 = vrot.slane %v5064_v23, %v5125_v41 }
  0xa6   : > { %v5243_v37 = vpop.permute.xlu1 %826  ;;  %v1016_v23 = vmul.f32 %v5300_v40, %v5168_v55 }
  0xa9   : > { %886 = vrot.lane.b32.xlu1 %v861_v27, %s7459_s29  ;;  %888 = vrot.lane.b32.xlu0 %v862_v34, %s7459_s29  ;;  %v1015_v27 = vmul.f32 %v5282_v20, %v5168_v55  ;;  %v1014_v34 = vmul.f32 %v5286_v26, %v5168_v55 }
  0xaa   : > { %v5255_v50 = vpop.permute.xlu1 %1611 }
  0xad   : > { %890 = vrot.lane.b32.xlu1 %v863_v56, %s7459_s29  ;;  %892 = vrot.lane.b32.xlu0 %v864_v57, %s7459_s29  ;;  %v5308_v56 = vrot.slane %v5029_v12, %v5128_v42 }
  0xae   : > { %v5272_v5 = vpop.permute.xlu1 %391 }
  0xaf   : > { %7473 = vst [vmem:[#allocation16_spill] sm:$0xff] %v5272_v5  ;;  %406 = vst.msk [vmem:[#allocation2 + $0x58] sm:$0xff] %vm399_vm0, %v5272_v5  ;;  %v5329_v5 = vrot.slane %v5029_v12, %v5142_v46 }
  0xb1   : > { %1038 = vrot.lane.b32.xlu1 %v1013_v7, %s4854_s30  ;;  %884 = vrot.lane.b32.xlu0 %v860_v22, %s7459_s29  ;;  %v1012_v22 = vmul.f32 %v5296_v35, %v5168_v55 }
  0xb2   : > { %v5302_v51 = vpop.permute.xlu1 %429 }
  0xb3   : > { %7474 = vst [vmem:[#allocation17_spill] sm:$0xff] %v5302_v51  ;;  %v474_v7 = vmul.f32 %v456_v15, %v5302_v51 }
  0xb5   : > { %1042 = vrot.lane.b32.xlu1 %v1015_v27, %s4854_s30  ;;  %1040 = vrot.lane.b32.xlu0 %v1014_v34, %s4854_s30  ;;  %v5319_v27 = vpop.permute.xlu0 %1125 }
  0xb6   : > { %v418_v57 = vld [vmem:[#allocation2 + $0x58] sm:$0xff]  ;;  %v1165_v15 = vmul.f32 %v5308_v56, %v5319_v27  ;;  %v1166_v3 = vmul.f32 %v5317_v2, %v5319_v27 }
  0xb7   : > { %v486_v34 = vadd.f32 %v474_v7, %v418_v57  ;;  %v1167_v57 = vmul.f32 %v5329_v5, %v5319_v27  ;;  %v1168_v7 = vmul.f32 %v5333_v31, %v5319_v27 }
  0xb9   : > { %1036 = vrot.lane.b32.xlu1 %v1012_v22, %s4854_s30  ;;  %1044 = vrot.lane.b32.xlu0 %v1016_v23, %s4854_s30  ;;  %498 = vst.msk [vmem:[#allocation2 + $0x58] sm:$0xff] %vm399_vm0, %v486_v34  ;;  %v5344_v22 = vrot.slane %v5029_v12, %v5149_v49  ;;  %v523_v23 = vpop.permute.xlu0 %522 }
  0xba   : > { %v565_v51 = vmul.f32 %v5161_v53, %v523_v23  ;;  %v566_v12 = vmul.f32 %v5157_v52, %v523_v23  ;;  %v5374_v53 = vrot.slane %v5045_v17, %v5142_v46 }
  0xbb   : > { %v1164_v34 = vmul.f32 %v5344_v22, %v5319_v27 }
  0xbd   : > { %1190 = vrot.lane.b32.xlu1 %v1165_v15, %s4855_s25  ;;  %1192 = vrot.lane.b32.xlu0 %v1166_v3, %s4855_s25  ;;  %v563_v3 = vmul.f32 %v5139_v45, %v523_v23  ;;  %v564_v15 = vmul.f32 %v5135_v44, %v523_v23  ;;  %v5363_v45 = vrot.slane %v5045_v17, %v5128_v42 }
  0xc1   : > { %1194 = vrot.lane.b32.xlu1 %v1167_v57, %s4855_s25  ;;  %1196 = vrot.lane.b32.xlu0 %v1168_v7, %s4855_s25  ;;  %v562_v57 = vmul.f32 %v5180_v59, %v523_v23  ;;  %v549_v7 = vrot.slane %v5131_v43, %v5015_v9 }
  0xc3   : > { %v561_v44 = vmul.f32 %v549_v7, %v5146_v48  ;;  %v567_v43 = vmul.f32 %v549_v7, %v523_v23  ;;  %v5386_v48 = vrot.slane %v5045_v17, %v5149_v49  ;;  %v715_v7 = vmul.f32 %v5176_v58, %v5230_v21 }
  0xc5   : > { %1188 = vrot.lane.b32.xlu1 %v1164_v34, %s4855_s25  ;;  %594 = vrot.lane.b32.xlu0 %v563_v3, %s7461_s14  ;;  %v5365_v34 = vpop.permute.xlu0 %1277 }
  0xc6   : > { %v1322_v52 = vmul.f32 %v5363_v45, %v5365_v34  ;;  %v1324_v59 = vmul.f32 %v5374_v53, %v5365_v34  ;;  %v1321_v23 = vmul.f32 %v5386_v48, %v5365_v34 }
  0xc9   : > { %596 = vrot.lane.b32.xlu1 %v564_v15, %s7461_s14  ;;  %598 = vrot.lane.b32.xlu0 %v565_v51, %s7461_s14  ;;  %v5382_v51 = vrot.slane %v5045_v17, %v5125_v41  ;;  %v5396_v15 = vrot.slane %v5045_v17, %v5042_v16  ;;  %v718_v16 = vmul.f32 %v5216_v10, %v5230_v21  ;;  %v5421_v58 = vpop.permute.xlu0 %1444 }
  0xcb   : > { %v1323_v3 = vmul.f32 %v5382_v51, %v5365_v34 }
  0xcd   : > { %600 = vrot.lane.b32.xlu1 %v566_v12, %s7461_s14  ;;  %592 = vrot.lane.b32.xlu0 %v562_v57, %s7461_s14  ;;  %v1325_v12 = vmul.f32 %v5396_v15, %v5365_v34  ;;  %v716_v57 = vmul.f32 %v5200_v1, %v5230_v21  ;;  %v717_v1 = vmul.f32 %v5196_v0, %v5230_v21 }
  0xce   : > { %v5431_v0 = vrot.slane %v5067_v24, %v5142_v46 }
  0xd1   : > { %590 = vrot.lane.b32.xlu1 %v561_v44, %s7461_s14  ;;  %1351 = vrot.lane.b32.xlu0 %v1322_v52, %s7447_s12  ;;  %v701_v44 = vrot.slane %v5164_v54, %v5015_v9  ;;  %v714_v9 = vmul.f32 %v5212_v8, %v5230_v21  ;;  %v5442_v8 = vrot.slane %v5067_v24, %v5125_v41 }
  0xd3   : > { %v713_v52 = vmul.f32 %v701_v44, %v5182_v60  ;;  %v5435_v60 = vpop.permute.xlu0 %978  ;;  %v719_v10 = vmul.f32 %v701_v44, %v5230_v21  ;;  %v867_v44 = vmul.f32 %v5222_v11, %v5243_v37  ;;  %v866_v11 = vmul.f32 %v5267_v63, %v5243_v37 }
  0xd5   : > { %602 = vrot.lane.b32.xlu1 %v567_v43, %s7461_s14  ;;  %1355 = vrot.lane.b32.xlu0 %v1324_v59, %s7447_s12  ;;  %v5419_v43 = vrot.slane %v5067_v24, %v5128_v42  ;;  %v1491_v59 = vmul.f32 %v5431_v0, %v5421_v58 }
  0xd7   : > { %v1489_v54 = vmul.f32 %v5419_v43, %v5421_v58 }
  0xd9   : > { %1353 = vrot.lane.b32.xlu1 %v1323_v3, %s7447_s12  ;;  %1349 = vrot.lane.b32.xlu0 %v1321_v23, %s7447_s12  ;;  %v5446_v3 = vrot.slane %v5067_v24, %v5149_v49  ;;  %v1490_v23 = vmul.f32 %v5442_v8, %v5421_v58 }
  0xdb   : > { %v1488_v21 = vmul.f32 %v5446_v3, %v5421_v58 }
  0xdd   : > { %1357 = vrot.lane.b32.xlu1 %v1325_v12, %s7447_s12  ;;  %748 = vrot.lane.b32.xlu0 %v716_v57, %s7448_s22  ;;  %v5454_v12 = vpop.permute.xlu0 %1130  ;;  %v1492_v57 = vmul.f32 %v5071_v25, %v5421_v58 }
  0xe1   : > { %746 = vrot.lane.b32.xlu1 %v715_v7, %s7448_s22  ;;  %752 = vrot.lane.b32.xlu0 %v718_v16, %s7448_s22  ;;  %v868_v7 = vmul.f32 %v5226_v14, %v5243_v37  ;;  %v5464_v16 = vpop.permute.xlu0 %1282  ;;  %v865_v14 = vmul.f32 %v5081_v28, %v5144_v47 }
  0xe5   : > { %750 = vrot.lane.b32.xlu1 %v717_v1, %s7448_s22  ;;  %742 = vrot.lane.b32.xlu0 %v713_v52, %s7448_s22  ;;  %v870_v1 = vmul.f32 %v5251_v39, %v5243_v37  ;;  %v869_v52 = vmul.f32 %v5247_v38, %v5243_v37  ;;  %v5490_v38 = vrot.slane %v5084_v29, %v5142_v46 }
  0xe7   : > { %v1658_v63 = vmul.f32 %v5490_v38, %v5255_v50 }
  0xe9   : > { %744 = vrot.lane.b32.xlu1 %v714_v9, %s7448_s22  ;;  %1518 = vrot.lane.b32.xlu0 %v1489_v54, %s4857_s13  ;;  %v5478_v9 = vrot.slane %v5084_v29, %v5128_v42  ;;  %v5480_v54 = vpop.permute.xlu0 %1449 }
  0xeb   : > { %v1656_v39 = vmul.f32 %v5478_v9, %v5255_v50 }
  0xed   : > { %754 = vrot.lane.b32.xlu1 %v719_v10, %s7448_s22  ;;  %1522 = vrot.lane.b32.xlu0 %v1491_v59, %s4857_s13  ;;  %v5494_v47 = vpop.permute.xlu0 %1616  ;;  %v871_v10 = vmul.f32 %v5081_v28, %v5243_v37  ;;  %v5502_v59 = vrot.slane %v5084_v29, %v5125_v41  ;;  %s4864_s22 = smov 101  }
  0xef   : > { %v1657_v28 = vmul.f32 %v5502_v59, %v5255_v50 }
  0xf1   : > { %1520 = vrot.lane.b32.xlu1 %v1490_v23, %s4857_s13  ;;  %1516 = vrot.lane.b32.xlu0 %v1488_v21, %s4857_s13  ;;  %v5506_v23 = vrot.slane %v5084_v29, %v5149_v49 }
  0xf3   : > { %v1655_v37 = vmul.f32 %v5506_v23, %v5255_v50 }
  0xf5   : > { %1524 = vrot.lane.b32.xlu1 %v1492_v57, %s4857_s13  ;;  %900 = vrot.lane.b32.xlu0 %v868_v7, %s7459_s29 }
  0xf9   : > { %898 = vrot.lane.b32.xlu1 %v867_v44, %s7459_s29  ;;  %904 = vrot.lane.b32.xlu0 %v870_v1, %s7459_s29  ;;  %v1659_v1 = vmul.f32 %v5096_v32, %v5255_v50 }
  0xfd   : > { %902 = vrot.lane.b32.xlu1 %v869_v52, %s7459_s29  ;;  %894 = vrot.lane.b32.xlu0 %v865_v14, %s7459_s29  ;;  %v1020_v52 = vmul.f32 %v5286_v26, %v5435_v60 }
 0x101   : > { %896 = vrot.lane.b32.xlu1 %v866_v11, %s7459_s29  ;;  %1685 = vrot.lane.b32.xlu0 %v1656_v39, %s4858_s15  ;;  %v1019_v39 = vmul.f32 %v5263_v62, %v5435_v60 }
 0x105   : > { %906 = vrot.lane.b32.xlu1 %v871_v10, %s7459_s29  ;;  %1689 = vrot.lane.b32.xlu0 %v1658_v63, %s4858_s15  ;;  %v1022_v10 = vmul.f32 %v5300_v40, %v5435_v60  ;;  %s4878_s29 = smov 94  }
 0x107   : > { %v5510_v21 = vpop.permute.xlu1 %584  ;;  %v5512_v57 = vpop.permute.xlu0 %582 }
 0x109   : > { %1687 = vrot.lane.b32.xlu1 %v1657_v28, %s4858_s15  ;;  %1683 = vrot.lane.b32.xlu0 %v1655_v37, %s4858_s15  ;;  %v1021_v28 = vmul.f32 %v5282_v20, %v5435_v60  ;;  %v1017_v37 = vmul.f32 %v5088_v30, %v5168_v55 }
 0x10b   : > { %v5520_v7 = vpop.permute.xlu1 %588  ;;  %v5522_v44 = vpop.permute.xlu0 %586 }
 0x10d   : > { %1691 = vrot.lane.b32.xlu1 %v1659_v1, %s4858_s15  ;;  %1052 = vrot.lane.b32.xlu0 %v1020_v52, %s4854_s30  ;;  %v1018_v1 = vmul.f32 %v5296_v35, %v5435_v60  ;;  %v1171_v52 = vmul.f32 %v5308_v56, %v5454_v12 }
 0x10f   : > { %v5530_v14 = vpop.permute.xlu1 %734  ;;  %v5532_v11 = vpop.permute.xlu0 %580 }
 0x111   : > { %1050 = vrot.lane.b32.xlu1 %v1019_v39, %s4854_s30  ;;  %1056 = vrot.lane.b32.xlu0 %v1022_v10, %s4854_s30  ;;  %v1023_v39 = vmul.f32 %v5088_v30, %v5435_v60  ;;  %v1173_v10 = vmul.f32 %v5329_v5, %v5454_v12  ;;  %v1174_v60 = vmul.f32 %v5333_v31, %v5454_v12 }
 0x113   : > { %v5540_v63 = vpop.permute.xlu1 %738  ;;  %v5542_v26 = vpop.permute.xlu0 %736 }
 0x115   : > { %1054 = vrot.lane.b32.xlu1 %v1021_v28, %s4854_s30  ;;  %1046 = vrot.lane.b32.xlu0 %v1017_v37, %s4854_s30  ;;  %v1172_v28 = vmul.f32 %v5317_v2, %v5454_v12  ;;  %v1170_v37 = vmul.f32 %v5344_v22, %v5454_v12 }
 0x117   : > { %v5550_v62 = vpop.permute.xlu1 %732  ;;  %v5552_v40 = vpop.permute.xlu0 %740 }
 0x119   : > { %1048 = vrot.lane.b32.xlu1 %v1018_v1, %s4854_s30  ;;  %1202 = vrot.lane.b32.xlu0 %v1171_v52, %s4855_s25  ;;  %v1175_v1 = vmul.f32 %v5033_v13, %v5454_v12  ;;  %v1169_v52 = vmul.f32 %v5033_v13, %v5319_v27 }
 0x11b   : > { %v5560_v20 = vpop.permute.xlu1 %886  ;;  %v5562_v55 = vpop.permute.xlu0 %888 }
 0x11d   : > { %1058 = vrot.lane.b32.xlu1 %v1023_v39, %s4854_s30  ;;  %1206 = vrot.lane.b32.xlu0 %v1173_v10, %s4855_s25  ;;  %v1330_v39 = vmul.f32 %v5382_v51, %v5464_v16  ;;  %v1329_v10 = vmul.f32 %v5363_v45, %v5464_v16  ;;  %v1331_v51 = vmul.f32 %v5374_v53, %v5464_v16  ;;  %s7509_s30 = smov 127  }
 0x11e   : > { %v1333_v53 = vmul.f32 %v5049_v18, %v5464_v16 }
 0x11f   : > { %v5570_v35 = vpop.permute.xlu1 %890  ;;  %v5572_v56 = vpop.permute.xlu0 %892 }
 0x121   : > { %1204 = vrot.lane.b32.xlu1 %v1172_v28, %s4855_s25  ;;  %1200 = vrot.lane.b32.xlu0 %v1170_v37, %s4855_s25  ;;  %v1332_v28 = vmul.f32 %v5396_v15, %v5464_v16  ;;  %v1326_v37 = vmul.f32 %v5049_v18, %v5365_v34 }
 0x123   : > { %v5580_v30 = vpop.permute.xlu1 %1038  ;;  %v5582_v5 = vpop.permute.xlu0 %884 }
 0x125   : > { %1208 = vrot.lane.b32.xlu1 %v1174_v60, %s4855_s25  ;;  %1210 = vrot.lane.b32.xlu0 %v1175_v1, %s4855_s25  ;;  %v5619_v60 = vsub.s32 6, %v5006_v6  ;;  %v1328_v1 = vmul.f32 %v5386_v48, %v5464_v16 }
 0x127   : > { %v5590_v2 = vpop.permute.xlu1 %1042  ;;  %v5592_v22 = vpop.permute.xlu0 %1040 }
 0x129   : > { %1198 = vrot.lane.b32.xlu1 %v1169_v52, %s4855_s25  ;;  %1367 = vrot.lane.b32.xlu0 %v1330_v39, %s7447_s12  ;;  %v1313_v52 = vrot.slane %v5045_v17, %v5619_v60  ;;  %s7510_s25 = smov 126  }
 0x12b   : > { %v5600_v31 = vpop.permute.xlu1 %1036  ;;  %v5602_v12 = vpop.permute.xlu0 %1044  ;;  %v1334_v48 = vmul.f32 %v1313_v52, %v5464_v16  ;;  %v1480_v16 = vrot.slane %v5067_v24, %v5619_v60 }
 0x12d   : > { %1365 = vrot.lane.b32.xlu1 %v1329_v10, %s7447_s12  ;;  %1371 = vrot.lane.b32.xlu0 %v1332_v28, %s7447_s12  ;;  %v1327_v28 = vmul.f32 %v1313_v52, %v5365_v34  ;;  %v504_v52 = vld [vmem:[#allocation2 + $0x28] sm:$0xff] }
 0x12f   : > { %v5610_v13 = vpop.permute.xlu1 %1190  ;;  %v5612_v27 = vpop.permute.xlu0 %1192 }
 0x131   : > { %1369 = vrot.lane.b32.xlu1 %v1331_v51, %s7447_s12  ;;  %1359 = vrot.lane.b32.xlu0 %v1326_v37, %s7447_s12  ;;  %v1496_v51 = vmul.f32 %v5419_v43, %v5480_v54  ;;  %v1498_v37 = vmul.f32 %v5431_v0, %v5480_v54 }
 0x133   : > { %v5623_v45 = vpop.permute.xlu1 %1194  ;;  %v5625_v15 = vpop.permute.xlu0 %1196 }
 0x135   : > { %1363 = vrot.lane.b32.xlu1 %v1328_v1, %s7447_s12  ;;  %1373 = vrot.lane.b32.xlu0 %v1333_v53, %s7447_s12  ;;  %v1497_v1 = vmul.f32 %v5442_v8, %v5480_v54  ;;  %v1495_v53 = vmul.f32 %v5446_v3, %v5480_v54  ;;  %v1494_v8 = vmul.f32 %v1480_v16, %v5421_v58  ;;  %v510_v3 = vld [vmem:[#allocation2 + $0x58] sm:$0xff] }
 0x137   : > { %v5635_v39 = vpop.permute.xlu1 %1188  ;;  %v5637_v10 = vpop.permute.xlu0 %594 }
 0x139   : > { %1361 = vrot.lane.b32.xlu1 %v1327_v28, %s7447_s12  ;;  %1532 = vrot.lane.b32.xlu0 %v1496_v51, %s4857_s13  ;;  %v1499_v51 = vmul.f32 %v5071_v25, %v5480_v54  ;;  %v1501_v25 = vmul.f32 %v1480_v16, %v5480_v54 }
 0x13b   : > { %v5644_v18 = vpop.permute.xlu1 %596  ;;  %v5646_v17 = vpop.permute.xlu0 %598 }
 0x13d   : > { %1375 = vrot.lane.b32.xlu1 %v1334_v48, %s7447_s12  ;;  %1536 = vrot.lane.b32.xlu0 %v1498_v37, %s4857_s13  ;;  %s7506_s12 = smov 100  }
 0x13f   : > { %v5653_v34 = vpop.permute.xlu1 %600  ;;  %v5655_v43 = vpop.permute.xlu0 %592 }
 0x141   : > { %1534 = vrot.lane.b32.xlu1 %v1497_v1, %s4857_s13  ;;  %1530 = vrot.lane.b32.xlu0 %v1495_v53, %s4857_s13  ;;  %v1493_v1 = vmul.f32 %v5100_v33, %v5421_v58  ;;  %v1664_v58 = vmul.f32 %v5502_v59, %v5494_v47  ;;  %v1665_v59 = vmul.f32 %v5490_v38, %v5494_v47 }
 0x142   : > { %v1647_v38 = vrot.slane %v5084_v29, %v5619_v60 }
 0x143   : > { %v5665_v0 = vpop.permute.xlu1 %590  ;;  %v5667_v28 = vpop.permute.xlu0 %1351 }
 0x144   : > { %v632_v48 = vadd.f32 %v5665_v0, %v504_v52  ;;  %v1668_v60 = vmul.f32 %v1647_v38, %v5494_v47 }
 0x145   : > { %1538 = vrot.lane.b32.xlu1 %v1499_v51, %s4857_s13  ;;  %1528 = vrot.lane.b32.xlu0 %v1494_v8, %s4857_s13  ;;  %v1500_v8 = vmul.f32 %v5100_v33, %v5480_v54 }
 0x146   : > { %644 = vst.msk [vmem:[#allocation2 + $0x28] sm:$0xff] %vm399_vm0, %v632_v48 }
 0x147   : > { %v5676_v24 = vpop.permute.xlu1 %602  ;;  %v5678_v37 = vpop.permute.xlu0 %1355 }
 0x148   : > { %v638_v53 = vadd.f32 %v5676_v24, %v510_v3  ;;  %v1663_v3 = vmul.f32 %v5478_v9, %v5494_v47 }
 0x149   : > { %1526 = vrot.lane.b32.xlu1 %v1493_v1, %s4857_s13  ;;  %1542 = vrot.lane.b32.xlu0 %v1501_v25, %s4857_s13  ;;  %v1666_v1 = vmul.f32 %v5096_v32, %v5494_v47  ;;  %v1660_v25 = vmul.f32 %v5110_v36, %v5255_v50 }
 0x14a   : > { %650 = vst.msk [vmem:[#allocation2 + $0x58] sm:$0xff] %vm399_vm0, %v638_v53 }
 0x14b   : > { %v5687_v52 = vpop.permute.xlu1 %1353  ;;  %v5689_v51 = vpop.permute.xlu0 %1349 }
 0x14d   : > { %1540 = vrot.lane.b32.xlu1 %v1500_v8, %s4857_s13  ;;  %1701 = vrot.lane.b32.xlu0 %v1664_v58, %s4858_s15  ;;  %v656_v53 = vld [vmem:[#allocation2 + $0x28] sm:$0xff]  ;;  %v1662_v8 = vmul.f32 %v5506_v23, %v5494_v47  ;;  %v1667_v58 = vmul.f32 %v5110_v36, %v5494_v47  ;;  %v1661_v23 = vmul.f32 %v1647_v38, %v5255_v50  ;;  %s4869_s13 = smov 50  }
 0x14e   : > { %v5751_v50 = vrot.slane %v5052_v19, %v5125_v41  ;;  %v5763_v38 = vrot.slane %v5052_v19, %v5149_v49 }
 0x14f   : > { %v5697_v16 = vpop.permute.xlu1 %1357  ;;  %v5699_v48 = vpop.permute.xlu0 %748 }
 0x151   : > { %1699 = vrot.lane.b32.xlu1 %v1663_v3, %s4858_s15  ;;  %1705 = vrot.lane.b32.xlu0 %v1666_v1, %s4858_s15 }
 0x153   : > { %v5707_v33 = vpop.permute.xlu1 %746  ;;  %v5709_v54 = vpop.permute.xlu0 %752 }
 0x154   : > { %7475 = vst [vmem:[#allocation18_spill] sm:$0xff] %v5709_v54 }
 0x155   : > { %1703 = vrot.lane.b32.xlu1 %v1665_v59, %s4858_s15  ;;  %1693 = vrot.lane.b32.xlu0 %v1660_v25, %s4858_s15  ;;  %v662_v25 = vld [vmem:[#allocation2 + $0x58] sm:$0xff] }
 0x157   : > { %v5717_v9 = vpop.permute.xlu1 %750  ;;  %v5719_v32 = vpop.permute.xlu0 %742 }
 0x158   : > { %7476 = vst [vmem:[#allocation19_spill] sm:$0xff] %v5717_v9  ;;  %7477 = vst [vmem:[#allocation20_spill] sm:$0xff] %v5719_v32  ;;  %v784_v3 = vadd.f32 %v5719_v32, %v656_v53 }
 0x159   : > { %1697 = vrot.lane.b32.xlu1 %v1662_v8, %s4858_s15  ;;  %1707 = vrot.lane.b32.xlu0 %v1667_v58, %s4858_s15  ;;  %v5747_v8 = vrot.slane %v5052_v19, %v5128_v42  ;;  %v5755_v58 = vrot.slane %v5052_v19, %v5142_v46  ;;  %v463_v46 = vmul.f32 %v5763_v38, %v5204_v4 }
 0x15a   : > { %796 = vst.msk [vmem:[#allocation2 + $0x28] sm:$0xff] %vm399_vm0, %v784_v3 }
 0x15b   : > { %v5731_v1 = vpop.permute.xlu1 %744  ;;  %v5733_v59 = vpop.permute.xlu0 %1518  ;;  %v475_v32 = vadd.f32 %v463_v46, %v5186_v61  ;;  %v759_v46 = vsel %vm756_vm2, %v5542_v26, %v5540_v63 }
 0x15c   : > { %7478 = vst [vmem:[#allocation21_spill] sm:$0xff] %v5731_v1  ;;  %v607_v1 = vsel %vm604_vm1, %v5510_v21, %v5522_v44 }
 0x15d   : > { %1695 = vrot.lane.b32.xlu1 %v1661_v23, %s4858_s15  ;;  %v464_v23 = vmul.f32 %v5747_v8, %v5204_v4 }
 0x15f   : > { %v5737_v36 = vpop.permute.xlu1 %754  ;;  %v5739_v29 = vpop.permute.xlu0 %1522  ;;  %v476_v19 = vadd.f32 %v464_v23, %v5186_v61  ;;  %v605_v23 = vsel %vm604_vm1, %v5532_v11, %v5512_v57 }
 0x160   : > { %7479 = vst [vmem:[#allocation22_spill] sm:$0xff] %v5737_v36  ;;  %v790_v53 = vadd.f32 %v5737_v36, %v662_v25  ;;  %v465_v25 = vmul.f32 %v5751_v50, %v5204_v4 }
 0x161   : > { %1709 = vrot.lane.b32.xlu1 %v1668_v60, %s4858_s15  ;;  %v466_v60 = vmul.f32 %v5755_v58, %v5204_v4  ;;  %v808_v9 = vld [vmem:[#allocation2 + $0x28] sm:$0xff]  ;;  %s4860_s15 = smov 115  }
 0x162   : > { %802 = vst.msk [vmem:[#allocation2 + $0x58] sm:$0xff] %vm399_vm0, %v790_v53  ;;  %v477_v49 = vadd.f32 %v465_v25, %v5186_v61  ;;  %v608_v25 = vsel %vm604_vm1, %v5522_v44, %v5520_v7 }
 0x163   : > { %v5757_v3 = vpop.permute.xlu1 %1520  ;;  %v5759_v47 = vpop.permute.xlu0 %1516  ;;  %v478_v42 = vadd.f32 %v466_v60, %v5186_v61  ;;  %v758_v60 = vsel %vm756_vm2, %v5530_v14, %v5542_v26  ;;  %v910_v26 = vsel %vm908_vm3, %v5560_v20, %v5562_v55 }
 0x164   : > { %v629_v11 = vadd.f32 %v607_v1, %v477_v49 }
 0x167   : > { %v5771_v53 = vpop.permute.xlu1 %1524  ;;  %v5773_v41 = vpop.permute.xlu0 %900 }
 0x168   : > { %7480 = vst [vmem:[#allocation23_spill] sm:$0xff] %v5773_v41  ;;  %v606_v41 = vsel %vm604_vm1, %v5512_v57, %v5510_v21  ;;  %v757_v21 = vsel %vm756_vm2, %v5550_v62, %v5530_v14  ;;  %v911_v14 = vsel %vm908_vm3, %v5562_v55, %v5570_v35  ;;  %v1063_v55 = vsel %vm1060_vm4, %v5592_v22, %v5590_v2 }
 0x169   : > { %v628_v57 = vadd.f32 %v606_v41, %v476_v19  ;;  %v909_v41 = vsel %vm908_vm3, %v5582_v5, %v5560_v20  ;;  %v912_v19 = vsel %vm908_vm3, %v5570_v35, %v5572_v56  ;;  %v1061_v20 = vsel %vm1060_vm4, %v5600_v31, %v5580_v30 }
 0x16b   : > { %v5780_v6 = vpop.permute.xlu1 %898  ;;  %v5782_v36 = vpop.permute.xlu0 %904  ;;  %v780_v62 = vadd.f32 %v758_v60, %v628_v57  ;;  %v1214_v60 = vsel %vm1212_vm5, %v5610_v13, %v5612_v27  ;;  %v1064_v57 = vsel %vm1060_vm4, %v5590_v2, %v5602_v12 }
 0x16c   : > { %7481 = vst [vmem:[#allocation24_spill] sm:$0xff] %v5780_v6  ;;  %7482 = vst [vmem:[#allocation25_spill] sm:$0xff] %v5782_v36  ;;  %v627_v36 = vadd.f32 %v605_v23, %v475_v32  ;;  %v760_v6 = vsel %vm756_vm2, %v5540_v63, %v5552_v40  ;;  %v630_v63 = vadd.f32 %v608_v25, %v478_v42 }
 0x16d   : > { %v781_v32 = vadd.f32 %v759_v46, %v629_v11  ;;  %v1062_v23 = vsel %vm1060_vm4, %v5580_v30, %v5592_v22  ;;  %v932_v5 = vadd.f32 %v910_v26, %v780_v62  ;;  %v1215_v22 = vsel %vm1212_vm5, %v5612_v27, %v5623_v45 }
 0x16e   : > { %v779_v1 = vadd.f32 %v757_v21, %v627_v36  ;;  %v782_v42 = vadd.f32 %v760_v6, %v630_v63  ;;  %v1213_v30 = vsel %vm1212_vm5, %v5635_v39, %v5610_v13  ;;  %v1379_v11 = vsel %vm1377_vm6, %v5667_v28, %v5687_v52 }
 0x16f   : > { %v5809_v44 = vpop.permute.xlu1 %902  ;;  %v5811_v54 = vpop.permute.xlu0 %894  ;;  %v1084_v31 = vadd.f32 %v1062_v23, %v932_v5  ;;  %v1380_v27 = vsel %vm1377_vm6, %v5687_v52, %v5678_v37  ;;  %v1378_v13 = vsel %vm1377_vm6, %v5689_v51, %v5667_v28  ;;  %v1546_v62 = vsel %vm1544_vm7, %v5733_v59, %v5757_v3 }
 0x170   : > { %v936_v49 = vadd.f32 %v5811_v54, %v808_v9  ;;  %v933_v9 = vadd.f32 %v911_v14, %v781_v32  ;;  %v931_v36 = vadd.f32 %v909_v41, %v779_v1  ;;  %v934_v6 = vadd.f32 %v912_v19, %v782_v42 }
 0x171   : > { %v1236_v39 = vadd.f32 %v1214_v60, %v1084_v31  ;;  %v1216_v14 = vsel %vm1212_vm5, %v5623_v45, %v5625_v15  ;;  %v1547_v52 = vsel %vm1544_vm7, %v5757_v3, %v5739_v29  ;;  %v1545_v28 = vsel %vm1544_vm7, %v5759_v47, %v5733_v59 }
 0x172   : > { %948 = vst.msk [vmem:[#allocation2 + $0x28] sm:$0xff] %vm399_vm0, %v936_v49  ;;  %v1085_v46 = vadd.f32 %v1063_v55, %v933_v9  ;;  %v1083_v21 = vadd.f32 %v1061_v20, %v931_v36  ;;  %v814_v49 = vld [vmem:[#allocation2 + $0x58] sm:$0xff]  ;;  %v1086_v45 = vadd.f32 %v1064_v57, %v934_v6  ;;  %v1381_v23 = vsel %vm1377_vm6, %v5678_v37, %v5697_v16 }
 0x173   : > { %v5836_v25 = vpop.permute.xlu1 %896  ;;  %v1686_v35 = vpop.permute.xlu0 %1685  ;;  %v1403_v32 = vadd.f32 %v1379_v11, %v1236_v39  ;;  %v1548_v59 = vsel %vm1544_vm7, %v5739_v29, %v5771_v53  ;;  %v1979_v39 = vld [vmem:[%s7419_s5 + $0xf8] sm:$0xff] }
 0x174   : > { %v1237_v26 = vadd.f32 %v1215_v22, %v1085_v46  ;;  %v1235_v41 = vadd.f32 %v1213_v30, %v1083_v21  ;;  %v1238_v55 = vadd.f32 %v1216_v14, %v1086_v45  ;;  %2138 = vmatprep.subr.mxu0 %v1979_v39  ;;  %v1977_v14 = vld [vmem:[%s7419_s5 + $0xe8] sm:$0xff] }
 0x175   : > { %v1570_v20 = vadd.f32 %v1546_v62, %v1403_v32  ;;  %v1973_v45 = vld [vmem:[%s7419_s5 + $0xc8] sm:$0xff]  ;;  %v1972_v32 = vld [vmem:[%s7419_s5 + $0xc0] sm:$0xff] }
 0x176   : > { %v1404_v1 = vadd.f32 %v1380_v27, %v1237_v26  ;;  %v1402_v19 = vadd.f32 %v1378_v13, %v1235_v41  ;;  %v1405_v22 = vadd.f32 %v1381_v23, %v1238_v55  ;;  %v1978_v26 = vld [vmem:[%s7419_s5 + $0xf0] sm:$0xff]  ;;  %v1976_v41 = vld [vmem:[%s7419_s5 + $0xe0] sm:$0xff] }
 0x177   : > { %v5862_v2 = vpop.permute.xlu1 %906  ;;  %v1690_v63 = vpop.permute.xlu0 %1689  ;;  %2139 = vmatpush1.msra.mxu0 %v1978_v26 }
 0x178   : > { %v942_v51 = vadd.f32 %v5862_v2, %v814_v49  ;;  %v1571_v42 = vadd.f32 %v1547_v52, %v1404_v1  ;;  %v1569_v3 = vadd.f32 %v1545_v28, %v1402_v19  ;;  %v1572_v31 = vadd.f32 %v1548_v59, %v1405_v22  ;;  %v1975_v52 = vld [vmem:[%s7419_s5 + $0xd8] sm:$0xff]  ;;  %2140 = vmatprep.subr.mxu0 %v1977_v14  ;;  %v1974_v28 = vld [vmem:[%s7419_s5 + $0xd0] sm:$0xff] }
 0x179   : > { %2141 = vmatpush1.msra.mxu0 %v1976_v41  ;;  %v960_v23 = vld [vmem:[#allocation2 + $0x28] sm:$0xff] }
 0x17a   : > { %954 = vst.msk [vmem:[#allocation2 + $0x58] sm:$0xff] %vm399_vm0, %v942_v51  ;;  %2142 = vmatprep.subr.mxu0 %v1975_v52 }
 0x17b   : > { %v1688_v5 = vpop.permute.xlu1 %1687  ;;  %v1684_v9 = vpop.permute.xlu0 %1683  ;;  %2143 = vmatpush1.msra.mxu0 %v1974_v28 }
 0x17c   : > { %v1713_v47 = vsel %vm1711_vm8, %v1686_v35, %v1688_v5  ;;  %v1714_v36 = vsel %vm1711_vm8, %v1688_v5, %v1690_v63  ;;  %v1712_v60 = vsel %vm1711_vm8, %v1684_v9, %v1686_v35  ;;  %2144 = vmatprep.subr.mxu0 %v1973_v45 }
 0x17d   : > { %v5884_v37 = vadd.f32 %v1713_v47, %v1570_v20  ;;  %v5886_v30 = vadd.f32 %v1714_v36, %v1571_v42  ;;  %v5888_v6 = vadd.f32 %v1712_v60, %v1569_v3  ;;  %2145 = vmatpush1.msra.mxu0 %v1972_v32 }
 0x17f   : > { %7483 = vst [vmem:[#allocation26_spill] sm:$0xff] %v5884_v37  ;;  %7484 = vst [vmem:[#allocation27_spill] sm:$0xff] %v5886_v30  ;;  %v7453_v46 = vmax.f32 %v5884_v37, 0.0  ;;  %v7451_v21 = vmax.f32 %v5886_v30, 0.0  ;;  %v7452_v29 = vmax.f32 %v5888_v6, 0.0  ;;  %v5893_v57 = vpop.permute.xlu1 %1691  ;;  %v5895_v11 = vpop.permute.xlu0 %1052 }
 0x180   : > { %7485 = vst [vmem:[#allocation28_spill] sm:$0xff] %v5888_v6  ;;  %7486 = vst [vmem:[#allocation29_spill] sm:$0xff] %v5893_v57  ;;  %v1715_v35 = vsel %vm1711_vm8, %v1690_v63, %v5893_v57  ;;  %v610_v6 = vsel %vm604_vm1, %v5655_v43, %v5637_v10 }
 0x181   : > { %v5899_v27 = vadd.f32 %v1715_v35, %v1572_v31  ;;  %v4723_v13 = vpack.i.bf16 %v7451_v21, %v7453_v46  ;;  %v966_v5 = vld [vmem:[#allocation2 + $0x58] sm:$0xff] }
 0x182   : > { %v7489_v21 = vld [vmem:[#allocation11_spill] sm:$0xff] }
 0x183   : > { %7487 = vst [vmem:[#allocation30_spill] sm:$0xff] %v5899_v27  ;;  %v7450_v49 = vmax.f32 %v5899_v27, 0.0  ;;  %v5918_v63 = vpop.permute.xlu1 %1050  ;;  %v5920_v62 = vpop.permute.xlu0 %1056  ;;  %4724 = vrot.lane.b32.xlu0 %v4723_v13, %s7461_s14 }
 0x185   : > { %v4728_v51 = vpack.i.bf16 %v7452_v29, %v7450_v49  ;;  %v467_v29 = vmul.f32 %v7489_v21, %v5204_v4 }
 0x187   : > { %v5939_v1 = vpop.permute.xlu1 %1054  ;;  %v5941_v19 = vpop.permute.xlu0 %1046  ;;  %4729 = vrot.lane.b32.xlu1 %v4728_v51, %s7461_s14 }
 0x188   : > { %v1088_v55 = vadd.f32 %v5941_v19, %v960_v23 }
 0x18a   : > { %1100 = vst.msk [vmem:[#allocation2 + $0x28] sm:$0xff] %vm399_vm0, %v1088_v55 }
 0x18b   : > { %v5946_v20 = vpop.permute.xlu1 %1048  ;;  %v5948_v42 = vpop.permute.xlu0 %1202 }
 0x18f   : > { %v5950_v3 = vpop.permute.xlu1 %1058  ;;  %v5952_v9 = vpop.permute.xlu0 %1206 }
 0x190   : > { %v1094_v59 = vadd.f32 %v5950_v3, %v966_v5 }
 0x191   : > { %v1112_v39 = vld [vmem:[#allocation2 + $0x28] sm:$0xff] }
 0x192   : > { %1106 = vst.msk [vmem:[#allocation2 + $0x58] sm:$0xff] %vm399_vm0, %v1094_v59 }
 0x193   : > { %v5956_v47 = vpop.permute.xlu1 %1204  ;;  %v5958_v36 = vpop.permute.xlu0 %1200 }
 0x197   : > { %v5960_v60 = vpop.permute.xlu1 %1208  ;;  %v5962_v22 = vpop.permute.xlu0 %1210 }
 0x199   : > { %v1118_v31 = vld [vmem:[#allocation2 + $0x58] sm:$0xff] }
 0x19a   : > { %v1246_v35 = vadd.f32 %v5962_v22, %v1118_v31  ;;  %v7488_v31 = vld [vmem:[#allocation17_spill] sm:$0xff] }
 0x19b   : > { %v5965_v13 = vpop.permute.xlu1 %1198  ;;  %v5967_v26 = vpop.permute.xlu0 %1367  ;;  %v472_v49 = vmul.f32 %v5755_v58, %v7488_v31  ;;  %v469_v46 = vmul.f32 %v5763_v38, %v7488_v31  ;;  %v473_v27 = vmul.f32 %v7489_v21, %v7488_v31  ;;  %v612_v58 = vsel %vm604_vm1, %v5644_v18, %v5646_v17 }
 0x19c   : > { %1258 = vst.msk [vmem:[#allocation2 + $0x58] sm:$0xff] %vm399_vm0, %v1246_v35  ;;  %v1240_v14 = vadd.f32 %v5965_v13, %v1112_v39  ;;  %v470_v35 = vmul.f32 %v5747_v8, %v7488_v31  ;;  %v471_v39 = vmul.f32 %v5751_v50, %v7488_v31  ;;  %v611_v50 = vsel %vm604_vm1, %v5637_v10, %v5644_v18  ;;  %v7491_v10 = vld [vmem:[#allocation19_spill] sm:$0xff] }
 0x19d   : > { %v613_v31 = vsel %vm604_vm1, %v5646_v17, %v5653_v34  ;;  %v479_v18 = vadd.f32 %v467_v29, %v5186_v61  ;;  %v614_v61 = vsel %vm604_vm1, %v5653_v34, %v5676_v24  ;;  %v764_v43 = vsel %vm756_vm2, %v5699_v48, %v7491_v10  ;;  %v7492_v29 = vld [vmem:[#allocation18_spill] sm:$0xff]  ;;  %v7494_v34 = vld [vmem:[#allocation21_spill] sm:$0xff] }
 0x19e   : > { %1252 = vst.msk [vmem:[#allocation2 + $0x28] sm:$0xff] %vm399_vm0, %v1240_v14  ;;  %v762_v24 = vsel %vm756_vm2, %v7494_v34, %v5707_v33 }
 0x19f   : > { %v5972_v41 = vpop.permute.xlu1 %1365  ;;  %v5974_v52 = vpop.permute.xlu0 %1371 }
 0x1a3   : > { %v5976_v28 = vpop.permute.xlu1 %1369  ;;  %v5978_v51 = vpop.permute.xlu0 %1359  ;;  %v1270_v4 = vld [vmem:[#allocation2 + $0x58] sm:$0xff] }
 0x1a5   : > { %v1264_v5 = vld [vmem:[#allocation2 + $0x28] sm:$0xff] }
 0x1a7   : > { %v5980_v45 = vpop.permute.xlu1 %1363  ;;  %v5982_v32 = vpop.permute.xlu0 %1373 }
 0x1ab   : > { %v1362_v23 = vpop.permute.xlu1 %1361  ;;  %v5984_v55 = vpop.permute.xlu0 %1532 }
 0x1ac   : > { %v1383_v59 = vsel %vm1377_vm6, %v5978_v51, %v1362_v23 }
 0x1ad   : > { %v1407_v14 = vadd.f32 %v1383_v59, %v1264_v5  ;;  %v7490_v5 = vld [vmem:[#allocation16_spill] sm:$0xff] }
 0x1ae   : > { %v482_v59 = vadd.f32 %v470_v35, %v7490_v5  ;;  %v483_v21 = vadd.f32 %v471_v39, %v7490_v5  ;;  %v484_v30 = vadd.f32 %v472_v49, %v7490_v5  ;;  %v481_v39 = vadd.f32 %v469_v46, %v7490_v5 }
 0x1af   : > { %1419 = vst.msk [vmem:[#allocation2 + $0x28] sm:$0xff] %vm399_vm0, %v1407_v14  ;;  %v1376_v23 = vpop.permute.xlu1 %1375  ;;  %v6001_v8 = vpop.permute.xlu0 %1536  ;;  %v485_v57 = vadd.f32 %v473_v27, %v7490_v5  ;;  %v765_v27 = vsel %vm756_vm2, %v7491_v10, %v7492_v29  ;;  %v7496_v5 = vld [vmem:[#allocation23_spill] sm:$0xff] }
 0x1b0   : > { %v1389_v38 = vsel %vm1377_vm6, %v5982_v32, %v1376_v23  ;;  %v609_v23 = vsel %vm604_vm1, %v5520_v7, %v5665_v0  ;;  %v634_v35 = vadd.f32 %v611_v50, %v482_v59  ;;  %v635_v37 = vadd.f32 %v612_v58, %v483_v21  ;;  %v7493_v50 = vld [vmem:[#allocation20_spill] sm:$0xff]  ;;  %v7495_v58 = vld [vmem:[#allocation22_spill] sm:$0xff] }
 0x1b1   : > { %v1413_v14 = vadd.f32 %v1389_v38, %v1270_v4  ;;  %v636_v4 = vadd.f32 %v613_v31, %v484_v30  ;;  %v763_v7 = vsel %vm756_vm2, %v5707_v33, %v5699_v48  ;;  %v633_v0 = vadd.f32 %v610_v6, %v481_v39  ;;  %v7497_v48 = vld [vmem:[#allocation24_spill] sm:$0xff] }
 0x1b2   : > { %v631_v46 = vadd.f32 %v609_v23, %v479_v18  ;;  %v761_v30 = vsel %vm756_vm2, %v5552_v40, %v7493_v50  ;;  %v766_v38 = vsel %vm756_vm2, %v7492_v29, %v7495_v58  ;;  %v915_v6 = vsel %vm908_vm3, %v7497_v48, %v7496_v5  ;;  %v7498_v40 = vld [vmem:[#allocation25_spill] sm:$0xff] }
 0x1b3   : > { %1425 = vst.msk [vmem:[#allocation2 + $0x58] sm:$0xff] %vm399_vm0, %v1413_v14  ;;  %v6027_v17 = vpop.permute.xlu1 %1534  ;;  %v6029_v49 = vpop.permute.xlu0 %1530  ;;  %v916_v59 = vsel %vm908_vm3, %v7496_v5, %v5809_v44  ;;  %v637_v21 = vadd.f32 %v614_v61, %v485_v57  ;;  %v786_v31 = vadd.f32 %v763_v7, %v634_v35  ;;  %v787_v14 = vadd.f32 %v764_v43, %v635_v37 }
 0x1b4   : > { %v917_v18 = vsel %vm908_vm3, %v5809_v44, %v7498_v40  ;;  %v788_v39 = vadd.f32 %v765_v27, %v636_v4  ;;  %v783_v10 = vadd.f32 %v761_v30, %v631_v46  ;;  %v913_v29 = vsel %vm908_vm3, %v5572_v56, %v5811_v54 }
 0x1b5   : > { %v914_v50 = vsel %vm908_vm3, %v5836_v25, %v7497_v48  ;;  %v785_v57 = vadd.f32 %v762_v24, %v633_v0  ;;  %v789_v35 = vadd.f32 %v766_v38, %v637_v21  ;;  %v938_v37 = vadd.f32 %v915_v6, %v786_v31 }
 0x1b6   : > { %v939_v61 = vadd.f32 %v916_v59, %v787_v14  ;;  %v940_v7 = vadd.f32 %v917_v18, %v788_v39  ;;  %v918_v44 = vsel %vm908_vm3, %v7498_v40, %v5862_v2  ;;  %v1067_v4 = vsel %vm1060_vm4, %v5918_v63, %v5895_v11  ;;  %v1431_v34 = vld [vmem:[#allocation2 + $0x28] sm:$0xff] }
 0x1b7   : > { %v6061_v33 = vpop.permute.xlu1 %1538  ;;  %v1529_v23 = vpop.permute.xlu0 %1528  ;;  %v1068_v56 = vsel %vm1060_vm4, %v5895_v11, %v5939_v1  ;;  %v935_v54 = vadd.f32 %v913_v29, %v783_v10  ;;  %v937_v43 = vadd.f32 %v914_v50, %v785_v57  ;;  %v1069_v25 = vsel %vm1060_vm4, %v5939_v1, %v5920_v62 }
 0x1b8   : > { %v1065_v0 = vsel %vm1060_vm4, %v5602_v12, %v5941_v19  ;;  %v1066_v27 = vsel %vm1060_vm4, %v5946_v20, %v5918_v63  ;;  %v1070_v11 = vsel %vm1060_vm4, %v5920_v62, %v5950_v3  ;;  %v1219_v30 = vsel %vm1212_vm5, %v5948_v42, %v5956_v47 }
 0x1b9   : > { %v941_v24 = vadd.f32 %v918_v44, %v789_v35  ;;  %v1090_v58 = vadd.f32 %v1067_v4, %v938_v37  ;;  %v1091_v12 = vadd.f32 %v1068_v56, %v939_v61  ;;  %v1092_v38 = vadd.f32 %v1069_v25, %v940_v7  ;;  %v1971_v7 = vld [vmem:[%s7419_s5 + $0xb8] sm:$0xff] }
 0x1ba   : > { %v1220_v63 = vsel %vm1212_vm5, %v5956_v47, %v5952_v9  ;;  %v1218_v62 = vsel %vm1212_vm5, %v5958_v36, %v5948_v42  ;;  %v1385_v20 = vsel %vm1377_vm6, %v5972_v41, %v5967_v26  ;;  %v1087_v3 = vadd.f32 %v1065_v0, %v935_v54  ;;  %v1437_v31 = vld [vmem:[#allocation2 + $0x58] sm:$0xff]  ;;  %2146 = vmatprep.subr.mxu0 %v1971_v7  ;;  %v1968_v54 = vld [vmem:[%s7419_s5 + $0xa0] sm:$0xff] }
 0x1bb   : > { %v1527_v46 = vpop.permute.xlu1 %1526  ;;  %v1543_v2 = vpop.permute.xlu0 %1542  ;;  %v1089_v5 = vadd.f32 %v1066_v27, %v937_v43  ;;  %v1093_v48 = vadd.f32 %v1070_v11, %v941_v24  ;;  %v1242_v6 = vadd.f32 %v1219_v30, %v1090_v58  ;;  %v1221_v47 = vsel %vm1212_vm5, %v5952_v9, %v5960_v60  ;;  %v1966_v58 = vld [vmem:[%s7419_s5 + $0x90] sm:$0xff]  ;;  %v1952_v7 = vld [vmem:[%s7419_s5 + $0x20] sm:$0xff] }
 0x1bc   : > { %v1550_v1 = vsel %vm1544_vm7, %v1527_v46, %v1529_v23  ;;  %v1217_v42 = vsel %vm1212_vm5, %v5625_v15, %v5965_v13  ;;  %v1552_v36 = vsel %vm1544_vm7, %v5984_v55, %v6027_v17  ;;  %v1243_v40 = vadd.f32 %v1220_v63, %v1091_v12  ;;  %v1965_v12 = vld [vmem:[%s7419_s5 + $0x88] sm:$0xff] }
 0x1bd   : > { %v1574_v19 = vadd.f32 %v1550_v1, %v1431_v34  ;;  %v1241_v18 = vadd.f32 %v1218_v62, %v1089_v5  ;;  %v1409_v23 = vadd.f32 %v1385_v20, %v1242_v6  ;;  %v1222_v10 = vsel %vm1212_vm5, %v5960_v60, %v5962_v22 }
 0x1be   : > { %v1386_v9 = vsel %vm1377_vm6, %v5967_v26, %v5976_v28  ;;  %v1387_v15 = vsel %vm1377_vm6, %v5976_v28, %v5974_v52  ;;  %v1382_v13 = vsel %vm1377_vm6, %v5697_v16, %v5978_v51  ;;  %v1244_v29 = vadd.f32 %v1221_v47, %v1092_v38  ;;  %v1964_v38 = vld [vmem:[%s7419_s5 + $0x80] sm:$0xff] }
 0x1bf   : > { %1586 = vst.msk [vmem:[#allocation2 + $0x28] sm:$0xff] %vm399_vm0, %v1574_v19  ;;  %v1541_v59 = vpop.permute.xlu1 %1540  ;;  %v1702_v21 = vpop.permute.xlu0 %1701  ;;  %v1239_v50 = vadd.f32 %v1217_v42, %v1087_v3  ;;  %v1384_v57 = vsel %vm1377_vm6, %v5980_v45, %v5972_v41  ;;  %v1576_v35 = vadd.f32 %v1552_v36, %v1409_v23  ;;  %v1553_v26 = vsel %vm1544_vm7, %v6027_v17, %v6001_v8  ;;  %v1970_v17 = vld [vmem:[%s7419_s5 + $0xb0] sm:$0xff]  ;;  %v1963_v23 = vld [vmem:[%s7419_s5 + $0x78] sm:$0xff] }
 0x1c0   : > { %v1556_v14 = vsel %vm1544_vm7, %v1541_v59, %v1543_v2  ;;  %v1554_v28 = vsel %vm1544_vm7, %v6001_v8, %v6061_v33  ;;  %v1549_v16 = vsel %vm1544_vm7, %v5771_v53, %v1527_v46  ;;  %v1410_v37 = vadd.f32 %v1386_v9, %v1243_v40  ;;  %v1969_v8 = vld [vmem:[%s7419_s5 + $0xa8] sm:$0xff]  ;;  %2147 = vmatpush1.msra.mxu0 %v1970_v17  ;;  %v1962_v9 = vld [vmem:[%s7419_s5 + $0x70] sm:$0xff]  ;;  %v1951_v17 = vld [vmem:[%s7419_s5 + $0x18] sm:$0xff] }
 0x1c1   : > { %v1580_v39 = vadd.f32 %v1556_v14, %v1437_v31  ;;  %v1411_v41 = vadd.f32 %v1387_v15, %v1244_v29  ;;  %v1406_v45 = vadd.f32 %v1382_v13, %v1239_v50  ;;  %v1245_v53 = vadd.f32 %v1222_v10, %v1093_v48  ;;  %2148 = vmatprep.subr.mxu0 %v1969_v8  ;;  %v1961_v15 = vld [vmem:[%s7419_s5 + $0x68] sm:$0xff]  ;;  %v1960_v29 = vld [vmem:[%s7419_s5 + $0x60] sm:$0xff]  ;;  %v1950_v8 = vld [vmem:[%s7419_s5 + $0x10] sm:$0xff] }
 0x1c2   : > { %v1408_v44 = vadd.f32 %v1384_v57, %v1241_v18  ;;  %v1388_v4 = vsel %vm1377_vm6, %v5974_v52, %v5982_v32  ;;  %v1551_v56 = vsel %vm1544_vm7, %v6029_v49, %v5984_v55  ;;  %v1577_v43 = vadd.f32 %v1553_v26, %v1410_v37  ;;  %v7499_v49 = vld [vmem:[#allocation29_spill] sm:$0xff]  ;;  %2149 = vmatpush1.msra.mxu0 %v1968_v54  ;;  %v2011_v54 = vld [vmem:[%s7419_s5 + $0x1f8] sm:$0xff] }
 0x1c3   : > { %1592 = vst.msk [vmem:[#allocation2 + $0x58] sm:$0xff] %vm399_vm0, %v1580_v39  ;;  %v1700_v60 = vpop.permute.xlu1 %1699  ;;  %v1706_v22 = vpop.permute.xlu0 %1705  ;;  %v1578_v25 = vadd.f32 %v1554_v28, %v1411_v41  ;;  %v1573_v0 = vadd.f32 %v1549_v16, %v1406_v45  ;;  %v1555_v52 = vsel %vm1544_vm7, %v6061_v33, %v1541_v59  ;;  %v1412_v30 = vadd.f32 %v1388_v4, %v1245_v53  ;;  %v1967_v33 = vld [vmem:[%s7419_s5 + $0x98] sm:$0xff]  ;;  %v1957_v26 = vld [vmem:[%s7419_s5 + $0x48] sm:$0xff]  ;;  %v1956_v28 = vld [vmem:[%s7419_s5 + $0x40] sm:$0xff] }
 0x1c4   : > { %v1719_v51 = vsel %vm1711_vm8, %v1700_v60, %v1702_v21  ;;  %v1575_v19 = vadd.f32 %v1551_v56, %v1408_v44  ;;  %2150 = vmatprep.subr.mxu0 %v1967_v33  ;;  %v1955_v16 = vld [vmem:[%s7419_s5 + $0x38] sm:$0xff]  ;;  %v1953_v41 = vld [vmem:[%s7419_s5 + $0x28] sm:$0xff]  ;;  %v1948_v56 = vld [vmem:[%s7419_s5] sm:$0xff] }
 0x1c5   : > { %v6139_v61 = vadd.f32 %v1719_v51, %v1576_v35  ;;  %v1579_v63 = vadd.f32 %v1555_v52, %v1412_v30  ;;  %2151 = vmatpush1.msra.mxu0 %v1966_v58  ;;  %v1959_v35 = vld [vmem:[%s7419_s5 + $0x58] sm:$0xff]  ;;  %v1954_v51 = vld [vmem:[%s7419_s5 + $0x30] sm:$0xff]  ;;  %v1949_v44 = vld [vmem:[%s7419_s5 + $0x8] sm:$0xff] }
 0x1c6   : > { %2152 = vmatprep.subr.mxu0 %v1965_v12  ;;  %v1598_v40 = vld [vmem:[#allocation2 + $0x28] sm:$0xff]  ;;  %v2006_v52 = vld [vmem:[%s7419_s5 + $0x1d0] sm:$0xff]  ;;  %v2000_v58 = vld [vmem:[%s7419_s5 + $0x1a0] sm:$0xff] }
 0x1c7   : > { %v1779_v46 = vmax.f32 %v6139_v61, 0.0  ;;  %v1704_v2 = vpop.permute.xlu1 %1703  ;;  %v1694_v27 = vpop.permute.xlu0 %1693  ;;  %2153 = vmatpush1.msra.mxu0 %v1964_v38  ;;  %v2002_v30 = vld [vmem:[%s7419_s5 + $0x1b0] sm:$0xff]  ;;  %v2001_v33 = vld [vmem:[%s7419_s5 + $0x1a8] sm:$0xff]  ;;  %v1999_v12 = vld [vmem:[%s7419_s5 + $0x198] sm:$0xff] }
 0x1c8   : > { %v1720_v32 = vsel %vm1711_vm8, %v1702_v21, %v1704_v2  ;;  %v1721_v55 = vsel %vm1711_vm8, %v1704_v2, %v1706_v22  ;;  %v1716_v11 = vsel %vm1711_vm8, %v7499_v49, %v1694_v27  ;;  %2154 = vmatprep.subr.mxu0 %v1963_v23  ;;  %v2007_v2 = vld [vmem:[%s7419_s5 + $0x1d8] sm:$0xff]  ;;  %v1997_v38 = vld [vmem:[%s7419_s5 + $0x188] sm:$0xff] }
 0x1c9   : > { %v6166_v34 = vadd.f32 %v1720_v32, %v1577_v43  ;;  %v6168_v1 = vadd.f32 %v1721_v55, %v1578_v25  ;;  %v6170_v24 = vadd.f32 %v1716_v11, %v1573_v0  ;;  %2155 = vmatpush1.msra.mxu0 %v1962_v9  ;;  %v2010_v43 = vld [vmem:[%s7419_s5 + $0x1f0] sm:$0xff]  ;;  %v2009_v25 = vld [vmem:[%s7419_s5 + $0x1e8] sm:$0xff]  ;;  %v2008_v0 = vld [vmem:[%s7419_s5 + $0x1e0] sm:$0xff] }
 0x1ca   : > { %v1604_v50 = vld [vmem:[#allocation2 + $0x58] sm:$0xff]  ;;  %2156 = vmatprep.subr.mxu0 %v1961_v15  ;;  %v2005_v32 = vld [vmem:[%s7419_s5 + $0x1c8] sm:$0xff]  ;;  %v2004_v55 = vld [vmem:[%s7419_s5 + $0x1c0] sm:$0xff] }
 0x1cb   : > { %v1780_v62 = vmax.f32 %v6166_v34, 0.0  ;;  %v1781_v20 = vmax.f32 %v6168_v1, 0.0  ;;  %v1776_v3 = vmax.f32 %v6170_v24, 0.0  ;;  %v1698_v5 = vpop.permute.xlu1 %1697  ;;  %v1708_v48 = vpop.permute.xlu0 %1707  ;;  %2157 = vmatpush1.msra.mxu0 %v1960_v29  ;;  %v2003_v49 = vld [vmem:[%s7419_s5 + $0x1b8] sm:$0xff]  ;;  %v1986_v15 = vld [vmem:[%s7419_s5 + $0x130] sm:$0xff]  ;;  %v1985_v29 = vld [vmem:[%s7419_s5 + $0x128] sm:$0xff] }
 0x1cc   : > { %v1718_v6 = vsel %vm1711_vm8, %v1698_v5, %v1700_v60  ;;  %v1722_v59 = vsel %vm1711_vm8, %v1706_v22, %v1708_v48  ;;  %v1958_v22 = vld [vmem:[%s7419_s5 + $0x50] sm:$0xff]  ;;  %2158 = vmatprep.subr.mxu0 %v1959_v35  ;;  %v1995_v5 = vld [vmem:[%s7419_s5 + $0x178] sm:$0xff] }
 0x1cd   : > { %v6189_v21 = vadd.f32 %v1718_v6, %v1575_v19  ;;  %v6191_v47 = vadd.f32 %v1722_v59, %v1579_v63  ;;  %v4733_v42 = vpack.i.bf16 %v1780_v62, %v1779_v46  ;;  %2159 = vmatpush1.msra.mxu0 %v1958_v22  ;;  %v1998_v19 = vld [vmem:[%s7419_s5 + $0x190] sm:$0xff]  ;;  %v1996_v63 = vld [vmem:[%s7419_s5 + $0x180] sm:$0xff]  ;;  %v1993_v6 = vld [vmem:[%s7419_s5 + $0x168] sm:$0xff] }
 0x1ce   : > { %2160 = vmatprep.subr.mxu0 %v1957_v26  ;;  %v1992_v59 = vld [vmem:[%s7419_s5 + $0x160] sm:$0xff]  ;;  %v1987_v9 = vld [vmem:[%s7419_s5 + $0x138] sm:$0xff]  ;;  %v2042_v26 = vld [vmem:[%s7419_s5 + $0x2f0] sm:$0xff] }
 0x1cf   : > { %v1778_v36 = vmax.f32 %v6189_v21, 0.0  ;;  %v1782_v31 = vmax.f32 %v6191_v47, 0.0  ;;  %v1696_v14 = vpop.permute.xlu1 %1695  ;;  %4734 = vrot.lane.b32.xlu0 %v4733_v42, %s7461_s14  ;;  %2161 = vmatpush1.msra.mxu0 %v1956_v28  ;;  %v1991_v42 = vld [vmem:[%s7419_s5 + $0x158] sm:$0xff]  ;;  %v2041_v28 = vld [vmem:[%s7419_s5 + $0x2e8] sm:$0xff]  ;;  %v2046_v34 = vld [vmem:[%s7419_s5 + $0x310] sm:$0xff] }
 0x1d0   : > { %v1717_v18 = vsel %vm1711_vm8, %v1694_v27, %v1696_v14  ;;  %2162 = vmatprep.subr.mxu0 %v1955_v16  ;;  %v1990_v14 = vld [vmem:[%s7419_s5 + $0x150] sm:$0xff]  ;;  %v2043_v22 = vld [vmem:[%s7419_s5 + $0x2f8] sm:$0xff]  ;;  %v2044_v21 = vld [vmem:[%s7419_s5 + $0x300] sm:$0xff] }
 0x1d1   : > { %v1741_v39 = vadd.f32 %v1717_v18, %v1598_v40  ;;  %v4738_v10 = vpack.i.bf16 %v1778_v36, %v1781_v20  ;;  %2163 = vmatpush1.msra.mxu0 %v1954_v51  ;;  %v1989_v18 = vld [vmem:[%s7419_s5 + $0x148] sm:$0xff]  ;;  %v1983_v16 = vld [vmem:[%s7419_s5 + $0x118] sm:$0xff]  ;;  %2215 = vmatprep.subr.mxu1 %v2043_v22  ;;  %v2040_v51 = vld [vmem:[%s7419_s5 + $0x2e0] sm:$0xff] }
 0x1d2   : > { %2164 = vmatprep.subr.mxu0 %v1953_v41  ;;  %2216 = vmatpush1.msra.mxu1 %v2042_v26  ;;  %v2012_v22 = vld [vmem:[%s7419_s5 + $0x200] sm:$0xff]  ;;  %v2075_v26 = vld [vmem:[%s7419_s5 + $0x3f8] sm:$0xff] }
 0x1d3   : > { %1753 = vst.msk [vmem:[#allocation2 + $0x28] sm:$0xff] %vm399_vm0, %v1741_v39  ;;  %v1710_v13 = vpop.permute.xlu1 %1709  ;;  %1828 = vrot.lane.b32.xlu0 %v1776_v3, %s7461_s14  ;;  %4739 = vrot.lane.b32.xlu1 %v4738_v10, %s7461_s14  ;;  %v1988_v10 = vld [vmem:[%s7419_s5 + $0x140] sm:$0xff] }
 0x1d4   : > { %v1723_v57 = vsel %vm1711_vm8, %v1708_v48, %v1710_v13  ;;  %2165 = vmatpush1.msra.mxu0 %v1952_v7  ;;  %v1994_v48 = vld [vmem:[%s7419_s5 + $0x170] sm:$0xff]  ;;  %2217 = vmatprep.subr.mxu1 %v2041_v28 }
 0x1d5   : > { %v1747_v60 = vadd.f32 %v1723_v57, %v1604_v50  ;;  %2166 = vmatprep.subr.mxu0 %v1951_v17  ;;  %v1984_v50 = vld [vmem:[%s7419_s5 + $0x120] sm:$0xff]  ;;  %v7500_v7 = vld [vmem:[#allocation26_spill] sm:$0xff]  ;;  %2218 = vmatpush1.msra.mxu1 %v2040_v51 }
 0x1d6   : > { %2167 = vmatpush1.msra.mxu0 %v1950_v8  ;;  %v7501_v17 = vmax.f32 %v7500_v7, 0.0  ;;  %v2074_v28 = vld [vmem:[%s7419_s5 + $0x3f0] sm:$0xff]  ;;  %v2072_v51 = vld [vmem:[%s7419_s5 + $0x3e0] sm:$0xff] }
 0x1d7   : > { %1759 = vst.msk [vmem:[#allocation2 + $0x58] sm:$0xff] %vm399_vm0, %v1747_v60  ;;  %1840 = vrot.lane.b32.xlu0 %v1782_v31, %s7461_s14  ;;  %2168 = vmatprep.subr.mxu0 %v1949_v44  ;;  %v2068_v7 = vld [vmem:[%s7419_s5 + $0x3c0] sm:$0xff] }
 0x1d8   : > { %2169 = vmatpush1.msra.mxu0 %v1948_v56  ;;  %v7504_v56 = vld [vmem:[#allocation27_spill] sm:$0xff] }
 0x1d9   : > { %2170 = vmatprep.subr.mxu0 %v2011_v54  ;;  %v7505_v54 = vmax.f32 %v7504_v56, 0.0  ;;  %v2064_v56 = vld [vmem:[%s7419_s5 + $0x3a0] sm:$0xff] }
 0x1da   : > { %v1765_v37 = vld [vmem:[#allocation2 + $0x28] sm:$0xff]  ;;  %2171 = vmatpush2.msra.mxu0 %v2010_v43 }
 0x1db   : > { %v1777_v45 = vmax.f32 %v1765_v37, 0.0  ;;  %2172 = vmatprep.subr.mxu0 %v2009_v25  ;;  %v1981_v25 = vld [vmem:[%s7419_s5 + $0x108] sm:$0xff] }
 0x1dc   : > { %2173 = vmatpush2.msra.mxu0 %v2008_v0  ;;  %v2039_v0 = vld [vmem:[%s7419_s5 + $0x2d8] sm:$0xff] }
 0x1dd   : > { %1789 = vst.msk [vmem:[#allocation2 + $0x28] sm:$0xff] %vm399_vm0, %v1777_v45  ;;  %2174 = vmatprep.subr.mxu0 %v2007_v2  ;;  %v1982_v45 = vld [vmem:[%s7419_s5 + $0x110] sm:$0xff]  ;;  %v1980_v2 = vld [vmem:[%s7419_s5 + $0x100] sm:$0xff]  ;;  %2219 = vmatprep.subr.mxu1 %v2039_v0  ;;  %v2061_v0 = vld [vmem:[%s7419_s5 + $0x388] sm:$0xff] }
 0x1de   : > { %v1771_v53 = vld [vmem:[#allocation2 + $0x58] sm:$0xff]  ;;  %2175 = vmatpush2.msra.mxu0 %v2006_v52 }
 0x1df   : > { %v1783_v4 = vmax.f32 %v1771_v53, 0.0  ;;  %2176 = vmatprep.subr.mxu0 %v2005_v32  ;;  %v7502_v53 = vld [vmem:[#allocation28_spill] sm:$0xff]  ;;  %v2038_v32 = vld [vmem:[%s7419_s5 + $0x2d0] sm:$0xff] }
 0x1e0   : > { %2177 = vmatpush2.msra.mxu0 %v2004_v55  ;;  %v7503_v44 = vmax.f32 %v7502_v53, 0.0  ;;  %v2037_v55 = vld [vmem:[%s7419_s5 + $0x2c8] sm:$0xff]  ;;  %2220 = vmatpush1.msra.mxu1 %v2038_v32  ;;  %v2066_v53 = vld [vmem:[%s7419_s5 + $0x3b0] sm:$0xff] }
 0x1e1   : > { %1795 = vst.msk [vmem:[#allocation2 + $0x58] sm:$0xff] %vm399_vm0, %v1783_v4  ;;  %2178 = vmatprep.subr.mxu0 %v2003_v49  ;;  %v2107_v49 = vld [vmem:[%s7419_s5 + $0x4f8] sm:$0xff]  ;;  %2221 = vmatprep.subr.mxu1 %v2037_v55  ;;  %v2058_v32 = vld [vmem:[%s7419_s5 + $0x370] sm:$0xff]  ;;  %v2057_v55 = vld [vmem:[%s7419_s5 + $0x368] sm:$0xff]  ;;  %vm3119_vm0 = vcmask 834560  }
 0x1e2   : > { %2179 = vmatpush2.msra.mxu0 %v2002_v30  ;;  %v2036_v30 = vld [vmem:[%s7419_s5 + $0x2c0] sm:$0xff] }
 0x1e3   : > { %2180 = vmatprep.subr.mxu0 %v2001_v33  ;;  %v2035_v33 = vld [vmem:[%s7419_s5 + $0x2b8] sm:$0xff]  ;;  %2222 = vmatpush1.msra.mxu1 %v2036_v30 }
 0x1e4   : > { %v6280_v27 = vld [vmem:[#allocation2 + $0x28] sm:$0xff]  ;;  %2181 = vmatpush2.msra.mxu0 %v2000_v58  ;;  %v2034_v58 = vld [vmem:[%s7419_s5 + $0x2b0] sm:$0xff]  ;;  %2223 = vmatprep.subr.mxu1 %v2035_v33  ;;  %v2055_v30 = vld [vmem:[%s7419_s5 + $0x358] sm:$0xff] }
 0x1e5   : > { %1830 = vrot.lane.b32.xlu1 %v6280_v27, %s7461_s14  ;;  %2182 = vmatprep.subr.mxu0 %v1999_v12  ;;  %v2033_v12 = vld [vmem:[%s7419_s5 + $0x2a8] sm:$0xff]  ;;  %v2054_v33 = vld [vmem:[%s7419_s5 + $0x350] sm:$0xff] }
 0x1e6   : > { %2183 = vmatpush2.msra.mxu0 %v1998_v19  ;;  %v2032_v19 = vld [vmem:[%s7419_s5 + $0x2a0] sm:$0xff]  ;;  %2224 = vmatpush1.msra.mxu1 %v2034_v58  ;;  %v2053_v58 = vld [vmem:[%s7419_s5 + $0x348] sm:$0xff] }
 0x1e7   : > { %2184 = vmatprep.subr.mxu0 %v1997_v38  ;;  %v2031_v38 = vld [vmem:[%s7419_s5 + $0x298] sm:$0xff]  ;;  %2225 = vmatprep.subr.mxu1 %v2033_v12  ;;  %v2052_v12 = vld [vmem:[%s7419_s5 + $0x340] sm:$0xff] }
 0x1e8   : > { %v6296_v11 = vld [vmem:[#allocation2 + $0x58] sm:$0xff]  ;;  %2185 = vmatpush2.msra.mxu0 %v1996_v63  ;;  %v2030_v63 = vld [vmem:[%s7419_s5 + $0x290] sm:$0xff]  ;;  %2226 = vmatpush1.msra.mxu1 %v2032_v19 }
 0x1e9   : > { %1842 = vrot.lane.b32.xlu1 %v6296_v11, %s7461_s14  ;;  %2186 = vmatprep.subr.mxu0 %v1995_v5  ;;  %v2029_v5 = vld [vmem:[%s7419_s5 + $0x288] sm:$0xff]  ;;  %v2051_v19 = vld [vmem:[%s7419_s5 + $0x338] sm:$0xff]  ;;  %s4862_s14 = smov 113  }
 0x1ea   : > { %2187 = vmatpush2.msra.mxu0 %v1994_v48  ;;  %2227 = vmatprep.subr.mxu1 %v2031_v38  ;;  %v2028_v48 = vld [vmem:[%s7419_s5 + $0x280] sm:$0xff] }
 0x1eb   : > { %2188 = vmatprep.subr.mxu0 %v1993_v6  ;;  %2228 = vmatpush1.msra.mxu1 %v2030_v63  ;;  %v2027_v6 = vld [vmem:[%s7419_s5 + $0x278] sm:$0xff]  ;;  %v2050_v63 = vld [vmem:[%s7419_s5 + $0x330] sm:$0xff] }
 0x1ec   : > { %2189 = vmatpush2.msra.mxu0 %v1992_v59  ;;  %2229 = vmatprep.subr.mxu1 %v2029_v5  ;;  %v2026_v59 = vld [vmem:[%s7419_s5 + $0x270] sm:$0xff]  ;;  %v2049_v5 = vld [vmem:[%s7419_s5 + $0x328] sm:$0xff] }
 0x1ed   : > { %2190 = vmatprep.subr.mxu0 %v1991_v42  ;;  %2230 = vmatpush1.msra.mxu1 %v2028_v48  ;;  %v2025_v42 = vld [vmem:[%s7419_s5 + $0x268] sm:$0xff] }
 0x1ee   : > { %2191 = vmatpush2.msra.mxu0 %v1990_v14  ;;  %2231 = vmatprep.subr.mxu1 %v2027_v6  ;;  %v2024_v14 = vld [vmem:[%s7419_s5 + $0x260] sm:$0xff] }
 0x1ef   : > { %2192 = vmatprep.subr.mxu0 %v1989_v18  ;;  %2232 = vmatpush1.msra.mxu1 %v2026_v59  ;;  %v2022_v18 = vld [vmem:[%s7419_s5 + $0x250] sm:$0xff]  ;;  %v2048_v59 = vld [vmem:[%s7419_s5 + $0x320] sm:$0xff] }
 0x1f0   : > { %2193 = vmatpush2.msra.mxu0 %v1988_v10  ;;  %2233 = vmatprep.subr.mxu1 %v2025_v42  ;;  %v2019_v10 = vld [vmem:[%s7419_s5 + $0x238] sm:$0xff] }
 0x1f1   : > { %2194 = vmatprep.subr.mxu0 %v1987_v9  ;;  %2234 = vmatpush1.msra.mxu1 %v2024_v14  ;;  %v2018_v9 = vld [vmem:[%s7419_s5 + $0x230] sm:$0xff] }
 0x1f2   : > { %2195 = vmatpush2.msra.mxu0 %v1986_v15  ;;  %v2017_v15 = vld [vmem:[%s7419_s5 + $0x228] sm:$0xff] }
 0x1f3   : > { %2196 = vmatprep.subr.mxu0 %v1985_v29  ;;  %v2016_v29 = vld [vmem:[%s7419_s5 + $0x220] sm:$0xff] }
 0x1f4   : > { %2197 = vmatpush2.msra.mxu0 %v1984_v50  ;;  %v2015_v50 = vld [vmem:[%s7419_s5 + $0x218] sm:$0xff] }
 0x1f5   : > { %v4725_v40 = vpop.permute.xlu0 %4724  ;;  %2198 = vmatprep.subr.mxu0 %v1983_v16  ;;  %v2073_v16 = vld [vmem:[%s7419_s5 + $0x3e8] sm:$0xff] }
 0x1f6   : > { %v4727_v23 = vunpack.i.h.bf16 %v4725_v40  ;;  %v4726_v39 = vunpack.i.l.bf16 %v4725_v40  ;;  %2199 = vmatpush2.msra.mxu0 %v1982_v45  ;;  %v2023_v40 = vld [vmem:[%s7419_s5 + $0x258] sm:$0xff]  ;;  %v2069_v45 = vld [vmem:[%s7419_s5 + $0x3c8] sm:$0xff] }
 0x1f7   : > { %2200 = vmatprep.subr.mxu0 %v1981_v25  ;;  %2235 = vmatprep.subr.mxu1 %v2023_v40  ;;  %v2062_v25 = vld [vmem:[%s7419_s5 + $0x390] sm:$0xff] }
 0x1f8   : > { %v1845_v57 = vsel %vm604_vm1, %v4726_v39, %v4727_v23  ;;  %2201 = vmatpush2.msra.mxu0 %v1980_v2  ;;  %2236 = vmatpush1.msra.mxu1 %v2022_v18  ;;  %v2060_v2 = vld [vmem:[%s7419_s5 + $0x380] sm:$0xff] }
 0x1f9   : > { %v6351_v13 = vpop.permute.xlu1 %4729  ;;  %v6386_v8 = vmax.f32 %v7501_v17, %v1845_v57  ;;  %2292 = vmatprep.subr.mxu0 %v2107_v49  ;;  %v2014_v57 = vld [vmem:[%s7419_s5 + $0x210] sm:$0xff]  ;;  %v2067_v17 = vld [vmem:[%s7419_s5 + $0x3b8] sm:$0xff]  ;;  %v2056_v49 = vld [vmem:[%s7419_s5 + $0x360] sm:$0xff] }
 0x1fa   : > { %v4732_v35 = vunpack.i.h.bf16 %v6351_v13  ;;  %v4731_v60 = vunpack.i.l.bf16 %v6351_v13 }
 0x1fc   : > { %v1844_v37 = vsel %vm604_vm1, %v4732_v35, %v4726_v39  ;;  %v1846_v41 = vsel %vm604_vm1, %v4727_v23, %v4731_v60  ;;  %v2021_v23 = vld [vmem:[%s7419_s5 + $0x248] sm:$0xff]  ;;  %v2020_v39 = vld [vmem:[%s7419_s5 + $0x240] sm:$0xff] }
 0x1fd   : > { %v6390_v4 = vmax.f32 %v7503_v44, %v1844_v37  ;;  %v6394_v43 = vmax.f32 %v7505_v54, %v1846_v41  ;;  %2237 = vmatprep.subr.mxu1 %v2021_v23  ;;  %v2013_v35 = vld [vmem:[%s7419_s5 + $0x208] sm:$0xff]  ;;  %v2071_v37 = vld [vmem:[%s7419_s5 + $0x3d8] sm:$0xff]  ;;  %v2070_v41 = vld [vmem:[%s7419_s5 + $0x3d0] sm:$0xff] }
 0x1fe   : > { %2238 = vmatpush1.msra.mxu1 %v2020_v39  ;;  %v2065_v44 = vld [vmem:[%s7419_s5 + $0x3a8] sm:$0xff]  ;;  %v2063_v54 = vld [vmem:[%s7419_s5 + $0x398] sm:$0xff] }
 0x1ff   : > { %1890 = vrot.lane.b32.xlu1 %v6390_v4, %s7506_s12  ;;  %v4743_v52 = vpack.i.bf16 %v6394_v43, %v6386_v8  ;;  %2239 = vmatprep.subr.mxu1 %v2019_v10 }
 0x200   : > { %2240 = vmatpush1.msra.mxu1 %v2018_v9 }
 0x201   : > { %4744 = vrot.lane.b32.xlu0 %v4743_v52, %s7506_s12  ;;  %2241 = vmatprep.subr.mxu1 %v2017_v15  ;;  %v2059_v52 = vld [vmem:[%s7419_s5 + $0x378] sm:$0xff] }
 0x202   : > { %2242 = vmatpush1.msra.mxu1 %v2016_v29  ;;  %v7507_v29 = vld [vmem:[#allocation30_spill] sm:$0xff] }
 0x203   : > { %2243 = vmatprep.subr.mxu1 %v2015_v50  ;;  %v7508_v50 = vmax.f32 %v7507_v29, 0.0  ;;  %v2123_v29 = vld [vmem:[%s7419_s5 + $0x578] sm:$0x1] }
 0x204   : > { %2244 = vmatpush1.msra.mxu1 %v2014_v57 }
 0x205   : > { %2245 = vmatprep.subr.mxu1 %v2013_v35 }
 0x206   : > { %2246 = vmatpush1.msra.mxu1 %v2012_v22 }
 0x207   : > { %2247 = vmatprep.subr.mxu1 %v2075_v26 }
 0x208   : > { %2248 = vmatpush2.msra.mxu1 %v2074_v28 }
 0x209   : > { %2249 = vmatprep.subr.mxu1 %v2073_v16 }
 0x20a   : > { %2250 = vmatpush2.msra.mxu1 %v2072_v51 }
 0x20b   : > { %2251 = vmatprep.subr.mxu1 %v2071_v37 }
 0x20c   : > { %2252 = vmatpush2.msra.mxu1 %v2070_v41 }
 0x20d   : > { %2253 = vmatprep.subr.mxu1 %v2069_v45 }
 0x20e   : > { %2254 = vmatpush2.msra.mxu1 %v2068_v7 }
 0x20f   : > { %2255 = vmatprep.subr.mxu1 %v2067_v17 }
 0x210   : > { %2256 = vmatpush2.msra.mxu1 %v2066_v53 }
 0x211   : > { %2257 = vmatprep.subr.mxu1 %v2065_v44  ;;  %v2106_v44 = vld [vmem:[%s7419_s5 + $0x4f0] sm:$0xff] }
 0x212   : > { %2258 = vmatpush2.msra.mxu1 %v2064_v56  ;;  %v2105_v56 = vld [vmem:[%s7419_s5 + $0x4e8] sm:$0xff] }
 0x213   : > { %2259 = vmatprep.subr.mxu1 %v2063_v54  ;;  %v2104_v54 = vld [vmem:[%s7419_s5 + $0x4e0] sm:$0xff] }
 0x214   : > { %2260 = vmatpush2.msra.mxu1 %v2062_v25  ;;  %v2101_v25 = vld [vmem:[%s7419_s5 + $0x4c8] sm:$0xff] }
 0x215   : > { %2261 = vmatprep.subr.mxu1 %v2061_v0  ;;  %v2100_v0 = vld [vmem:[%s7419_s5 + $0x4c0] sm:$0xff] }
 0x216   : > { %2262 = vmatpush2.msra.mxu1 %v2060_v2  ;;  %v2099_v2 = vld [vmem:[%s7419_s5 + $0x4b8] sm:$0xff] }
 0x217   : > { %2263 = vmatprep.subr.mxu1 %v2059_v52  ;;  %v2098_v52 = vld [vmem:[%s7419_s5 + $0x4b0] sm:$0xff] }
 0x218   : > { %2264 = vmatpush2.msra.mxu1 %v2058_v32  ;;  %v2097_v32 = vld [vmem:[%s7419_s5 + $0x4a8] sm:$0xff] }
 0x219   : > { %2265 = vmatprep.subr.mxu1 %v2057_v55  ;;  %v2096_v55 = vld [vmem:[%s7419_s5 + $0x4a0] sm:$0xff] }
 0x21a   : > { %2266 = vmatpush2.msra.mxu1 %v2056_v49  ;;  %v2095_v49 = vld [vmem:[%s7419_s5 + $0x498] sm:$0xff] }
 0x21b   : > { %2267 = vmatprep.subr.mxu1 %v2055_v30  ;;  %v2094_v30 = vld [vmem:[%s7419_s5 + $0x490] sm:$0xff] }
 0x21c   : > { %2268 = vmatpush2.msra.mxu1 %v2054_v33  ;;  %v2093_v33 = vld [vmem:[%s7419_s5 + $0x488] sm:$0xff] }
 0x21d   : > { %2269 = vmatprep.subr.mxu1 %v2053_v58  ;;  %v2092_v58 = vld [vmem:[%s7419_s5 + $0x480] sm:$0xff] }
 0x21e   : > { %2270 = vmatpush2.msra.mxu1 %v2052_v12  ;;  %v2091_v12 = vld [vmem:[%s7419_s5 + $0x478] sm:$0xff] }
 0x21f   : > { %2271 = vmatprep.subr.mxu1 %v2051_v19  ;;  %v2090_v19 = vld [vmem:[%s7419_s5 + $0x470] sm:$0xff] }
 0x220   : > { %2272 = vmatpush2.msra.mxu1 %v2050_v63  ;;  %v2088_v63 = vld [vmem:[%s7419_s5 + $0x460] sm:$0xff] }
 0x221   : > { %2273 = vmatprep.subr.mxu1 %v2049_v5  ;;  %v2087_v5 = vld [vmem:[%s7419_s5 + $0x458] sm:$0xff] }
 0x222   : > { %2274 = vmatpush2.msra.mxu1 %v2048_v59  ;;  %v2084_v59 = vld [vmem:[%s7419_s5 + $0x440] sm:$0xff] }
 0x241   : > { %v4735_v38 = vpop.permute.xlu0 %4734 }
 0x242   : > { %v4737_v48 = vunpack.i.h.bf16 %v4735_v38  ;;  %v4736_v6 = vunpack.i.l.bf16 %v4735_v38  ;;  %v2089_v38 = vld [vmem:[%s7419_s5 + $0x468] sm:$0xff] }
 0x244   : > { %v1850_v40 = vsel %vm604_vm1, %v4736_v6, %v4737_v48 }
 0x245   : > { %v1829_v42 = vpop.permute.xlu0 %1828  ;;  %v4740_v14 = vpop.permute.xlu1 %4739  ;;  %v6586_v15 = vmax.f32 %v1779_v46, %v1850_v40  ;;  %v2047_v46 = vld [vmem:[%s7419_s5 + $0x318] sm:$0xff]  ;;  %v2081_v40 = vld [vmem:[%s7419_s5 + $0x428] sm:$0xff] }
 0x246   : > { %v1847_v18 = vsel %vm604_vm1, %v4731_v60, %v1829_v42  ;;  %v4742_v23 = vunpack.i.h.bf16 %v4740_v14  ;;  %v4741_v39 = vunpack.i.l.bf16 %v4740_v14  ;;  %2275 = vmatprep.subr.mxu1 %v2047_v46  ;;  %v2082_v14 = vld [vmem:[%s7419_s5 + $0x430] sm:$0xff]  ;;  %v2119_v46 = vld [vmem:[%s7419_s5 + $0x558] sm:$0xff] }
 0x247   : > { %v6590_v57 = vmax.f32 %v7508_v50, %v1847_v18  ;;  %2276 = vmatpush2.msra.mxu1 %v2046_v34  ;;  %v2080_v18 = vld [vmem:[%s7419_s5 + $0x420] sm:$0xff]  ;;  %v2122_v50 = vld [vmem:[%s7419_s5 + $0x570] sm:$0x1] }
 0x248   : > { %v1849_v10 = vsel %vm604_vm1, %v4742_v23, %v4736_v6  ;;  %v1851_v9 = vsel %vm604_vm1, %v4737_v48, %v4741_v39  ;;  %v2086_v48 = vld [vmem:[%s7419_s5 + $0x450] sm:$0xff]  ;;  %v2085_v6 = vld [vmem:[%s7419_s5 + $0x448] sm:$0xff]  ;;  %v2079_v23 = vld [vmem:[%s7419_s5 + $0x418] sm:$0xff] }
 0x249   : > { %v6594_v35 = vmax.f32 %v1778_v36, %v1849_v10  ;;  %v6598_v13 = vmax.f32 %v1780_v62, %v1851_v9  ;;  %v2045_v62 = vld [vmem:[%s7419_s5 + $0x308] sm:$0xff]  ;;  %v1841_v36 = vpop.permute.xlu0 %1840  ;;  %v2076_v9 = vld [vmem:[%s7419_s5 + $0x400] sm:$0xff]  ;;  %v2118_v34 = vld [vmem:[%s7419_s5 + $0x550] sm:$0xff] }
 0x24a   : > { %2277 = vmatprep.subr.mxu1 %v2045_v62  ;;  %v1852_v51 = vsel %vm604_vm1, %v4741_v39, %v1841_v36  ;;  %v2078_v39 = vld [vmem:[%s7419_s5 + $0x410] sm:$0xff]  ;;  %v2077_v10 = vld [vmem:[%s7419_s5 + $0x408] sm:$0xff] }
 0x24b   : > { %v4753_v60 = vpack.i.bf16 %v6590_v57, %v6594_v35  ;;  %v4748_v61 = vpack.i.bf16 %v6598_v13, %v6586_v15  ;;  %2278 = vmatpush2.msra.mxu1 %v2044_v21  ;;  %v2117_v62 = vld [vmem:[%s7419_s5 + $0x548] sm:$0xff]  ;;  %v2116_v21 = vld [vmem:[%s7419_s5 + $0x540] sm:$0xff] }
 0x24d   : > { %4754 = vrot.lane.b32.xlu1 %v4753_v60, %s7506_s12  ;;  %4749 = vrot.lane.b32.xlu0 %v4748_v61, %s7506_s12  ;;  %v2121_v60 = vld [vmem:[%s7419_s5 + $0x568] sm:$0xff]  ;;  %v2120_v61 = vld [vmem:[%s7419_s5 + $0x560] sm:$0xff] }
 0x257   : > { %v1831_v22 = vpop.permute.xlu1 %1830 }
 0x258   : > { %v1848_v26 = vsel %vm604_vm1, %v1829_v42, %v1831_v22  ;;  %v6620_v28 = vmax.f32 %v6280_v27, %v1831_v22  ;;  %v6637_v27 = vmax.f32 %v1781_v20, %v1852_v51  ;;  %v2083_v42 = vld [vmem:[%s7419_s5 + $0x438] sm:$0xff]  ;;  %v2114_v22 = vld [vmem:[%s7419_s5 + $0x530] sm:$0xff]  ;;  %v2112_v51 = vld [vmem:[%s7419_s5 + $0x520] sm:$0xff] }
 0x259   : > { %v6624_v16 = vmax.f32 %v1776_v3, %v1848_v26  ;;  %v2113_v26 = vld [vmem:[%s7419_s5 + $0x528] sm:$0xff] }
 0x25a   : > { %1900 = vrot.lane.b32.xlu1 %v6620_v28, %s7506_s12 }
 0x25b   : > { %v1843_v37 = vpop.permute.xlu1 %1842  ;;  %1898 = vrot.lane.b32.xlu0 %v6624_v16, %s7506_s12 }
 0x25c   : > { %v1853_v41 = vsel %vm604_vm1, %v1841_v36, %v1843_v37  ;;  %v6633_v45 = vmax.f32 %v6296_v11, %v1843_v37  ;;  %v2115_v36 = vld [vmem:[%s7419_s5 + $0x538] sm:$0xff] }
 0x25d   : > { %v6641_v24 = vmax.f32 %v1782_v31, %v1853_v41  ;;  %v2111_v37 = vld [vmem:[%s7419_s5 + $0x518] sm:$0xff]  ;;  %v2110_v41 = vld [vmem:[%s7419_s5 + $0x510] sm:$0xff] }
 0x25e   : > { %1912 = vrot.lane.b32.xlu1 %v6633_v45, %s7506_s12 }
 0x25f   : > { %v4758_v3 = vpack.i.bf16 %v6641_v24, %v6637_v27 }
 0x261   : > { %4759 = vrot.lane.b32.xlu0 %v4758_v3, %s7506_s12  ;;  %v2109_v3 = vld [vmem:[%s7419_s5 + $0x508] sm:$0xff] }
 0x271   : > { %v1891_v20 = vpop.permute.xlu1 %1890 }
 0x273   : > { %v6648_v7 = vpop.permute.xlu0 %4744 }
 0x274   : > { %v4747_v11 = vunpack.i.h.bf16 %v6648_v7  ;;  %v4746_v1 = vunpack.i.l.bf16 %v6648_v7 }
 0x276   : > { %v1915_v47 = vsel %vm908_vm3, %v4746_v1, %v4747_v11  ;;  %v1914_v31 = vsel %vm908_vm3, %v1891_v20, %v4746_v1  ;;  %v2108_v1 = vld [vmem:[%s7419_s5 + $0x500] sm:$0xff] }
 0x277   : > { %v1937_v17 = vmax.f32 %v6386_v8, %v1915_v47  ;;  %v1936_v53 = vmax.f32 %v6390_v4, %v1914_v31  ;;  %v2103_v8 = vld [vmem:[%s7419_s5 + $0x4d8] sm:$0xff]  ;;  %v2102_v4 = vld [vmem:[%s7419_s5 + $0x4d0] sm:$0xff] }
 0x279   : > { %2202 = vmatprep.mubr.f32.mxu0 %v1937_v17 }
 0x27a   : > { %2203 = vmatmul.mubr.f32.vlgmr.msra.gmra.mxu0 %v1936_v53 }
 0x27b   : > { %2293 = vmatpush1.msra.mxu0 %v2106_v44 }
 0x27c   : > { %2294 = vmatprep.subr.mxu0 %v2105_v56 }
 0x27d   : > { %2295 = vmatpush1.msra.mxu0 %v2104_v54 }
 0x27e   : > { %2296 = vmatprep.subr.mxu0 %v2103_v8 }
 0x27f   : > { %2297 = vmatpush1.msra.mxu0 %v2102_v4 }
 0x280   : > { %2298 = vmatprep.subr.mxu0 %v2101_v25 }
 0x281   : > { %2299 = vmatpush1.msra.mxu0 %v2100_v0 }
 0x282   : > { %2300 = vmatprep.subr.mxu0 %v2099_v2 }
 0x283   : > { %2301 = vmatpush1.msra.mxu0 %v2098_v52 }
 0x284   : > { %2302 = vmatprep.subr.mxu0 %v2097_v32 }
 0x285   : > { %2303 = vmatpush1.msra.mxu0 %v2096_v55 }
 0x286   : > { %2304 = vmatprep.subr.mxu0 %v2095_v49 }
 0x287   : > { %2305 = vmatpush1.msra.mxu0 %v2094_v30 }
 0x288   : > { %2306 = vmatprep.subr.mxu0 %v2093_v33 }
 0x289   : > { %2307 = vmatpush1.msra.mxu0 %v2092_v58 }
 0x28a   : > { %2308 = vmatprep.subr.mxu0 %v2091_v12 }
 0x28b   : > { %2309 = vmatpush1.msra.mxu0 %v2090_v19  ;;  %v4859_v19 = vmov 0.0  }
 0x28c   : > { %2310 = vmatprep.subr.mxu0 %v2089_v38 }
 0x28d   : > { %2311 = vmatpush1.msra.mxu0 %v2088_v63 }
 0x28e   : > { %2312 = vmatprep.subr.mxu0 %v2087_v5 }
 0x28f   : > { %2313 = vmatpush1.msra.mxu0 %v2086_v48 }
 0x290   : > { %2314 = vmatprep.subr.mxu0 %v2085_v6 }
 0x291   : > { %2315 = vmatpush1.msra.mxu0 %v2084_v59 }
 0x292   : > { %2316 = vmatprep.subr.mxu0 %v2083_v42 }
 0x293   : > { %2317 = vmatpush1.msra.mxu0 %v2082_v14 }
 0x294   : > { %2318 = vmatprep.subr.mxu0 %v2081_v40 }
 0x295   : > { %2319 = vmatpush1.msra.mxu0 %v2080_v18 }
 0x296   : > { %2320 = vmatprep.subr.mxu0 %v2079_v23 }
 0x297   : > { %2321 = vmatpush1.msra.mxu0 %v2078_v39 }
 0x298   : > { %2322 = vmatprep.subr.mxu0 %v2077_v10 }
 0x299   : > { %2323 = vmatpush1.msra.mxu0 %v2076_v9 }
 0x29a   : > { %4444 = vmatprep.subr.msk.mxu0 %vm2131_vm9, %v2123_v29 }
 0x29b   : > { %4445 = vmatpush2.msk.msra.mxu0 %vm2131_vm9, %v2122_v50 }
 0x29c   : > { %2342 = vmatprep.subr.mxu0 %v2121_v60 }
 0x29d   : > { %2343 = vmatpush2.msra.mxu0 %v2120_v61 }
 0x29e   : > { %2344 = vmatprep.subr.mxu0 %v2119_v46 }
 0x29f   : > { %2345 = vmatpush2.msra.mxu0 %v2118_v34  ;;  %v2395_v34 = vld [vmem:[%s7417_s3] sm:$0xff] }
 0x2a0   : > { %2346 = vmatprep.subr.mxu0 %v2117_v62  ;;  %v2396_v62 = vld [vmem:[%s7417_s3 + $0x8] sm:$0xff] }
 0x2a1   : > { %2347 = vmatpush2.msra.mxu0 %v2116_v21  ;;  %v2374_v21 = vld [vmem:[%s7418_s4] sm:$0xff] }
 0x2a2   : > { %2348 = vmatprep.subr.mxu0 %v2115_v36  ;;  %v2375_v36 = vld [vmem:[%s7418_s4 + $0x8] sm:$0xff] }
 0x2a3   : > { %2349 = vmatpush2.msra.mxu0 %v2114_v22 }
 0x2a4   : > { %2350 = vmatprep.subr.mxu0 %v2113_v26 }
 0x2a5   : > { %2351 = vmatpush2.msra.mxu0 %v2112_v51 }
 0x2a6   : > { %2352 = vmatprep.subr.mxu0 %v2111_v37 }
 0x2a7   : > { %2353 = vmatpush2.msra.mxu0 %v2110_v41 }
 0x2a8   : > { %2354 = vmatprep.subr.mxu0 %v2109_v3 }
 0x2a9   : > { %2355 = vmatpush2.msra.mxu0 %v2108_v1 }
 0x2bf   : > { %v4755_v20 = vpop.permute.xlu1 %4754  ;;  %v4750_v47 = vpop.permute.xlu0 %4749 }
 0x2c0   : > { %v4756_v31 = vunpack.i.l.bf16 %v4755_v20  ;;  %v4752_v17 = vunpack.i.h.bf16 %v4750_v47  ;;  %v4751_v53 = vunpack.i.l.bf16 %v4750_v47  ;;  %v4757_v4 = vunpack.i.h.bf16 %v4755_v20  ;;  %v4450_v20 = vld [vmem:[%s7417_s3 + $0x10] sm:$0xff] }
 0x2c2   : > { %v1920_v44 = vsel %vm908_vm3, %v4751_v53, %v4752_v17  ;;  %v1919_v56 = vsel %vm908_vm3, %v4756_v31, %v4751_v53  ;;  %v1916_v52 = vsel %vm908_vm3, %v4747_v11, %v4757_v4  ;;  %v4451_v53 = vld [vmem:[%s7417_s3 + $0x18] sm:$0xff] }
 0x2c3   : > { %v1943_v54 = vmax.f32 %v6586_v15, %v1920_v44  ;;  %v1942_v8 = vmax.f32 %v6594_v35, %v1919_v56  ;;  %v1938_v30 = vmax.f32 %v6394_v43, %v1916_v52 }
 0x2c5   : > { %2208 = vmatprep.mubr.f32.mxu0 %v1943_v54 }
 0x2c6   : > { %2209 = vmatmul.mubr.f32.gmra.mxu0 %v1942_v8  ;;  %v4454_v8 = vld [vmem:[%s7417_s3 + $0x20] sm:$0xff] }
 0x2cc   : > { %v1901_v25 = vpop.permute.xlu1 %1900 }
 0x2cd   : > { %v1941_v0 = vmax.f32 %v6620_v28, %v1901_v25  ;;  %v1899_v2 = vpop.permute.xlu0 %1898 }
 0x2ce   : > { %v1918_v32 = vsel %vm908_vm3, %v1899_v2, %v1901_v25  ;;  %v1917_v55 = vsel %vm908_vm3, %v4757_v4, %v1899_v2  ;;  %v4455_v2 = vld [vmem:[%s7417_s3 + $0x28] sm:$0xff] }
 0x2cf   : > { %v1940_v15 = vmax.f32 %v6624_v16, %v1918_v32  ;;  %v1939_v35 = vmax.f32 %v6590_v57, %v1917_v55  ;;  %4446 = vmatprep.mubr.msk.f32.mxu0 %vm2124_vm10, %v1941_v0 }
 0x2d0   : > { %v1913_v49 = vpop.permute.xlu1 %1912 }
 0x2d1   : > { %v1947_v28 = vmax.f32 %v6633_v45, %v1913_v49  ;;  %2279 = vmatprep.mubr.f32.mxu1 %v1939_v35  ;;  %2357 = vmatmul.mubr.f32.vlgmr.msra.gmra.mxu0 %v1940_v15  ;;  %v4458_v15 = vld [vmem:[%s7417_s3 + $0x30] sm:$0xff] }
 0x2d2   : > { %2280 = vmatmul.mubr.f32.vlgmr.msra.gmra.mxu1 %v1938_v30 }
 0x2d3   : > { %v4760_v7 = vpop.permute.xlu0 %4759  ;;  %4447 = vmatprep.mubr.msk.f32.mxu0 %vm2124_vm10, %v1947_v28  ;;  %v4459_v28 = vld [vmem:[%s7417_s3 + $0x38] sm:$0xff] }
 0x2d4   : > { %v4762_v11 = vunpack.i.h.bf16 %v4760_v7  ;;  %v4761_v33 = vunpack.i.l.bf16 %v4760_v7 }
 0x2d6   : > { %v1922_v58 = vsel %vm908_vm3, %v4761_v33, %v4762_v11  ;;  %v1921_v16 = vsel %vm908_vm3, %v4752_v17, %v4761_v33  ;;  %v1923_v57 = vsel %vm908_vm3, %v4762_v11, %v1913_v49 }
 0x2d7   : > { %v1945_v12 = vmax.f32 %v6637_v27, %v1922_v58  ;;  %v1944_v43 = vmax.f32 %v6598_v13, %v1921_v16  ;;  %v1946_v45 = vmax.f32 %v6641_v24, %v1923_v57  ;;  %v4462_v58 = vld [vmem:[%s7417_s3 + $0x40] sm:$0xff] }
 0x2d9   : > { %2285 = vmatprep.mubr.f32.mxu1 %v1945_v12  ;;  %2363 = vmatmul.mubr.f32.gmra.mxu0 %v1946_v45 }
 0x2da   : > { %2286 = vmatmul.mubr.f32.gmra.mxu1 %v1944_v43  ;;  %3196 = vmatprep.mubr.f32.mxu0 %v4859_v19  ;;  %v4463_v43 = vld [vmem:[%s7417_s3 + $0x48] sm:$0xff] }
 0x2db   : > { %2472 = vmatprep.mubr.f32.mxu1 %v4859_v19 }
 0x33a   : > { %v2204_v38 = vpop.f32.mrf.mxu0 }
 0x33c   : > { %v2206_v63 = vpop.f32.mrf.mxu0 }
 0x386   : > { %v2210_v5 = vpop.f32.mrf.mxu0 }
 0x388   : > { %v2212_v48 = vpop.f32.mrf.mxu0 }
 0x391   : > { %v2358_v59 = vpop.f32.mrf.mxu0 }
 0x392   : > { %v2281_v6 = vpop.f32.mrf.mxu1 }
 0x393   : > { %v2282_v42 = vadd.f32 %v2281_v6, %v2204_v38  ;;  %v2360_v40 = vpop.f32.mrf.mxu0 }
 0x394   : > { %v2283_v27 = vpop.f32.mrf.mxu1 }
 0x395   : > { %v2284_v14 = vadd.f32 %v2283_v27, %v2206_v63  ;;  %v2359_v13 = vadd.f32 %v2358_v59, %v2282_v42  ;;  %v4467_v59 = vld [vmem:[%s7417_s3 + $0x58] sm:$0xff] }
 0x397   : > { %v2361_v24 = vadd.f32 %v2360_v40, %v2284_v14 }
 0x399   : > { %2371 = vst.msk [vmem:[#allocation3 + $0x8] sm:$0xff] %vm2370_vm11, %v2361_v24  ;;  %v2364_v23 = vpop.f32.mrf.mxu0 }
 0x39a   : > { %v2287_v18 = vpop.f32.mrf.mxu1 }
 0x39b   : > { %v2288_v39 = vadd.f32 %v2287_v18, %v2210_v5  ;;  %v2366_v50 = vpop.f32.mrf.mxu0  ;;  %v4466_v5 = vld [vmem:[%s7417_s3 + $0x50] sm:$0xff] }
 0x39c   : > { %v2289_v10 = vpop.f32.mrf.mxu1 }
 0x39d   : > { %v2365_v9 = vadd.f32 %v2364_v23, %v2288_v39  ;;  %v2290_v29 = vadd.f32 %v2289_v10, %v2212_v48  ;;  %v4471_v23 = vld [vmem:[%s7417_s3 + $0x68] sm:$0xff] }
 0x39f   : > { %v2367_v60 = vadd.f32 %v2366_v50, %v2290_v29  ;;  %2512 = vrot.lane.b32.xlu0 %v2365_v9, %s7509_s30 }
 0x3a0   : > { %v2398_v46 = vld [vmem:[#allocation3 + $0x8] sm:$0xff] }
 0x3a1   : > { %2373 = vst.msk [vmem:[#allocation3 + $0x18] sm:$0xff] %vm2370_vm11, %v2367_v60 }
 0x3a3   : > { %2508 = vrot.lane.b32.xlu0 %v2359_v13, %s7509_s30 }
 0x3a7   : > { %2632 = vrot.lane.b32.xlu0 %v2365_v9, %s7510_s25 }
 0x3a8   : > { %v2503_v61 = vld [vmem:[#allocation3 + $0x18] sm:$0xff] }
 0x3a9   : > { %2514 = vrot.lane.b32.xlu1 %v2503_v61, %s7509_s30  ;;  %2436 = vmatprep.subr.mxu1 %v2503_v61 }
 0x3aa   : > { %2437 = vmatpush1.msra.mxu1 %v2365_v9 }
 0x3ab   : > { %2438 = vmatprep.subr.mxu1 %v2398_v46  ;;  %2628 = vrot.lane.b32.xlu0 %v2359_v13, %s7510_s25 }
 0x3ac   : > { %2439 = vmatpush1.msra.mxu1 %v2359_v13 }
 0x3ad   : > { %2510 = vrot.lane.b32.xlu1 %v2398_v46, %s7509_s30  ;;  %4448 = vmatmul.mubr.msk.f32.vlgmr.msra.gmra.mxu1 %vm2401_vm12, %v2395_v34 }
 0x3ae   : > { %2478 = vmatprep.mubr.f32.mxu1 %v4859_v19 }
 0x3af   : > { %2752 = vrot.lane.b32.xlu0 %v2365_v9, %s4860_s15 }
 0x3b1   : > { %2634 = vrot.lane.b32.xlu1 %v2503_v61, %s7510_s25  ;;  %4449 = vmatmul.mubr.msk.f32.gmra.mxu1 %vm2401_vm12, %v2396_v62 }
 0x3b2   : > { %2592 = vmatprep.mubr.f32.mxu1 %v4859_v19 }
 0x3b3   : > { %2748 = vrot.lane.b32.xlu0 %v2359_v13, %s4860_s15 }
 0x3b5   : > { %2630 = vrot.lane.b32.xlu1 %v2398_v46, %s7510_s25  ;;  %s4873_s25 = smov 22  }
 0x3b7   : > { %2873 = vrot.lane.b32.xlu0 %v2365_v9, %s4861_s16 }
 0x3b9   : > { %2754 = vrot.lane.b32.xlu1 %v2503_v61, %s4860_s15 }
 0x3bb   : > { %2869 = vrot.lane.b32.xlu0 %v2359_v13, %s4861_s16 }
 0x3bd   : > { %2750 = vrot.lane.b32.xlu1 %v2398_v46, %s4860_s15 }
 0x3bf   : > { %2994 = vrot.lane.b32.xlu0 %v2365_v9, %s4862_s14 }
 0x3c1   : > { %2875 = vrot.lane.b32.xlu1 %v2503_v61, %s4861_s16 }
 0x3c3   : > { %2990 = vrot.lane.b32.xlu0 %v2359_v13, %s4862_s14 }
 0x3c5   : > { %2871 = vrot.lane.b32.xlu1 %v2398_v46, %s4861_s16  ;;  %s4870_s16 = smov 25  }
 0x3c7   : > { %3115 = vrot.lane.b32.xlu0 %v2365_v9, %s4863_s24 }
 0x3c9   : > { %2996 = vrot.lane.b32.xlu1 %v2503_v61, %s4862_s14 }
 0x3cb   : > { %3111 = vrot.lane.b32.xlu0 %v2359_v13, %s4863_s24 }
 0x3cd   : > { %2992 = vrot.lane.b32.xlu1 %v2398_v46, %s4862_s14  ;;  %s4867_s14 = smov 97  }
 0x3cf   : > { %3236 = vrot.lane.b32.xlu0 %v2365_v9, %s4864_s22 }
 0x3d1   : > { %3117 = vrot.lane.b32.xlu1 %v2503_v61, %s4863_s24 }
 0x3d3   : > { %3232 = vrot.lane.b32.xlu0 %v2359_v13, %s4864_s22 }
 0x3d5   : > { %3113 = vrot.lane.b32.xlu1 %v2398_v46, %s4863_s24  ;;  %s4866_s24 = smov 122  }
 0x3d7   : > { %3357 = vrot.lane.b32.xlu0 %v2365_v9, %s7506_s12  ;;  %v4474_v9 = vld [vmem:[%s7417_s3 + $0x70] sm:$0xff] }
 0x3d9   : > { %3238 = vrot.lane.b32.xlu1 %v2503_v61, %s4864_s22 }
 0x3db   : > { %3353 = vrot.lane.b32.xlu0 %v2359_v13, %s7506_s12  ;;  %v4470_v13 = vld [vmem:[%s7417_s3 + $0x60] sm:$0xff] }
 0x3dd   : > { %3234 = vrot.lane.b32.xlu1 %v2398_v46, %s4864_s22  ;;  %s7514_s22 = smov 72  }
 0x3df   : > { %2378 = vperm.xlu0 %4721, %v2374_v21   ;;  %v4478_v21 = vld [vmem:[%s7417_s3 + $0x80] sm:$0xff] }
 0x3e1   : > { %3359 = vrot.lane.b32.xlu1 %v2503_v61, %s7506_s12  ;;  %v4475_v61 = vld [vmem:[%s7417_s3 + $0x78] sm:$0xff] }
 0x3e5   : > { %3355 = vrot.lane.b32.xlu1 %v2398_v46, %s7506_s12 }
 0x3e9   : > { %2383 = vperm.xlu1 %4722, %v2375_v36  }
 0x411   : > { %v2513_v22 = vpop.permute.xlu0 %2512 }
 0x415   : > { %v2509_v26 = vpop.permute.xlu0 %2508 }
 0x419   : > { %v2633_v51 = vpop.permute.xlu0 %2632 }
 0x41b   : > { %v2515_v37 = vpop.permute.xlu1 %2514 }
 0x41c   : > { %v2517_v41 = vsel %vm604_vm1, %v2513_v22, %v2515_v37  ;;  %2556 = vmatprep.subr.mxu1 %v2515_v37 }
 0x41d   : > { %2557 = vmatpush1.msra.mxu1 %v2517_v41  ;;  %v2629_v3 = vpop.permute.xlu0 %2628 }
 0x41f   : > { %v2511_v1 = vpop.permute.xlu1 %2510 }
 0x420   : > { %v2516_v47 = vsel %vm604_vm1, %v2509_v26, %v2511_v1  ;;  %2558 = vmatprep.subr.mxu1 %v2511_v1  ;;  %vm3240_vm1 = vcmask 826368   ;;  %v4479_v26 = vld [vmem:[%s7417_s3 + $0x88] sm:$0xff] }
 0x421   : > { %2559 = vmatpush1.msra.mxu1 %v2516_v47  ;;  %v2753_v31 = vpop.permute.xlu0 %2752 }
 0x422   : > { %4452 = vmatmul.mubr.msk.f32.vlgmr.msra.gmra.mxu1 %vm2401_vm12, %v4450_v20 }
 0x423   : > { %v2635_v17 = vpop.permute.xlu1 %2634  ;;  %2598 = vmatprep.mubr.f32.mxu1 %v4859_v19 }
 0x424   : > { %v2637_v44 = vsel %vm756_vm2, %v2633_v51, %v2635_v17  ;;  %2676 = vmatprep.subr.mxu1 %v2635_v17 }
 0x425   : > { %2677 = vmatpush1.msra.mxu1 %v2637_v44  ;;  %v2749_v56 = vpop.permute.xlu0 %2748 }
 0x426   : > { %4453 = vmatmul.mubr.msk.f32.gmra.mxu1 %vm2401_vm12, %v4451_v53 }
 0x427   : > { %v2631_v54 = vpop.permute.xlu1 %2630  ;;  %2712 = vmatprep.mubr.f32.mxu1 %v4859_v19 }
 0x428   : > { %v2636_v4 = vsel %vm756_vm2, %v2629_v3, %v2631_v54  ;;  %2678 = vmatprep.subr.mxu1 %v2631_v54  ;;  %vm2387_vm2 = vcmask 105472  }
 0x429   : > { %2679 = vmatpush1.msra.mxu1 %v2636_v4  ;;  %v2874_v25 = vpop.permute.xlu0 %2873 }
 0x42a   : > { %4456 = vmatmul.mubr.msk.f32.vlgmr.msra.gmra.mxu1 %vm2401_vm12, %v4454_v8 }
 0x42b   : > { %v2755_v0 = vpop.permute.xlu1 %2754  ;;  %2718 = vmatprep.mubr.f32.mxu1 %v4859_v19 }
 0x42c   : > { %v2758_v52 = vsel %vm2756_vm13, %v2753_v31, %v2755_v0  ;;  %2797 = vmatprep.subr.mxu1 %v2755_v0 }
 0x42d   : > { %2798 = vmatpush1.msra.mxu1 %v2758_v52  ;;  %v2870_v32 = vpop.permute.xlu0 %2869 }
 0x42e   : > { %4457 = vmatmul.mubr.msk.f32.gmra.mxu1 %vm2401_vm12, %v4455_v2 }
 0x42f   : > { %v2751_v55 = vpop.permute.xlu1 %2750  ;;  %2833 = vmatprep.mubr.f32.mxu1 %v4859_v19 }
 0x430   : > { %v2757_v35 = vsel %vm2756_vm13, %v2749_v56, %v2751_v55  ;;  %2799 = vmatprep.subr.mxu1 %v2751_v55 }
 0x431   : > { %2800 = vmatpush1.msra.mxu1 %v2757_v35  ;;  %v2995_v49 = vpop.permute.xlu0 %2994 }
 0x432   : > { %4460 = vmatmul.mubr.msk.f32.vlgmr.msra.gmra.mxu1 %vm2401_vm12, %v4458_v15 }
 0x433   : > { %v2876_v30 = vpop.permute.xlu1 %2875  ;;  %2839 = vmatprep.mubr.f32.mxu1 %v4859_v19 }
 0x434   : > { %v2879_v7 = vsel %vm2877_vm14, %v2874_v25, %v2876_v30  ;;  %2918 = vmatprep.subr.mxu1 %v2876_v30 }
 0x435   : > { %2919 = vmatpush1.msra.mxu1 %v2879_v7  ;;  %v2991_v11 = vpop.permute.xlu0 %2990 }
 0x436   : > { %4461 = vmatmul.mubr.msk.f32.gmra.mxu1 %vm2401_vm12, %v4459_v28 }
 0x437   : > { %v2872_v33 = vpop.permute.xlu1 %2871  ;;  %2954 = vmatprep.mubr.f32.mxu1 %v4859_v19 }
 0x438   : > { %v2878_v16 = vsel %vm2877_vm14, %v2870_v32, %v2872_v33  ;;  %2920 = vmatprep.subr.mxu1 %v2872_v33 }
 0x439   : > { %2921 = vmatpush1.msra.mxu1 %v2878_v16  ;;  %v3116_v57 = vpop.permute.xlu0 %3115 }
 0x43a   : > { %4464 = vmatmul.mubr.msk.f32.vlgmr.msra.gmra.mxu1 %vm2401_vm12, %v4462_v58 }
 0x43b   : > { %v2997_v12 = vpop.permute.xlu1 %2996  ;;  %2960 = vmatprep.mubr.f32.mxu1 %v4859_v19 }
 0x43c   : > { %v3000_v45 = vsel %vm2998_vm15, %v2995_v49, %v2997_v12  ;;  %3039 = vmatprep.subr.mxu1 %v2997_v12 }
 0x43d   : > { %3040 = vmatpush1.msra.mxu1 %v3000_v45  ;;  %v3112_v38 = vpop.permute.xlu0 %3111 }
 0x43e   : > { %4465 = vmatmul.mubr.msk.f32.gmra.mxu1 %vm2401_vm12, %v4463_v43 }
 0x43f   : > { %v2993_v63 = vpop.permute.xlu1 %2992  ;;  %3075 = vmatprep.mubr.f32.mxu1 %v4859_v19 }
 0x440   : > { %v2999_v48 = vsel %vm2998_vm15, %v2991_v11, %v2993_v63  ;;  %3041 = vmatprep.subr.mxu1 %v2993_v63 }
 0x441   : > { %3042 = vmatpush1.msra.mxu1 %v2999_v48  ;;  %v3237_v27 = vpop.permute.xlu0 %3236 }
 0x442   : > { %4468 = vmatmul.mubr.msk.f32.vlgmr.msra.gmra.mxu1 %vm2401_vm12, %v4466_v5 }
 0x443   : > { %v3118_v6 = vpop.permute.xlu1 %3117  ;;  %3081 = vmatprep.mubr.f32.mxu1 %v4859_v19 }
 0x444   : > { %v3121_v42 = vsel %vm3119_vm0, %v3116_v57, %v3118_v6  ;;  %3160 = vmatprep.subr.mxu0 %v3118_v6 }
 0x445   : > { %3161 = vmatpush1.msra.mxu0 %v3121_v42  ;;  %v3233_v24 = vpop.permute.xlu0 %3232 }
 0x446   : > { %4469 = vmatmul.mubr.msk.f32.gmra.mxu1 %vm2401_vm12, %v4467_v59 }
 0x447   : > { %v3114_v14 = vpop.permute.xlu1 %3113  ;;  %3317 = vmatprep.mubr.f32.mxu1 %v4859_v19 }
 0x448   : > { %v3120_v40 = vsel %vm3119_vm0, %v3112_v38, %v3114_v14  ;;  %3162 = vmatprep.subr.mxu0 %v3114_v14 }
 0x449   : > { %3163 = vmatpush1.msra.mxu0 %v3120_v40  ;;  %v3358_v50 = vpop.permute.xlu0 %3357 }
 0x44a   : > { %4472 = vmatmul.mubr.msk.f32.vlgmr.msra.gmra.mxu0 %vm2401_vm12, %v4470_v13 }
 0x44b   : > { %v3239_v18 = vpop.permute.xlu1 %3238  ;;  %3202 = vmatprep.mubr.f32.mxu0 %v4859_v19 }
 0x44c   : > { %v3242_v39 = vsel %vm3240_vm1, %v3237_v27, %v3239_v18  ;;  %3281 = vmatprep.subr.mxu1 %v3239_v18 }
 0x44d   : > { %3282 = vmatpush1.msra.mxu1 %v3242_v39  ;;  %v3354_v34 = vpop.permute.xlu0 %3353 }
 0x44e   : > { %4473 = vmatmul.mubr.msk.f32.gmra.mxu0 %vm2401_vm12, %v4471_v23 }
 0x44f   : > { %v3235_v10 = vpop.permute.xlu1 %3234  ;;  %3437 = vmatprep.mubr.f32.mxu0 %v4859_v19 }
 0x450   : > { %v3241_v29 = vsel %vm3240_vm1, %v3233_v24, %v3235_v10  ;;  %3283 = vmatprep.subr.mxu1 %v3235_v10 }
 0x451   : > { %3284 = vmatpush1.msra.mxu1 %v3241_v29 }
 0x452   : > { %4476 = vmatmul.mubr.msk.f32.vlgmr.msra.gmra.mxu1 %vm2401_vm12, %v4474_v9 }
 0x453   : > { %v3360_v60 = vpop.permute.xlu1 %3359  ;;  %3323 = vmatprep.mubr.f32.mxu1 %v4859_v19 }
 0x454   : > { %v3362_v46 = vsel %vm908_vm3, %v3358_v50, %v3360_v60  ;;  %3401 = vmatprep.subr.mxu0 %v3360_v60 }
 0x455   : > { %3402 = vmatpush1.msra.mxu0 %v3362_v46 }
 0x456   : > { %4477 = vmatmul.mubr.msk.f32.gmra.mxu1 %vm2401_vm12, %v4475_v61 }
 0x457   : > { %v3356_v62 = vpop.permute.xlu1 %3355 }
 0x458   : > { %v3361_v36 = vsel %vm908_vm3, %v3354_v34, %v3356_v62  ;;  %3403 = vmatprep.subr.mxu0 %v3356_v62  ;;  %vm3591_vm3 = vcmask 203776  }
 0x459   : > { %3404 = vmatpush1.msra.mxu0 %v3361_v36 }
 0x45a   : > { %v2379_v22 = vpop.permute.xlu0 %2378  ;;  %4480 = vmatmul.mubr.msk.f32.vlgmr.msra.gmra.mxu0 %vm2401_vm12, %v4478_v21 }
 0x45b   : > { %2388 = vst.msk [vmem:[#allocation4 + $0x8] sm:$0xff] %vm2387_vm2, %v2379_v22  ;;  %3443 = vmatprep.mubr.f32.mxu0 %v4859_v19 }
 0x45e   : > { %4481 = vmatmul.mubr.msk.f32.gmra.mxu0 %vm2401_vm12, %v4479_v26 }
 0x462   : > { %v2392_v41 = vld [vmem:[#allocation4 + $0x8] sm:$0xff] }
 0x464   : > { %v2384_v51 = vpop.permute.xlu1 %2383 }
 0x465   : > { %2390 = vst.msk [vmem:[#allocation4 + $0x18] sm:$0xff] %vm2387_vm2, %v2384_v51 }
 0x46c   : > { %v2394_v47 = vld [vmem:[#allocation4 + $0x18] sm:$0xff] }
 0x46d   : > { %v2474_v37 = vpop.f32.mrf.mxu1 }
 0x46e   : > { %v2485_v14 = vadd.f32 %v2474_v37, %v2379_v22 }
 0x46f   : > { %v2476_v3 = vpop.f32.mrf.mxu1 }
 0x470   : > { %v2486_v1 = vadd.f32 %v2476_v3, %v2392_v41 }
 0x471   : > { %v2480_v20 = vpop.f32.mrf.mxu1 }
 0x472   : > { %2490 = vst.msk [vmem:[#allocation4 + $0x8] sm:$0xff] %vm2387_vm2, %v2486_v1  ;;  %v2487_v10 = vadd.f32 %v2480_v20, %v2384_v51 }
 0x473   : > { %v2482_v31 = vpop.f32.mrf.mxu1 }
 0x474   : > { %v2488_v17 = vadd.f32 %v2482_v31, %v2394_v47  ;;  %v3506_v47 = vld [vmem:[%s7420_s6 + $0x70] sm:$0x1]  ;;  %v3505_v31 = vld [vmem:[%s7420_s6 + $0x68] sm:$0xff] }
 0x475   : > { %4585 = vmatprep.subr.msk.mxu1 %vm2131_vm9, %v3506_v47 }
 0x476   : > { %2492 = vst.msk [vmem:[#allocation4 + $0x18] sm:$0xff] %vm2387_vm2, %v2488_v17  ;;  %4586 = vmatpush3.msk.msra.mxu1 %vm2131_vm9, %v3506_v47 }
 0x477   : > { %4587 = vmatprep.subr.mxu1 %v3505_v31 }
 0x478   : > { %4588 = vmatpush3.msra.mxu1 %v3505_v31  ;;  %v7513_v31 = vlaneseq }
 0x479   : > { %v2494_v44 = vld [vmem:[#allocation4 + $0x8] sm:$0xff] }
 0x47a   : > { %vm3597_vm4 = vcmp.lt.s32.totalorder %v7513_v31, 25  ;;  %vm3619_vm5 = vcmp.ge.s32.totalorder %v7513_v31, 25  ;;  %vm3620_vm6 = vcmp.lt.s32.totalorder %v7513_v31, 50  ;;  %vm3642_vm7 = vcmp.ge.s32.totalorder %v7513_v31, 50 }
 0x47b   : > { %vm3643_vm8 = vcmp.lt.s32.totalorder %v7513_v31, 75  ;;  %vm3621_vm9 = vmand %vm3619_vm5, %vm3620_vm6  ;;  %vm3665_vm10 = vcmp.ge.s32.totalorder %v7513_v31, 75  ;;  %vm3666_vm11 = vcmp.lt.s32.totalorder %v7513_v31, 100  ;;  %vm7150_vm0 = vcmp.lt.s32.totalorder %v7513_v31, 125 }
 0x47c   : > { %vm3644_vm13 = vmand %vm3642_vm7, %vm3643_vm8  ;;  %vm7155_vm1 = vcmp.ge.s32.totalorder %v7513_v31, 125  ;;  %vm3711_vm5 = vcmask 1022976   ;;  %vm7183_vm8 = vcmp.ge.s32.totalorder %v7513_v31, 47 }
 0x47d   : > { %v2496_v4 = vld [vmem:[#allocation4 + $0x18] sm:$0xff]  ;;  %vm3667_vm14 = vmand %vm3665_vm10, %vm3666_vm11  ;;  %vm7197_vm11 = vcmp.ge.s32.totalorder %v7513_v31, 72 }
 0x4e2   : > { %v2594_v53 = vpop.f32.mrf.mxu1 }
 0x4e3   : > { %v2605_v24 = vadd.f32 %v2594_v53, %v2485_v14 }
 0x4e4   : > { %v2596_v56 = vpop.f32.mrf.mxu1 }
 0x4e5   : > { %v2606_v54 = vadd.f32 %v2596_v56, %v2494_v44 }
 0x4e6   : > { %v2600_v8 = vpop.f32.mrf.mxu1 }
 0x4e7   : > { %2610 = vst.msk [vmem:[#allocation4 + $0x8] sm:$0xff] %vm2387_vm2, %v2606_v54  ;;  %v2607_v50 = vadd.f32 %v2600_v8, %v2487_v10  ;;  %v3504_v8 = vld [vmem:[%s7420_s6 + $0x60] sm:$0xff] }
 0x4e8   : > { %v2602_v25 = vpop.f32.mrf.mxu1  ;;  %4589 = vmatprep.subr.mxu1 %v3504_v8 }
 0x4e9   : > { %v2608_v0 = vadd.f32 %v2602_v25, %v2496_v4  ;;  %4590 = vmatpush3.msra.mxu1 %v3504_v8 }
 0x4ea   : > { %v2714_v2 = vpop.f32.mrf.mxu1 }
 0x4eb   : > { %2612 = vst.msk [vmem:[#allocation4 + $0x18] sm:$0xff] %vm2387_vm2, %v2608_v0  ;;  %v2725_v9 = vadd.f32 %v2714_v2, %v2605_v24  ;;  %v3494_v24 = vld [vmem:[%s7420_s6 + $0x10] sm:$0xff] }
 0x4ec   : > { %v2716_v52 = vpop.f32.mrf.mxu1 }
 0x4ee   : > { %v2614_v32 = vld [vmem:[#allocation4 + $0x8] sm:$0xff]  ;;  %v2720_v55 = vpop.f32.mrf.mxu1 }
 0x4ef   : > { %v2726_v15 = vadd.f32 %v2716_v52, %v2614_v32  ;;  %v2727_v62 = vadd.f32 %v2720_v55, %v2607_v50  ;;  %v3503_v52 = vld [vmem:[%s7420_s6 + $0x58] sm:$0xff] }
 0x4f0   : > { %v2722_v35 = vpop.f32.mrf.mxu1  ;;  %4591 = vmatprep.subr.mxu1 %v3503_v52 }
 0x4f1   : > { %2730 = vst.msk [vmem:[#allocation4 + $0x8] sm:$0xff] %vm2387_vm2, %v2726_v15  ;;  %4592 = vmatpush3.msra.mxu1 %v3503_v52 }
 0x4f2   : > { %v2616_v49 = vld [vmem:[#allocation4 + $0x18] sm:$0xff]  ;;  %v2835_v30 = vpop.f32.mrf.mxu1 }
 0x4f3   : > { %v2728_v28 = vadd.f32 %v2722_v35, %v2616_v49  ;;  %v2846_v60 = vadd.f32 %v2835_v30, %v2725_v9  ;;  %v3502_v35 = vld [vmem:[%s7420_s6 + $0x50] sm:$0xff] }
 0x4f4   : > { %v2837_v7 = vpop.f32.mrf.mxu1  ;;  %4593 = vmatprep.subr.mxu1 %v3502_v35 }
 0x4f5   : > { %2732 = vst.msk [vmem:[#allocation4 + $0x18] sm:$0xff] %vm2387_vm2, %v2728_v28  ;;  %v3501_v28 = vld [vmem:[%s7420_s6 + $0x48] sm:$0xff]  ;;  %4594 = vmatpush3.msra.mxu1 %v3502_v35 }
 0x4f6   : > { %v2841_v11 = vpop.f32.mrf.mxu1  ;;  %4595 = vmatprep.subr.mxu1 %v3501_v28 }
 0x4f7   : > { %v2848_v36 = vadd.f32 %v2841_v11, %v2727_v62  ;;  %4596 = vmatpush3.msra.mxu1 %v3501_v28  ;;  %v4865_v62 = vmov 1966171168  }
 0x4f8   : > { %v2734_v33 = vld [vmem:[#allocation4 + $0x8] sm:$0xff]  ;;  %v2843_v58 = vpop.f32.mrf.mxu1 }
 0x4f9   : > { %v2847_v16 = vadd.f32 %v2837_v7, %v2734_v33  ;;  %v3500_v33 = vld [vmem:[%s7420_s6 + $0x40] sm:$0xff] }
 0x4fa   : > { %v2956_v57 = vpop.f32.mrf.mxu1  ;;  %4597 = vmatprep.subr.mxu1 %v3500_v33 }
 0x4fb   : > { %2851 = vst.msk [vmem:[#allocation4 + $0x8] sm:$0xff] %vm2387_vm2, %v2847_v16  ;;  %v2967_v21 = vadd.f32 %v2956_v57, %v2846_v60  ;;  %v3499_v57 = vld [vmem:[%s7420_s6 + $0x38] sm:$0xff]  ;;  %4598 = vmatpush3.msra.mxu1 %v3500_v33 }
 0x4fc   : > { %v2736_v12 = vld [vmem:[#allocation4 + $0x18] sm:$0xff]  ;;  %v2958_v43 = vpop.f32.mrf.mxu1  ;;  %4599 = vmatprep.subr.mxu1 %v3499_v57 }
 0x4fd   : > { %v2849_v45 = vadd.f32 %v2843_v58, %v2736_v12  ;;  %4600 = vmatpush3.msra.mxu1 %v3499_v57  ;;  %v4773_v57 = vld [vmem:[%s7421_s7 + $0x60] sm:$0xff]  }
 0x4fe   : > { %v2962_v38 = vpop.f32.mrf.mxu1 }
 0x4ff   : > { %2853 = vst.msk [vmem:[#allocation4 + $0x18] sm:$0xff] %vm2387_vm2, %v2849_v45  ;;  %v2969_v3 = vadd.f32 %v2962_v38, %v2848_v36  ;;  %v3497_v45 = vld [vmem:[%s7420_s6 + $0x28] sm:$0xff] }
 0x500   : > { %v2964_v63 = vpop.f32.mrf.mxu1 }
 0x502   : > { %v2855_v5 = vld [vmem:[#allocation4 + $0x8] sm:$0xff]  ;;  %v3077_v6 = vpop.f32.mrf.mxu1 }
 0x503   : > { %v2968_v48 = vadd.f32 %v2958_v43, %v2855_v5  ;;  %v3088_v22 = vadd.f32 %v3077_v6, %v2967_v21  ;;  %v3498_v43 = vld [vmem:[%s7420_s6 + $0x30] sm:$0xff]  ;;  %v3610_v21 = vunpack.c.l.s4 %v4865_v62  ;;  %v4787_v62 = vld [vmem:[%s7421_s7 + $0xc0] sm:$0xff]  }
 0x504   : > { %v3079_v27 = vpop.f32.mrf.mxu1  ;;  %4601 = vmatprep.subr.mxu1 %v3498_v43 }
 0x505   : > { %2972 = vst.msk [vmem:[#allocation4 + $0x8] sm:$0xff] %vm2387_vm2, %v2968_v48  ;;  %4602 = vmatpush3.msra.mxu1 %v3498_v43  ;;  %v3495_v48 = vld [vmem:[%s7420_s6 + $0x18] sm:$0xff]  ;;  %v4774_v43 = vld [vmem:[%s7421_s7 + $0x20] sm:$0xff]  }
 0x506   : > { %v2857_v59 = vld [vmem:[#allocation4 + $0x18] sm:$0xff]  ;;  %v3083_v40 = vpop.f32.mrf.mxu1  ;;  %4603 = vmatprep.subr.mxu1 %v3497_v45 }
 0x507   : > { %v2970_v42 = vadd.f32 %v2964_v63, %v2857_v59  ;;  %v3090_v17 = vadd.f32 %v3083_v40, %v2969_v3  ;;  %v3496_v63 = vld [vmem:[%s7420_s6 + $0x20] sm:$0xff]  ;;  %4604 = vmatpush3.msra.mxu1 %v3497_v45  ;;  %v4775_v45 = vld [vmem:[%s7421_s7 + $0x98] sm:$0xff]  }
 0x508   : > { %v3085_v23 = vpop.f32.mrf.mxu1  ;;  %4605 = vmatprep.subr.mxu1 %v3496_v63 }
 0x509   : > { %2974 = vst.msk [vmem:[#allocation4 + $0x18] sm:$0xff] %vm2387_vm2, %v2970_v42  ;;  %4606 = vmatpush3.msra.mxu1 %v3496_v63  ;;  %v4776_v63 = vld [vmem:[%s7421_s7 + $0x58] sm:$0xff]  }
 0x50a   : > { %v3198_v39 = vpop.f32.mrf.mxu0  ;;  %4607 = vmatprep.subr.mxu1 %v3495_v48 }
 0x50b   : > { %v3209_v51 = vadd.f32 %v3198_v39, %v3088_v22  ;;  %4608 = vmatpush3.msra.mxu1 %v3495_v48  ;;  %v7511_v39 = vmov 0   ;;  %v3611_v22 = vunpack.c.0.s8 %v3610_v21 }
 0x50c   : > { %v2976_v13 = vld [vmem:[#allocation4 + $0x8] sm:$0xff]  ;;  %v3200_v46 = vpop.f32.mrf.mxu0  ;;  %4609 = vmatprep.subr.mxu1 %v3494_v24 }
 0x50d   : > { %v3089_v18 = vadd.f32 %v3079_v27, %v2976_v13  ;;  %4610 = vmatpush3.msra.mxu1 %v3494_v24 }
 0x50e   : > { %v3204_v37 = vpop.f32.mrf.mxu0 }
 0x50f   : > { %3093 = vst.msk [vmem:[#allocation4 + $0x8] sm:$0xff] %vm2387_vm2, %v3089_v18  ;;  %v3211_v4 = vadd.f32 %v3204_v37, %v3090_v17  ;;  %v3493_v18 = vld [vmem:[%s7420_s6 + $0x8] sm:$0xff]  ;;  %v4763_v37 = vld [vmem:[%s7421_s7 + $0xb8] sm:$0xff]  }
 0x510   : > { %v2978_v29 = vld [vmem:[#allocation4 + $0x18] sm:$0xff]  ;;  %v3206_v20 = vpop.f32.mrf.mxu0  ;;  %4611 = vmatprep.subr.mxu1 %v3493_v18 }
 0x511   : > { %v3091_v61 = vadd.f32 %v3085_v23, %v2978_v29  ;;  %4612 = vmatpush3.msra.mxu1 %v3493_v18  ;;  %v3492_v23 = vld [vmem:[%s7420_s6] sm:$0xff] }
 0x512   : > { %v3319_v34 = vpop.f32.mrf.mxu1  ;;  %4613 = vmatprep.subr.mxu1 %v3492_v23 }
 0x513   : > { %3095 = vst.msk [vmem:[#allocation4 + $0x18] sm:$0xff] %vm2387_vm2, %v3091_v61  ;;  %v3330_v53 = vadd.f32 %v3319_v34, %v3209_v51  ;;  %4614 = vmatpush3.msra.mxu1 %v3492_v23  ;;  %v4764_v51 = vld [vmem:[%s7421_s7 + $0x78] sm:$0xff]   ;;  %v4782_v23 = vld [vmem:[%s7421_s7 + $0x48] sm:$0xff]  }
 0x514   : > { %v3321_v41 = vpop.f32.mrf.mxu1  ;;  %4224 = vmatprep.subr.bf16.mxu1 %v7511_v39  ;;  %4547 = vmatprep.subr.bf16.mxu0 %v4764_v51  ;;  %v4264_v51 = vld [vmem:[%s7423_s9] sm:$0xff] }
 0x516   : > { %v3097_v26 = vld [vmem:[#allocation4 + $0x8] sm:$0xff]  ;;  %v3325_v56 = vpop.f32.mrf.mxu1 }
 0x517   : > { %v3210_v1 = vadd.f32 %v3200_v46, %v3097_v26  ;;  %v3332_v32 = vadd.f32 %v3325_v56, %v3211_v4 }
 0x518   : > { %v3327_v16 = vpop.f32.mrf.mxu1 }
 0x519   : > { %3214 = vst.msk [vmem:[#allocation4 + $0x8] sm:$0xff] %vm2387_vm2, %v3210_v1  ;;  %v4765_v1 = vld [vmem:[%s7421_s7 + $0x38] sm:$0xff]  }
 0x51a   : > { %v3099_v44 = vld [vmem:[#allocation4 + $0x18] sm:$0xff]  ;;  %v3439_v54 = vpop.f32.mrf.mxu0  ;;  %4548 = vmatpush3.bf16.msra.mxu0 %v4765_v1 }
 0x51b   : > { %v3212_v25 = vadd.f32 %v3206_v20, %v3099_v44  ;;  %v6969_v0 = vadd.f32 %v3439_v54, %v3330_v53  ;;  %v4766_v20 = vld [vmem:[%s7421_s7 + $0xb0] sm:$0xff]  }
 0x51c   : > { %v3441_v2 = vpop.f32.mrf.mxu0 }
 0x51d   : > { %3216 = vst.msk [vmem:[#allocation4 + $0x18] sm:$0xff] %vm2387_vm2, %v3212_v25  ;;  %v3462_v55 = vmax.f32 %v6969_v0, 0.0  ;;  %v4767_v25 = vld [vmem:[%s7421_s7 + $0x70] sm:$0xff]  }
 0x51e   : > { %v3445_v15 = vpop.f32.mrf.mxu0  ;;  %v4768_v0 = vld [vmem:[%s7421_s7 + $0x30] sm:$0xff]   ;;  %4549 = vmatprep.subr.bf16.mxu0 %v4767_v25 }
 0x51f   : > { %v6979_v49 = vadd.f32 %v3445_v15, %v3332_v32  ;;  %3474 = vrot.lane.b32.xlu0 %v3462_v55, %s7509_s30  ;;  %v4769_v32 = vld [vmem:[%s7421_s7 + $0xa8] sm:$0xff]   ;;  %4550 = vmatpush3.bf16.msra.mxu0 %v4768_v0 }
 0x520   : > { %v3218_v30 = vld [vmem:[#allocation4 + $0x8] sm:$0xff]  ;;  %v3447_v59 = vpop.f32.mrf.mxu0 }
 0x521   : > { %v3331_v7 = vadd.f32 %v3321_v41, %v3218_v30  ;;  %v3464_v11 = vmax.f32 %v6979_v49, 0.0  ;;  %v7512_v41 = vld [vmem:[#allocation10_spill] sm:$0xff]  ;;  %v4770_v15 = vld [vmem:[%s7421_s7 + $0x68] sm:$0xff]  }
 0x522   : > { %v7033_v3 = vsub.s32 %v3611_v22, %v7512_v41  ;;  %v4771_v49 = vld [vmem:[%s7421_s7 + $0x28] sm:$0xff]   ;;  %4551 = vmatprep.subr.bf16.mxu0 %v4770_v15 }
 0x523   : > { %3335 = vst.msk [vmem:[#allocation4 + $0x8] sm:$0xff] %vm2387_vm2, %v3331_v7  ;;  %3476 = vrot.lane.b32.xlu1 %v3464_v11, %s7509_s30  ;;  %s4868_s30 = smov 19   ;;  %v4772_v7 = vld [vmem:[%s7421_s7 + $0xa0] sm:$0xff]   ;;  %4552 = vmatpush3.bf16.msra.mxu0 %v4771_v49 }
 0x524   : > { %v3220_v58 = vld [vmem:[#allocation4 + $0x18] sm:$0xff]  ;;  %4553 = vmatprep.subr.bf16.mxu0 %v4773_v57 }
 0x525   : > { %v3333_v12 = vadd.f32 %v3327_v16, %v3220_v58 }
 0x527   : > { %3337 = vst.msk [vmem:[#allocation4 + $0x18] sm:$0xff] %vm2387_vm2, %v3333_v12  ;;  %4554 = vmatpush3.bf16.msra.mxu0 %v4774_v43 }
 0x528   : > { %4555 = vmatprep.subr.bf16.mxu0 %v4776_v63 }
 0x52a   : > { %v3339_v38 = vld [vmem:[#allocation4 + $0x8] sm:$0xff] }
 0x52b   : > { %v3451_v5 = vadd.f32 %v3441_v2, %v3339_v38 }
 0x52d   : > { %3455 = vst.msk [vmem:[#allocation4 + $0x8] sm:$0xff] %vm2387_vm2, %v3451_v5  ;;  %v4777_v5 = vld [vmem:[%s7421_s7 + $0x18] sm:$0xff]  }
 0x52e   : > { %v3341_v6 = vld [vmem:[#allocation4 + $0x18] sm:$0xff]  ;;  %4556 = vmatpush3.bf16.msra.mxu0 %v4777_v5 }
 0x52f   : > { %v3453_v42 = vadd.f32 %v3447_v59, %v3341_v6  ;;  %v4778_v59 = vld [vmem:[%s7421_s7 + $0x90] sm:$0xff]  }
 0x531   : > { %3457 = vst.msk [vmem:[#allocation4 + $0x18] sm:$0xff] %vm2387_vm2, %v3453_v42 }
 0x534   : > { %v3459_v27 = vld [vmem:[#allocation4 + $0x8] sm:$0xff] }
 0x535   : > { %v3463_v14 = vmax.f32 %v3459_v27, 0.0  ;;  %v4779_v27 = vld [vmem:[%s7421_s7 + $0x50] sm:$0xff]  }
 0x536   : > { %4557 = vmatprep.subr.bf16.mxu0 %v4779_v27  ;;  %v7560_v27 = vld [vmem:[#allocation14_spill] sm:$0xff] }
 0x537   : > { %3467 = vst.msk [vmem:[#allocation4 + $0x8] sm:$0xff] %vm2387_vm2, %v3463_v14 }
 0x538   : > { %v3461_v13 = vld [vmem:[#allocation4 + $0x18] sm:$0xff] }
 0x539   : > { %v3465_v40 = vmax.f32 %v3461_v13, 0.0  ;;  %v4780_v13 = vld [vmem:[%s7421_s7 + $0x10] sm:$0xff]  }
 0x53a   : > { %4558 = vmatpush3.bf16.msra.mxu0 %v4780_v13  ;;  %v7561_v13 = vld [vmem:[#allocation15_spill] sm:$0xff] }
 0x53b   : > { %3469 = vst.msk [vmem:[#allocation4 + $0x18] sm:$0xff] %vm2387_vm2, %v3465_v40  ;;  %v4781_v40 = vld [vmem:[%s7421_s7 + $0x88] sm:$0xff]   ;;  %4559 = vmatprep.subr.bf16.mxu0 %v4782_v23  ;;  %vm7160_vm2 = vcmp.lt.s32.totalorder %v7513_v31, 150 }
 0x53c   : > { %vm3716_vm7 = vmand %vm7155_vm1, %vm7160_vm2  ;;  %vm7221_vm1 = vcmp.ge.s32.totalorder %v7513_v31, 122  ;;  %vm7226_vm2 = vcmp.lt.s32.totalorder %v7513_v31, 147 }
 0x591   : > { %v3475_v10 = vpop.permute.xlu0 %3474 }
 0x592   : > { %v3480_v9 = vmax.f32 %v3462_v55, %v3475_v10 }
 0x594   : > { %3484 = vrot.lane.b32.xlu0 %v3480_v9, %s4860_s15 }
 0x595   : > { %v3477_v29 = vpop.permute.xlu1 %3476 }
 0x596   : > { %v3481_v50 = vmax.f32 %v3464_v11, %v3477_v29  ;;  %v4783_v29 = vld [vmem:[%s7421_s7 + $0x8] sm:$0xff]  }
 0x597   : > { %4560 = vmatpush3.bf16.msra.mxu0 %v4783_v29 }
 0x598   : > { %3486 = vrot.lane.b32.xlu1 %v3481_v50, %s4860_s15 }
 0x606   : > { %v3485_v60 = vpop.permute.xlu0 %3484 }
 0x607   : > { %v3490_v61 = vmax.f32 %v3480_v9, %v3485_v60 }
 0x609   : > { %4615 = vmatprep.mubr.msk.f32.mxu1 %vm2998_vm15, %v3490_v61  ;;  %v4785_v61 = vld [vmem:[%s7421_s7 + $0x40] sm:$0xff]  }
 0x60a   : > { %v3487_v46 = vpop.permute.xlu1 %3486  ;;  %4561 = vmatprep.subr.bf16.mxu0 %v4785_v61  ;;  %v4276_v61 = vld [vmem:[%s7423_s9 + $0x60] sm:$0xff] }
 0x60b   : > { %v3491_v34 = vmax.f32 %v3481_v50, %v3487_v46  ;;  %v4784_v50 = vld [vmem:[%s7421_s7 + $0x80] sm:$0xff]  }
 0x60d   : > { %4616 = vmatmul.mubr.msk.f32.vlgmr.msra.gmra.mxu1 %vm2998_vm15, %v3491_v34  ;;  %v4786_v34 = vld [vmem:[%s7421_s7] sm:$0xff]   ;;  %vm7145_vm15 = vcmp.ge.s32.totalorder %v7513_v31, 100 }
 0x60e   : > { %4225 = vmatpush1.bf16.msra.mxu1 %v4763_v37  ;;  %4562 = vmatpush3.bf16.msra.mxu0 %v4786_v34  ;;  %vm3690_vm6 = vmand %vm7145_vm15, %vm7150_vm0  ;;  %vm7212_vm15 = vcmp.lt.s32.totalorder %v7513_v31, 122  ;;  %v4274_v34 = vld [vmem:[%s7423_s9 + $0x50] sm:$0xff] }
 0x60f   : > { %4226 = vmatprep.subr.bf16.mxu1 %v7511_v39  ;;  %4618 = vmatprep.subr.mxu0 %v4859_v19 }
 0x612   : > { %4227 = vmatpush1.bf16.msra.mxu1 %v4766_v20 }
 0x613   : > { %4228 = vmatprep.subr.bf16.mxu1 %v7511_v39 }
 0x616   : > { %4229 = vmatpush1.bf16.msra.mxu1 %v4769_v32 }
 0x617   : > { %4230 = vmatprep.subr.bf16.mxu1 %v7511_v39 }
 0x61a   : > { %4231 = vmatpush1.bf16.msra.mxu1 %v4772_v7 }
 0x61b   : > { %4232 = vmatprep.subr.bf16.mxu1 %v7511_v39 }
 0x61e   : > { %4233 = vmatpush1.bf16.msra.mxu1 %v4775_v45 }
 0x61f   : > { %4234 = vmatprep.subr.bf16.mxu1 %v7511_v39 }
 0x622   : > { %4235 = vmatpush1.bf16.msra.mxu1 %v4778_v59 }
 0x623   : > { %4236 = vmatprep.subr.bf16.mxu1 %v7511_v39 }
 0x626   : > { %4237 = vmatpush1.bf16.msra.mxu1 %v4781_v40 }
 0x627   : > { %4238 = vmatprep.subr.bf16.mxu1 %v7511_v39 }
 0x62a   : > { %4239 = vmatpush1.bf16.msra.mxu1 %v4784_v50  ;;  %v4278_v50 = vld [vmem:[%s7423_s9 + $0x70] sm:$0xff] }
 0x62b   : > { %4254 = vmatprep.subr.bf16.mxu1 %v7511_v39 }
 0x62e   : > { %4255 = vmatpush2.bf16.msra.mxu1 %v4787_v62  ;;  %v4273_v62 = vld [vmem:[%s7423_s9 + $0x48] sm:$0xff] }
 0x6cd   : > { %v4617_v36 = vpop.f32.mrf.mxu1 }
 0x6ce   : > { %3593 = vst.msk [vmem:[#allocation5 + $0x8] sm:$0xff] %vm3591_vm3, %v4617_v36 }
 0x6cf   : > { %v3582_v26 = vpop.f32.mrf.mxu1 }
 0x6d0   : > { %3592 = vst.msk [vmem:[#allocation5] sm:$0xff] %vm3591_vm3, %v3582_v26  ;;  %vm7165_vm3 = vcmp.ge.s32.totalorder %v7513_v31, 22 }
 0x6d5   : > { %v4494_v47 = vld.sshfl [vmem:[#allocation5 + $0xa] sm:$0x1 pattern:$0x75316420] }
 0x6d6   : > { %v3825_v17 = vrot.slane %v4494_v47, %v7033_v3  ;;  %v4492_v53 = vld.sshfl [vmem:[#allocation5 + $0x8] sm:$0x1 pattern:$0x75316420]  ;;  %v4030_v47 = vld [vmem:[%s7422_s8] sm:$0x1] }
 0x6d7   : > { %v3779_v44 = vrot.slane %v4492_v53, %v7033_v3  ;;  %v4493_v56 = vld.sshfl [vmem:[#allocation5 + $0x9] sm:$0x1 pattern:$0x75316420]  ;;  %v3594_v54 = vld [vmem:[#allocation5] sm:$0x1] }
 0x6d8   : > { %3826 = vrot.lane.b32.xlu1 %v3825_v17, %s4866_s24  ;;  %v4495_v8 = vld.sshfl [vmem:[#allocation5 + $0xb] sm:$0x1 pattern:$0x75316420]  ;;  %3599 = vst.msk [vmem:[#allocation6] sm:$0x1] %vm3597_vm4, %v3594_v54  ;;  %v3802_v4 = vrot.slane %v4493_v56, %v7033_v3 }
 0x6d9   : > { %3780 = vrot.lane.b32.xlu0 %v3779_v44, %s7514_s22  ;;  %v3851_v2 = vrot.slane %v4495_v8, %v7033_v3  ;;  %v4486_v52 = vld.sshfl [vmem:[#allocation5 + $0x2] sm:$0x1 pattern:$0x75316420]  ;;  %s4871_s24 = smov 75   ;;  %s4875_s22 = smov 47  }
 0x6da   : > { %v4485_v55 = vld.sshfl [vmem:[#allocation5 + $0x1] sm:$0x1 pattern:$0x75316420]  ;;  %v3638_v35 = vrot.slane %v4486_v52, %v7033_v3  ;;  %vm7170_vm4 = vcmp.lt.s32.totalorder %v7513_v31, 47 }
 0x6db   : > { %v3615_v30 = vrot.slane %v4485_v55, %v7033_v3  ;;  %v4487_v28 = vld.sshfl [vmem:[#allocation5 + $0x3] sm:$0x1 pattern:$0x75316420]  ;;  %vm3739_vm10 = vmand %vm7165_vm3, %vm7170_vm4  ;;  %vm7236_vm4 = vcmp.ge.s32.totalorder %v7513_v31, 19 }
 0x6dc   : > { %3803 = vrot.lane.b32.xlu1 %v3802_v4, %s4867_s14  ;;  %v4489_v11 = vld.sshfl [vmem:[#allocation5 + $0x5] sm:$0x1 pattern:$0x75316420]  ;;  %v3661_v33 = vrot.slane %v4487_v28, %v7033_v3  ;;  %s4876_s14 = smov 69  }
 0x6dd   : > { %3852 = vrot.lane.b32.xlu0 %v3851_v2, %s4868_s30  ;;  %v3707_v58 = vrot.slane %v4489_v11, %v7033_v3  ;;  %v4490_v16 = vld.sshfl [vmem:[#allocation5 + $0x6] sm:$0x1 pattern:$0x75316420] }
 0x6de   : > { %v4488_v12 = vld.sshfl [vmem:[#allocation5 + $0x4] sm:$0x1 pattern:$0x75316420]  ;;  %v3733_v38 = vrot.slane %v4490_v16, %v7033_v3 }
 0x6df   : > { %v3684_v48 = vrot.slane %v4488_v12, %v7033_v3  ;;  %v4496_v6 = vld.sshfl [vmem:[#allocation5 + $0xc] sm:$0x1 pattern:$0x75316420] }
 0x6e0   : > { %3639 = vrot.lane.b32.xlu1 %v3638_v35, %s4869_s13  ;;  %v4491_v42 = vld.sshfl [vmem:[#allocation5 + $0x7] sm:$0x1 pattern:$0x75316420]  ;;  %v3874_v14 = vrot.slane %v4496_v6, %v7033_v3  ;;  %s4527_s13 = sshll.u32 %s4962_s21, 4  ;;  %s4880_s21 = smov [#allocation7]  }
 0x6e1   : > { %3616 = vrot.lane.b32.xlu0 %v3615_v30, %s4870_s16  ;;  %v3756_v24 = vrot.slane %v4491_v42, %v7033_v3  ;;  %v4497_v18 = vld.sshfl [vmem:[#allocation5 + $0xd] sm:$0x1 pattern:$0x75316420]  ;;  %v7559_v42 = vld [vmem:[#allocation13_spill] sm:$0xff]  ;;  %s4792_s15 = sshll.u32 %s4880_s21, 4  ;;  %s4793_s15 = int_to_ptr.vmem [resolvable:$false] %s4792_s15 }
 0x6e2   : > { %v4499_v10 = vld.sshfl [vmem:[#allocation5 + $0xf] sm:$0x1 pattern:$0x75316420]  ;;  %v3897_v9 = vrot.slane %v4497_v18, %v7033_v3 }
 0x6e3   : > { %v3943_v60 = vrot.slane %v4499_v10, %v7033_v3  ;;  %v4498_v46 = vld.sshfl [vmem:[#allocation5 + $0xe] sm:$0x1 pattern:$0x75316420] }
 0x6e4   : > { %3662 = vrot.lane.b32.xlu1 %v3661_v33, %s4871_s24  ;;  %s4874_s24 = smov 44   ;;  %v3920_v21 = vrot.slane %v4498_v46, %v7033_v3  ;;  %v4275_v46 = vld [vmem:[%s7423_s9 + $0x58] sm:$0xff] }
 0x6e5   : > { %3708 = vrot.lane.b32.xlu0 %v3707_v58, %s4872_s0  ;;  %s4794_s0 = scalar_lea.vmem %s4793_s15, 32 }
 0x6e8   : > { %3734 = vrot.lane.b32.xlu1 %v3733_v38, %s4873_s25 }
 0x6e9   : > { %3685 = vrot.lane.b32.xlu0 %v3684_v48, %s7506_s12  ;;  %s4877_s12 = smov 119  }
 0x6ec   : > { %3875 = vrot.lane.b32.xlu1 %v3874_v14, %s4874_s24  ;;  %s7379_s24 = scalar_lea.hbm %s7425_s11, %s4527_s13 }
 0x6ed   : > { %3757 = vrot.lane.b32.xlu0 %v3756_v24, %s4875_s22  ;;  %v7562_v24 = vld [vmem:[#allocation12_spill] sm:$0xff] }
 0x6f0   : > { %3898 = vrot.lane.b32.xlu1 %v3897_v9, %s4876_s14 }
 0x6f1   : > { %3944 = vrot.lane.b32.xlu0 %v3943_v60, %s4877_s12  ;;  %v4277_v60 = vld [vmem:[%s7423_s9 + $0x68] sm:$0xff] }
 0x6f5   : > { %3921 = vrot.lane.b32.xlu0 %v3920_v21, %s4878_s29  ;;  %v4272_v21 = vld [vmem:[%s7423_s9 + $0x40] sm:$0xff]  ;;  %s375_s29 = sand.u32 1, %s4840_s18  }
 0x6f6   : > { %s376_s16 = scalar_lea.vmem [#allocation7], %s375_s29  ;;  %s4357_s22 = scalar_lea.sflag [#allocation8], %s375_s29 }
 0x6f7   : > { %s4369_s14 = sshll.u32 %s376_s16, 4  ;;  %s4370_s14 = int_to_ptr.vmem [resolvable:$true] %s4369_s14 }
 0x6f8   : > { %s4788_s25 = scalar_lea.vmem %s4370_s14, 16  ;;  %p4795_p0 = scmp.lt.s32.totalorder %s4370_s14, %s4793_s15 }
 0x6f9   : > { %p4789_p11 = scmp.ne.s32.totalorder %s4370_s14, %s4788_s25  ;;  %p4796_p1 = scmp.lt.s32.totalorder %s4794_s0, %s4788_s25 }
 0x6fb   : > { %p4790_p12 = pnand %p4789_p11, %p4979_p5  ;;  %p4797_p2 = por %p4796_p1, %p4795_p0 }
 0x6fd   : > { %p4791_p13 = pneg %p4790_p12 }
 0x6ff   : > { %p4798_p3 = pnand %p4797_p2, %p4791_p13 }
 0x74a   : > { %v7134_v36 = vpop.permute.xlu1 %3826 }
 0x74b   : > { %v3781_v22 = vpop.permute.xlu0 %3780  ;;  %v3828_v49 = vrot.slane %v7134_v36, 7 }
 0x74e   : > { %v3804_v26 = vpop.permute.xlu1 %3803 }
 0x74f   : > { %v7138_v37 = vpop.permute.xlu0 %3852 }
 0x752   : > { %v3640_v39 = vpop.permute.xlu1 %3639 }
 0x753   : > { %v3617_v41 = vpop.permute.xlu0 %3616 }
 0x754   : > { %3622 = vst.msk [vmem:[#allocation6] sm:$0x1] %vm3621_vm9, %v3617_v41  ;;  %vm7188_vm9 = vcmp.lt.s32.totalorder %v7513_v31, 72  ;;  %v4266_v41 = vld [vmem:[%s7423_s9 + $0x10] sm:$0xff] }
 0x755   : > { %3645 = vst.msk [vmem:[#allocation6] sm:$0x1] %vm3644_vm13, %v3640_v39  ;;  %vm7202_vm13 = vcmp.lt.s32.totalorder %v7513_v31, 97  ;;  %vm3762_vm0 = vmand %vm7183_vm8, %vm7188_vm9  ;;  %vm7250_vm8 = vcmp.ge.s32.totalorder %v7513_v31, 44  ;;  %vm7255_vm9 = vcmp.lt.s32.totalorder %v7513_v31, 69  ;;  %v4267_v39 = vld [vmem:[%s7423_s9 + $0x18] sm:$0xff] }
 0x756   : > { %v3663_v3 = vpop.permute.xlu1 %3662  ;;  %vm3785_vm3 = vmand %vm7197_vm11, %vm7202_vm13  ;;  %vm7264_vm11 = vcmp.ge.s32.totalorder %v7513_v31, 69  ;;  %vm7269_vm13 = vcmp.lt.s32.totalorder %v7513_v31, 94 }
 0x757   : > { %3668 = vst.msk [vmem:[#allocation6] sm:$0x1] %vm3667_vm14, %v3663_v3  ;;  %v3709_v20 = vpop.permute.xlu0 %3708  ;;  %vm7207_vm14 = vcmp.ge.s32.totalorder %v7513_v31, 97  ;;  %v4265_v3 = vld [vmem:[%s7423_s9 + $0x8] sm:$0xff] }
 0x758   : > { %v3710_v53 = vrot.slane %v3709_v20, 7 }
 0x75a   : > { %v3735_v54 = vpop.permute.xlu1 %3734  ;;  %v3712_v52 = vsel %vm3711_vm5, %v3710_v53, %v3709_v20  ;;  %vm7241_vm5 = vcmp.lt.s32.totalorder %v7513_v31, 44 }
 0x75b   : > { %v3686_v25 = vpop.permute.xlu0 %3685 }
 0x75c   : > { %3691 = vst.msk [vmem:[#allocation6] sm:$0x1] %vm3690_vm6, %v3686_v25  ;;  %vm3829_vm6 = vcmask 998400  }
 0x75d   : > { %3717 = vst.msk [vmem:[#allocation6] sm:$0x3] %vm3716_vm7, %v3712_v52  ;;  %vm3808_vm7 = vmand %vm7207_vm14, %vm7212_vm15  ;;  %v3830_v12 = vsel %vm3829_vm6, %v3828_v49, %v7134_v36  ;;  %v4271_v36 = vld [vmem:[%s7423_s9 + $0x38] sm:$0xff] }
 0x75e   : > { %3740 = vst.msk [vmem:[#allocation6 + $0x1] sm:$0x1] %vm3739_vm10, %v3735_v54  ;;  %v3876_v7 = vpop.permute.xlu1 %3875  ;;  %vm3834_vm10 = vmand %vm7221_vm1, %vm7226_vm2  ;;  %vm7288_vm1 = vcmp.lt.s32.totalorder %v7513_v31, 119 }
 0x75f   : > { %v3758_v11 = vpop.permute.xlu0 %3757  ;;  %vm3857_vm14 = vmand %vm7236_vm4, %vm7241_vm5  ;;  %vm3951_vm4 = vcmp.lt.s32.totalorder %v7513_v31, 144  ;;  %vm3947_vm5 = vcmask 973824  }
 0x760   : > { %3763 = vst.msk [vmem:[#allocation6 + $0x1] sm:$0x1] %vm3762_vm0, %v3758_v11  ;;  %vm3880_vm15 = vmand %vm7250_vm8, %vm7255_vm9  ;;  %vm7283_vm0 = vcmp.ge.s32.totalorder %v7513_v31, 94  ;;  %vm4280_vm8 = vcmask 982016   ;;  %vm4354_vm9 = vcmask 73728  }
 0x761   : > { %3786 = vst.msk [vmem:[#allocation6 + $0x1] sm:$0x1] %vm3785_vm3, %v3781_v22  ;;  %vm3903_vm2 = vmand %vm7264_vm11, %vm7269_vm13  ;;  %vm3950_vm3 = vcmp.ge.s32.totalorder %v7513_v31, 119  ;;  %v4270_v22 = vld [vmem:[%s7423_s9 + $0x30] sm:$0xff] }
 0x762   : > { %3809 = vst.msk [vmem:[#allocation6 + $0x1] sm:$0x1] %vm3808_vm7, %v3804_v26  ;;  %v3899_v5 = vpop.permute.xlu1 %3898  ;;  %vm3926_vm6 = vmand %vm7283_vm0, %vm7288_vm1  ;;  %v4269_v26 = vld [vmem:[%s7423_s9 + $0x28] sm:$0xff] }
 0x763   : > { %3835 = vst.msk [vmem:[#allocation6 + $0x1] sm:$0x3] %vm3834_vm10, %v3830_v12  ;;  %v3945_v38 = vpop.permute.xlu0 %3944  ;;  %vm3952_vm7 = vmand %vm3950_vm3, %vm3951_vm4 }
 0x764   : > { %3858 = vst.msk [vmem:[#allocation6 + $0x2] sm:$0x1] %vm3857_vm14, %v7138_v37  ;;  %v3946_v63 = vrot.slane %v3945_v38, 7  ;;  %v4268_v37 = vld [vmem:[%s7423_s9 + $0x20] sm:$0xff] }
 0x765   : > { %3881 = vst.msk [vmem:[#allocation6 + $0x2] sm:$0x1] %vm3880_vm15, %v3876_v7 }
 0x766   : > { %3904 = vst.msk [vmem:[#allocation6 + $0x2] sm:$0x1] %vm3903_vm2, %v3899_v5  ;;  %v3948_v6 = vsel %vm3947_vm5, %v3946_v63, %v3945_v38 }
 0x767   : > { %v3922_v48 = vpop.permute.xlu0 %3921 }
 0x768   : > { %3927 = vst.msk [vmem:[#allocation6 + $0x2] sm:$0x1] %vm3926_vm6, %v3922_v48 }
 0x769   : > { %3953 = vst.msk [vmem:[#allocation6 + $0x2] sm:$0x3] %vm3952_vm7, %v3948_v6 }
 0x770   : > { %v3954_v59 = vld [vmem:[#allocation6] sm:$0xf] }
 0x771   : > { %v3963_v31 = vrot.slane %v3954_v59, %v7559_v42  ;;  %v3971_v14 = vrot.slane %v3954_v59, %v7560_v27  ;;  %v3959_v40 = vrot.slane %v3954_v59, %v7561_v13  ;;  %v3967_v18 = vrot.slane %v3954_v59, %v7562_v24 }
 0x773   : > { %v3977_v23 = vpack.c.bf16 %v3963_v31, %v3963_v31  ;;  %v3979_v10 = vpack.c.bf16 %v3971_v14, %v3971_v14  ;;  %v3976_v9 = vpack.c.bf16 %v3959_v40, %v3959_v40  ;;  %v3978_v29 = vpack.c.bf16 %v3967_v18, %v3967_v18 }
 0x775   : > { %4216 = vmatprep.mubr.bf16.mxu0 %v3977_v23  ;;  %4525 = vmatprep.mubr.msk.bf16.mxu1 %vm2401_vm12, %v3979_v10  ;;  %vm4879_vm12 = vmmov 0  }
 0x776   : > { %4217 = vmatmul.mubr.bf16.vlgmr.msra.gmra.mxu0 %v3976_v9  ;;  %4257 = vmatmul.mubr.bf16.vlgmr.msra.gmra.mxu1 %v3978_v29 }
 0x777   : > { %4619 = vmatpush3.msra.mxu0 %v4278_v50  ;;  %4648 = vmatprep.mubr.msk.f32.mxu0 %vm4879_vm12, %v4859_v19 }
 0x778   : > { %4620 = vmatprep.subr.mxu0 %v4859_v19 }
 0x779   : > { %4621 = vmatpush3.msra.mxu0 %v4277_v60 }
 0x77a   : > { %4622 = vmatprep.subr.mxu0 %v4859_v19 }
 0x77b   : > { %4623 = vmatpush3.msra.mxu0 %v4276_v61 }
 0x77c   : > { %4624 = vmatprep.subr.mxu0 %v4859_v19 }
 0x77d   : > { %4625 = vmatpush3.msra.mxu0 %v4275_v46 }
 0x77e   : > { %4626 = vmatprep.subr.mxu0 %v4859_v19 }
 0x77f   : > { %4627 = vmatpush3.msra.mxu0 %v4274_v34 }
 0x780   : > { %4628 = vmatprep.subr.mxu0 %v4859_v19 }
 0x781   : > { %4629 = vmatpush3.msra.mxu0 %v4273_v62 }
 0x782   : > { %4630 = vmatprep.subr.mxu0 %v4859_v19 }
 0x783   : > { %4631 = vmatpush3.msra.mxu0 %v4272_v21 }
 0x784   : > { %4632 = vmatprep.subr.mxu0 %v4859_v19 }
 0x785   : > { %4633 = vmatpush3.msra.mxu0 %v4271_v36 }
 0x786   : > { %4634 = vmatprep.subr.mxu0 %v4859_v19 }
 0x787   : > { %4635 = vmatpush3.msra.mxu0 %v4270_v22 }
 0x788   : > { %4636 = vmatprep.subr.mxu0 %v4859_v19 }
 0x789   : > { %4637 = vmatpush3.msra.mxu0 %v4269_v26 }
 0x78a   : > { %4638 = vmatprep.subr.mxu0 %v4859_v19 }
 0x78b   : > { %4639 = vmatpush3.msra.mxu0 %v4268_v37 }
 0x78c   : > { %4640 = vmatprep.subr.mxu0 %v4859_v19 }
 0x78d   : > { %4641 = vmatpush3.msra.mxu0 %v4267_v39 }
 0x78e   : > { %4642 = vmatprep.subr.mxu0 %v4859_v19 }
 0x78f   : > { %4643 = vmatpush3.msra.mxu0 %v4266_v41 }
 0x790   : > { %4644 = vmatprep.subr.mxu0 %v4859_v19 }
 0x791   : > { %4645 = vmatpush3.msra.mxu0 %v4265_v3 }
 0x792   : > { %4646 = vmatprep.subr.mxu0 %v4859_v19  ;;  %v4279_v19 = vld [vmem:[%s7424_s10] sm:$0x1] }
 0x793   : > { %4647 = vmatpush3.msra.mxu0 %v4264_v51 }
 0x836   : > { %v4563_v1 = vpop.f32.mrf.mxu0  ;;  %v4258_v20 = vpop.f32.mrf.mxu1 }
 0x838   : > { %v4564_v17 = vpop.f32.mrf.mxu0  ;;  %v4260_v53 = vpop.f32.mrf.mxu1 }
 0x839   : > { %v4565_v44 = vadd.f32 %v4564_v17, %v4563_v1 }
 0x83a   : > { %v4566_v56 = vpop.f32.mrf.mxu0  ;;  %v4261_v54 = vpop.f32.mrf.mxu1 }
 0x83b   : > { %v4219_v8 = vadd.f32 %v4565_v44, %v4030_v47 }
 0x83c   : > { %v4567_v4 = vpop.f32.mrf.mxu0  ;;  %v4262_v25 = vpop.f32.mrf.mxu1 }
 0x83d   : > { %v4259_v0 = vadd.f32 %v4258_v20, %v4219_v8 }
 0x83f   : > { %4649 = vmatmul.mubr.msk.f32.vlgmr.msra.gmra.mxu0 %vm4280_vm8, %v4259_v0 }
 0x8ff   : > { %v4350_v2 = vpop.f32.mrf.mxu0 }
 0x900   : > { %v4351_v52 = vadd.f32 %v4350_v2, %v4279_v19 }
 0x901   : > { %v4650_v32 = vpop.f32.mrf.mxu0 }
 0x902   : > { %4355 = vst.msk [vmem:[%s376_s16] sm:$0x1] %vm4354_vm9, %v4351_v52 }
 0x903   : > { %4801 = shalt.err (!%p4798_p3)
}
 0x904   : > { %s4802_s13 = scalar_lea.hbm %s7379_s24, 16  ;;  %s4806_s12 = scalar_lea.hbm %s7425_s11, 32 }
 0x905   : > { %p4803_p4 = scmp.ne.s32.totalorder %s7379_s24, %s4802_s13  ;;  %p4807_p9 = scmp.lt.s32.totalorder %s7379_s24, %s7425_s11 }
 0x906   : > { %p4808_p10 = scmp.lt.s32.totalorder %s4806_s12, %s4802_s13 }
 0x907   : > { %p4804_p7 = pnand %p4803_p4, %p4979_p5 }
 0x908   : > { %p4809_p11 = por %p4808_p10, %p4807_p9 }
 0x909   : > { %p4805_p8 = pneg %p4804_p7 }
 0x90b   : > { %p4810_p12 = pnand %p4809_p11, %p4805_p8 }
 0x90d   : > { %4813 = shalt.err (!%p4810_p12)
}
 0x90e   : > { %4652 = dma.vmem_to_hbm [thread:$0]  (%p4979_p5), %s4370_s14, 16, %s7379_s24, %s4357_s22  }
 0x90f PF: > { %p4658_p13 = scmp.ge.s32.totalorder %s4848_s20, 2  ;;  %s4381_s25 = sand.u32 1, %s4836_s17  }
 0x910   : > { %s4382_s15 = scalar_lea.sflag [#allocation8], %s4381_s25 }
 0x911   : > { %p4655_p0 = pnand %p4658_p13, %p4983_p6 }
 0x913   : > { %p4656_p1 = pneg %p4655_p0 }
 0x915   : > { %4831 = dma.done.wait (%p4656_p1), %s4382_s15, 16  }
 0x916   : > { %4833 = vsyncadd (%p4656_p1), %s4382_s15, 4294967280  ;;  %p21_p2 = scmp.ge.s32.totalorder %s4966_s23, 4   ;;  %s7563_s17 = smov %s4840_s18 }
 0x917   : > { %s7564_s18 = smov %s4844_s19  ;;  %s7565_s19 = smov %s4977_s26 }
 0x918   : > { %s7566_s20 = smov %s4966_s23  ;;  %23 = sbr.rel (!%p21_p2) target bundleno = 5 (0x5), region = 115 }
 0x91d   :  { %4386 = vsyncpa [#allocation8], 1 }
 0x91e   :  { %4388 = vsyncpa [#allocation8 + $0x1], 1 }

</bundles_post_ra>
